<compile_context>
chip_gen: v6e
topology: v6e:2x2x1
jax: 0.10.0
libtpu: 0.0.40
codegen_flags: <defaults>
</compile_context>

<pallas_src>
import functools

import jax
import jax.numpy as jnp
from jax.experimental import pallas as pl
from jax.experimental.pallas import tpu as pltpu


# ----------------------------- Pallas kernel --------------------------------
def cfa_score_kernel(x_ref, w_ref, b_ref, c2_ref, csq_ref, out_ref):
    x = x_ref[...]          # (Cin2, TN)   bf16
    w = w_ref[...]          # (Cout, Cin2) bf16
    b = b_ref[...]          # (Cout, 1)    f32
    c2 = c2_ref[...]        # (M, Cout)    bf16  == -2 * C^T
    csq = csq_ref[...]      # (M, 1)       f32   == |C_m|^2

    # 1x1 CoordConv as a matmul: phi_p columns (Descriptor.forward output).
    phi = jnp.dot(w, x, preferred_element_type=jnp.float32) + b          # (Cout, TN) f32

    # Squared distance to every centroid: |phi|^2 + |C|^2 - 2 phi.C
    feat = jnp.sum(phi * phi, axis=0, keepdims=True)                     # (1, TN)
    cross = jnp.dot(c2, phi.astype(jnp.bfloat16),
                    preferred_element_type=jnp.float32)                  # (M, TN)
    dsq = cross + feat + csq                                             # (M, TN)

    # Top-3 smallest squared distances along the centroid (sublane) axis,
    # via value masking.  (Exact ties mask all copies; with f32 random data
    # ties are essentially impossible -- noted vs torch.topk index semantics.)
    inf = jnp.float32(jnp.inf)
    d1 = jnp.min(dsq, axis=0, keepdims=True)                             # (1, TN)
    rest = jnp.where(dsq == d1, inf, dsq)
    d2 = jnp.min(rest, axis=0, keepdims=True)
    rest = jnp.where(rest == d2, inf, rest)
    d3 = jnp.min(rest, axis=0, keepdims=True)

    # sqrt only on the three winners, clamped against tiny negative cancellation.
    s1 = jnp.sqrt(jnp.maximum(d1, 0.0))
    s2 = jnp.sqrt(jnp.maximum(d2, 0.0))
    s3 = jnp.sqrt(jnp.maximum(d3, 0.0))

    # softmin over (s1, s2, s3), weight at index 0 (the min), times the min distance.
    # stable form: w0 = 1 / (1 + exp(s1-s2) + exp(s1-s3)), exponents <= 0.
    denom = 1.0 + jnp.exp(s1 - s2) + jnp.exp(s1 - s3)
    out_ref[...] = pl.reciprocal(denom, approx=True) * s1                # (1, TN)


def _const_spec(shape, single_buffer):
    """BlockSpec for a grid-invariant operand; single-buffered when supported."""
    index_map = lambda i: (0,) * len(shape)
    if single_buffer:
        return pl.BlockSpec(shape, index_map, pipeline_mode=pl.Buffered(buffer_count=1))
    return pl.BlockSpec(shape, index_map)


def dsvdd_score(x_t, w_t, b_t, c2_t, c_sq, *, tile_n=256, single_buffer=True,
                vmem_limit_bytes=64 * 1024 * 1024):
    """Fused CoordConv + centroid-distance score. Returns (N,) f32 scores."""
    cin2, n = x_t.shape
    m, cout = c2_t.shape

    # Pad N to a tile multiple (real CFA shapes, e.g. B*56*56, are not multiples of 256).
    n_tiles = pl.cdiv(n, tile_n)
    n_pad = n_tiles * tile_n
    if n_pad != n:
        x_t = jnp.pad(x_t, ((0, 0), (0, n_pad - n)))

    # bf16 MXU operands, f32 accumulation; bias / |C|^2 stay f32 (VPU-side adds).
    x_bf = x_t.astype(jnp.bfloat16)
    w_bf = w_t.astype(jnp.bfloat16)
    c2_bf = c2_t.astype(jnp.bfloat16)

    out = pl.pallas_call(
        cfa_score_kernel,
        out_shape=jax.ShapeDtypeStruct((1, n_pad), jnp.float32),
        grid=(n_tiles,),
        in_specs=[
            pl.BlockSpec((cin2, tile_n), lambda i: (0, i)),
            _const_spec((cout, cin2), single_buffer),
            _const_spec((cout, 1), single_buffer),
            _const_spec((m, cout), single_buffer),
            _const_spec((m, 1), single_buffer),
        ],
        out_specs=pl.BlockSpec((1, tile_n), lambda i: (0, i)),
        compiler_params=pltpu.CompilerParams(
            dimension_semantics=("parallel",),
            vmem_limit_bytes=vmem_limit_bytes,
        ),
    )(x_bf, w_bf, b_t, c2_bf, c_sq)
    # TODO(synk): at real CFA sizes on v7x (64 MiB VMEM), split M onto a second
    # 'arbitrary' grid axis with a running top-3 merge in VMEM scratch.
    return out[0, :n]


# ------------------------------ JAX glue -------------------------------------
# Descriptor preprocessing (avg_pool / bilinear resize / concat) is layout glue,
# kept in plain JAX; the conv / distance / top-k hot path runs in the kernel above.
def avg_pool_3x3_same(x_nchw):
    # F.avg_pool2d(x, 3, 1, 1) with count_include_pad=True (PyTorch default)
    s = jax.lax.reduce_window(
        x_nchw, 0.0, jax.lax.add,
        window_dimensions=(1, 1, 3, 3),
        window_strides=(1, 1, 1, 1),
        padding=((0, 0), (0, 0), (1, 1), (1, 1)),
    )
    return s / 9.0


def bilinear_resize_nchw(x, h, w):
    b, c = x.shape[0], x.shape[1]
    # matches F.interpolate(mode='bilinear', align_corners=False) half-pixel centers
    return jax.image.resize(x, (b, c, h, w), method="bilinear")


def descriptor_sample(pyramid):
    sample = None
    for o in pyramid:
        o = avg_pool_3x3_same(o)  # cnn == 'wrn50_2' branch (no /channels)
        if sample is None:
            sample = o
        else:
            sample = jnp.concatenate(
                [sample, bilinear_resize_nchw(o, sample.shape[2], sample.shape[3])],
                axis=1,
            )
    return sample


def add_coords(x_nchw):
    # CoordConv2d: append x / y coordinate channels normalized to [-1, 1]
    b, _, h, w = x_nchw.shape
    xx = jnp.linspace(-1.0, 1.0, w, dtype=jnp.float32)
    yy = jnp.linspace(-1.0, 1.0, h, dtype=jnp.float32)
    xx_ch = jnp.broadcast_to(xx[None, None, None, :], (b, 1, h, w))
    yy_ch = jnp.broadcast_to(yy[None, None, :, None], (b, 1, h, w))
    return jnp.concatenate([x_nchw, xx_ch, yy_ch], axis=1)


@functools.partial(jax.jit, static_argnames=("single_buffer",))
def dsvdd_forward(pyramid, w_conv, b_conv, centers, single_buffer=True):
    """Eval-mode CFA forward: Descriptor (CoordConv phi_p) + DSVDD score.

    Returns (loss, score) with score shaped (B, 1, H, W)."""
    sample = descriptor_sample(pyramid)                 # (B, dim, H, W)
    sample = add_coords(sample)                         # (B, dim+2, H, W)
    b, cin2, h, w = sample.shape

    # channels-first, spatially flattened, transposed layout for the kernel
    x_t = sample.reshape(b, cin2, h * w).transpose(1, 0, 2).reshape(cin2, b * h * w)

    # grid-invariant operands precomputed once (hoisted |C|^2, folded -2 scale)
    w_t = jnp.transpose(w_conv)                         # (Cout, Cin2)
    b_t = jnp.reshape(b_conv, (-1, 1))                  # (Cout, 1)
    c_sq = jnp.sum(centers * centers, axis=0).reshape(-1, 1)   # (M, 1)
    c2_t = jnp.transpose(-2.0 * centers)                # (M, Cout)

    score_flat = dsvdd_score(x_t, w_t, b_t, c2_t, c_sq,
                             single_buffer=single_buffer)      # (B*H*W,)
    score = score_flat.reshape(b, 1, h, w)
    loss = jnp.float32(0.0)  # eval mode (self.training == False) => loss = 0
    # TODO(synk): training-mode _soft_boundary loss (r, nu, alpha, K+J top-k) not
    # implemented; eval forward returns loss == 0 exactly as the PyTorch module does.
    return loss, score


# ------------------------------ main ------------------------------------------
if __name__ == "__main__":
    key = jax.random.PRNGKey(0)
    keys = jax.random.split(key, 6)

    # Small synthetic stand-in for the wrn50_2 feature pyramid `x = model(p)`.
    B = 2
    chans = (8, 16, 32)          # concat -> dim = 56   (real wrn50_2: 256+512+1024=1792)
    spats = (16, 8, 4)
    gamma_d = 1
    gamma_c = 1
    dim = sum(chans)             # 56
    c_out = dim // gamma_d       # 56
    scale = spats[0]             # 16  (self.scale)
    M = scale * scale // gamma_c  # 256 memorized centroids

    pyramid = tuple(
        jax.random.normal(keys[i], (B, chans[i], spats[i], spats[i]), jnp.float32)
        for i in range(3)
    )

    # CoordConv2d(dim, c_out, 1) parameters, deterministic, in matmul layout.
    w_conv = 0.05 * jax.random.normal(keys[3], (dim + 2, c_out), jnp.float32)
    b_conv = 0.01 * jax.random.normal(keys[4], (1, c_out), jnp.float32)
    # self.C memorized patch features: (c_out, M)
    centers = 0.05 * jax.random.normal(keys[5], (c_out, M), jnp.float32)

    try:
        loss, score = dsvdd_forward(pyramid, w_conv, b_conv, centers, single_buffer=True)
        jax.block_until_ready(score)
    except Exception:
        # Fallback if pl.Buffered(1) single-buffering is unsupported on this build:
        # identical kernel, default double-buffered constant operands.
        loss, score = dsvdd_forward(pyramid, w_conv, b_conv, centers, single_buffer=False)
        jax.block_until_ready(score)

    assert score.shape == (B, 1, scale, scale), score.shape
    assert bool(jnp.all(jnp.isfinite(score)))
    print("KERNEL_OK")
</pallas_src>

<mosaic_0001>
module attributes {stable_mosaic.version = 11 : i64} {
  func.func @cfa_score_kernel(%arg0: i32, %arg1: memref<58x256xbf16, #tpu.memory_space<vmem>>, %arg2: memref<56x58xbf16, #tpu.memory_space<vmem>>, %arg3: memref<56x1xf32, #tpu.memory_space<vmem>>, %arg4: memref<256x56xbf16, #tpu.memory_space<vmem>>, %arg5: memref<256x1xf32, #tpu.memory_space<vmem>>, %arg6: memref<1x256xf32, #tpu.memory_space<vmem>>) attributes {dimension_semantics = [#tpu.dimension_semantics<parallel>], iteration_bounds = array<i64: 2>, scalar_prefetch = 0 : i64, scratch_operands = 0 : i64, tpu.core_type = #tpu.core_type<tc>, window_params = [{transform_indices = @transform_0, window_bounds = array<i64: 58, 256>}, {pipeline_mode = #tpu.pipeline_mode<synchronous>, transform_indices = @transform_1, window_bounds = array<i64: 56, 58>}, {pipeline_mode = #tpu.pipeline_mode<synchronous>, transform_indices = @transform_2, window_bounds = array<i64: 56, 1>}, {pipeline_mode = #tpu.pipeline_mode<synchronous>, transform_indices = @transform_3, window_bounds = array<i64: 256, 56>}, {pipeline_mode = #tpu.pipeline_mode<synchronous>, transform_indices = @transform_4, window_bounds = array<i64: 256, 1>}, {transform_indices = @transform_5, window_bounds = array<i64: 1, 256>}]} {
    %c0 = arith.constant 0 : index
    %c0_0 = arith.constant 0 : index
    %0 = vector.load %arg1[%c0, %c0_0] : memref<58x256xbf16, #tpu.memory_space<vmem>>, vector<58x256xbf16>
    %c0_1 = arith.constant 0 : index
    %c0_2 = arith.constant 0 : index
    %1 = vector.load %arg2[%c0_1, %c0_2] : memref<56x58xbf16, #tpu.memory_space<vmem>>, vector<56x58xbf16>
    %c0_3 = arith.constant 0 : index
    %c0_4 = arith.constant 0 : index
    %2 = vector.load %arg3[%c0_3, %c0_4] : memref<56x1xf32, #tpu.memory_space<vmem>>, vector<56x1xf32>
    %c0_5 = arith.constant 0 : index
    %c0_6 = arith.constant 0 : index
    %3 = vector.load %arg4[%c0_5, %c0_6] : memref<256x56xbf16, #tpu.memory_space<vmem>>, vector<256x56xbf16>
    %c0_7 = arith.constant 0 : index
    %c0_8 = arith.constant 0 : index
    %4 = vector.load %arg5[%c0_7, %c0_8] : memref<256x1xf32, #tpu.memory_space<vmem>>, vector<256x1xf32>
    %cst = arith.constant dense<0.000000e+00> : vector<56x256xf32>
    %5 = tpu.matmul %1, %0, %cst {dimension_numbers = #tpu.dot_dimension_numbers<[1], [0], [0], [1], [0, 0, 1, 1], [], []>} : vector<56x58xbf16>, vector<58x256xbf16>, vector<56x256xf32> -> vector<56x256xf32>
    %6 = vector.broadcast %2 : vector<56x1xf32> to vector<56x256xf32>
    %7 = arith.addf %5, %6 : vector<56x256xf32>
    %8 = arith.mulf %7, %7 : vector<56x256xf32>
    %cst_9 = arith.constant dense<0.000000e+00> : vector<256xf32>
    %9 = vector.multi_reduction <add>, %8, %cst_9 [0] : vector<56x256xf32> to vector<256xf32>
    %10 = vector.shape_cast %9 : vector<256xf32> to vector<1x256xf32>
    %11 = arith.truncf %7 : vector<56x256xf32> to vector<56x256xbf16>
    %cst_10 = arith.constant dense<0.000000e+00> : vector<256x256xf32>
    %12 = tpu.matmul %3, %11, %cst_10 {dimension_numbers = #tpu.dot_dimension_numbers<[1], [0], [0], [1], [0, 0, 1, 1], [], []>} : vector<256x56xbf16>, vector<56x256xbf16>, vector<256x256xf32> -> vector<256x256xf32>
    %13 = vector.broadcast %10 : vector<1x256xf32> to vector<256x256xf32>
    %14 = arith.addf %12, %13 : vector<256x256xf32>
    %15 = vector.broadcast %4 : vector<256x1xf32> to vector<256x256xf32>
    %16 = arith.addf %14, %15 : vector<256x256xf32>
    %cst_11 = arith.constant dense<0x7F800000> : vector<256xf32>
    %17 = vector.multi_reduction <minimumf>, %16, %cst_11 [0] : vector<256x256xf32> to vector<256xf32>
    %18 = vector.shape_cast %17 : vector<256xf32> to vector<1x256xf32>
    %19 = vector.broadcast %18 : vector<1x256xf32> to vector<256x256xf32>
    %20 = arith.cmpf oeq, %16, %19 : vector<256x256xf32>
    %cst_12 = arith.constant 0x7F800000 : f32
    %21 = vector.broadcast %cst_12 : f32 to vector<256x256xf32>
    %22 = arith.select %20, %21, %16 : vector<256x256xi1>, vector<256x256xf32>
    %cst_13 = arith.constant dense<0x7F800000> : vector<256xf32>
    %23 = vector.multi_reduction <minimumf>, %22, %cst_13 [0] : vector<256x256xf32> to vector<256xf32>
    %24 = vector.shape_cast %23 : vector<256xf32> to vector<1x256xf32>
    %25 = vector.broadcast %24 : vector<1x256xf32> to vector<256x256xf32>
    %26 = arith.cmpf oeq, %22, %25 : vector<256x256xf32>
    %cst_14 = arith.constant 0x7F800000 : f32
    %27 = vector.broadcast %cst_14 : f32 to vector<256x256xf32>
    %28 = arith.select %26, %27, %22 : vector<256x256xi1>, vector<256x256xf32>
    %cst_15 = arith.constant dense<0x7F800000> : vector<256xf32>
    %29 = vector.multi_reduction <minimumf>, %28, %cst_15 [0] : vector<256x256xf32> to vector<256xf32>
    %30 = vector.shape_cast %29 : vector<256xf32> to vector<1x256xf32>
    %cst_16 = arith.constant 0.000000e+00 : f32
    %31 = vector.broadcast %cst_16 : f32 to vector<1x256xf32>
    %32 = arith.maximumf %18, %31 : vector<1x256xf32>
    %33 = math.sqrt %32 : vector<1x256xf32>
    %cst_17 = arith.constant 0.000000e+00 : f32
    %34 = vector.broadcast %cst_17 : f32 to vector<1x256xf32>
    %35 = arith.maximumf %24, %34 : vector<1x256xf32>
    %36 = math.sqrt %35 : vector<1x256xf32>
    %cst_18 = arith.constant 0.000000e+00 : f32
    %37 = vector.broadcast %cst_18 : f32 to vector<1x256xf32>
    %38 = arith.maximumf %30, %37 : vector<1x256xf32>
    %39 = math.sqrt %38 : vector<1x256xf32>
    %40 = arith.subf %33, %36 : vector<1x256xf32>
    %41 = math.exp %40 : vector<1x256xf32>
    %cst_19 = arith.constant 1.000000e+00 : f32
    %42 = vector.broadcast %cst_19 : f32 to vector<1x256xf32>
    %43 = arith.addf %42, %41 : vector<1x256xf32>
    %44 = arith.subf %33, %39 : vector<1x256xf32>
    %45 = math.exp %44 : vector<1x256xf32>
    %46 = arith.addf %43, %45 : vector<1x256xf32>
    %47 = tpu.reciprocal %46 {approx = true} : vector<1x256xf32> -> vector<1x256xf32>
    %48 = arith.mulf %47, %33 : vector<1x256xf32>
    %c0_20 = arith.constant 0 : index
    %c0_21 = arith.constant 0 : index
    %49 = vector.load %arg6[%c0_20, %c0_21] : memref<1x256xf32, #tpu.memory_space<vmem>>, vector<1x256xf32>
    tpu.vector_store %arg6[%c0_20, %c0_21], %48 {strides = array<i32>} : memref<1x256xf32, #tpu.memory_space<vmem>>, vector<1x256xf32>,
    return
  }
  func.func @transform_0(%arg0: i32) -> (i32, i32) {
    %c0_i32 = arith.constant 0 : i32
    %c0_i32_0 = arith.constant 0 : i32
    return %c0_i32, %arg0 : i32, i32
  }
  func.func @transform_1(%arg0: i32) -> (i32, i32) {
    %c0_i32 = arith.constant 0 : i32
    %c0_i32_0 = arith.constant 0 : i32
    %c0_i32_1 = arith.constant 0 : i32
    return %c0_i32, %c0_i32_0 : i32, i32
  }
  func.func @transform_2(%arg0: i32) -> (i32, i32) {
    %c0_i32 = arith.constant 0 : i32
    %c0_i32_0 = arith.constant 0 : i32
    %c0_i32_1 = arith.constant 0 : i32
    return %c0_i32, %c0_i32_0 : i32, i32
  }
  func.func @transform_3(%arg0: i32) -> (i32, i32) {
    %c0_i32 = arith.constant 0 : i32
    %c0_i32_0 = arith.constant 0 : i32
    %c0_i32_1 = arith.constant 0 : i32
    return %c0_i32, %c0_i32_0 : i32, i32
  }
  func.func @transform_4(%arg0: i32) -> (i32, i32) {
    %c0_i32 = arith.constant 0 : i32
    %c0_i32_0 = arith.constant 0 : i32
    %c0_i32_1 = arith.constant 0 : i32
    return %c0_i32, %c0_i32_0 : i32, i32
  }
  func.func @transform_5(%arg0: i32) -> (i32, i32) {
    %c0_i32 = arith.constant 0 : i32
    %c0_i32_0 = arith.constant 0 : i32
    return %c0_i32, %arg0 : i32, i32
  }
}

module attributes {stable_mosaic.version = 11 : i64} {
  func.func @cfa_score_kernel(%arg0: i32, %arg1: memref<58x256xbf16, #tpu.memory_space<vmem>>, %arg2: memref<56x58xbf16, #tpu.memory_space<vmem>>, %arg3: memref<56x1xf32, #tpu.memory_space<vmem>>, %arg4: memref<256x56xbf16, #tpu.memory_space<vmem>>, %arg5: memref<256x1xf32, #tpu.memory_space<vmem>>, %arg6: memref<1x256xf32, #tpu.memory_space<vmem>>) attributes {dimension_semantics = [#tpu.dimension_semantics<parallel>], iteration_bounds = array<i64: 2>, scalar_prefetch = 0 : i64, scratch_operands = 0 : i64, tpu.core_type = #tpu.core_type<tc>, window_params = [{transform_indices = @transform_0, window_bounds = array<i64: 58, 256>}, {pipeline_mode = #tpu.pipeline_mode<synchronous>, transform_indices = @transform_1, window_bounds = array<i64: 56, 58>}, {pipeline_mode = #tpu.pipeline_mode<synchronous>, transform_indices = @transform_2, window_bounds = array<i64: 56, 1>}, {pipeline_mode = #tpu.pipeline_mode<synchronous>, transform_indices = @transform_3, window_bounds = array<i64: 256, 56>}, {pipeline_mode = #tpu.pipeline_mode<synchronous>, transform_indices = @transform_4, window_bounds = array<i64: 256, 1>}, {transform_indices = @transform_5, window_bounds = array<i64: 1, 256>}]} {
    %c0 = arith.constant 0 : index
    %c0_0 = arith.constant 0 : index
    %0 = vector.load %arg1[%c0, %c0_0] : memref<58x256xbf16, #tpu.memory_space<vmem>>, vector<58x256xbf16>
    %c0_1 = arith.constant 0 : index
    %c0_2 = arith.constant 0 : index
    %1 = vector.load %arg2[%c0_1, %c0_2] : memref<56x58xbf16, #tpu.memory_space<vmem>>, vector<56x58xbf16>
    %c0_3 = arith.constant 0 : index
    %c0_4 = arith.constant 0 : index
    %2 = vector.load %arg3[%c0_3, %c0_4] : memref<56x1xf32, #tpu.memory_space<vmem>>, vector<56x1xf32>
    %c0_5 = arith.constant 0 : index
    %c0_6 = arith.constant 0 : index
    %3 = vector.load %arg4[%c0_5, %c0_6] : memref<256x56xbf16, #tpu.memory_space<vmem>>, vector<256x56xbf16>
    %c0_7 = arith.constant 0 : index
    %c0_8 = arith.constant 0 : index
    %4 = vector.load %arg5[%c0_7, %c0_8] : memref<256x1xf32, #tpu.memory_space<vmem>>, vector<256x1xf32>
    %cst = arith.constant dense<0.000000e+00> : vector<56x256xf32>
    %5 = tpu.matmul %1, %0, %cst {dimension_numbers = #tpu.dot_dimension_numbers<[1], [0], [0], [1], [0, 0, 1, 1], [], []>} : vector<56x58xbf16>, vector<58x256xbf16>, vector<56x256xf32> -> vector<56x256xf32>
    %6 = vector.broadcast %2 : vector<56x1xf32> to vector<56x256xf32>
    %7 = arith.addf %5, %6 : vector<56x256xf32>
    %8 = arith.mulf %7, %7 : vector<56x256xf32>
    %cst_9 = arith.constant dense<0.000000e+00> : vector<256xf32>
    %9 = vector.multi_reduction <add>, %8, %cst_9 [0] : vector<56x256xf32> to vector<256xf32>
    %10 = vector.shape_cast %9 : vector<256xf32> to vector<1x256xf32>
    %11 = arith.truncf %7 : vector<56x256xf32> to vector<56x256xbf16>
    %cst_10 = arith.constant dense<0.000000e+00> : vector<256x256xf32>
    %12 = tpu.matmul %3, %11, %cst_10 {dimension_numbers = #tpu.dot_dimension_numbers<[1], [0], [0], [1], [0, 0, 1, 1], [], []>} : vector<256x56xbf16>, vector<56x256xbf16>, vector<256x256xf32> -> vector<256x256xf32>
    %13 = vector.broadcast %10 : vector<1x256xf32> to vector<256x256xf32>
    %14 = arith.addf %12, %13 : vector<256x256xf32>
    %15 = vector.broadcast %4 : vector<256x1xf32> to vector<256x256xf32>
    %16 = arith.addf %14, %15 : vector<256x256xf32>
    %cst_11 = arith.constant dense<0x7F800000> : vector<256xf32>
    %17 = vector.multi_reduction <minimumf>, %16, %cst_11 [0] : vector<256x256xf32> to vector<256xf32>
    %18 = vector.shape_cast %17 : vector<256xf32> to vector<1x256xf32>
    %19 = vector.broadcast %18 : vector<1x256xf32> to vector<256x256xf32>
    %20 = arith.cmpf oeq, %16, %19 : vector<256x256xf32>
    %cst_12 = arith.constant 0x7F800000 : f32
    %21 = vector.broadcast %cst_12 : f32 to vector<256x256xf32>
    %22 = arith.select %20, %21, %16 : vector<256x256xi1>, vector<256x256xf32>
    %cst_13 = arith.constant dense<0x7F800000> : vector<256xf32>
    %23 = vector.multi_reduction <minimumf>, %22, %cst_13 [0] : vector<256x256xf32> to vector<256xf32>
    %24 = vector.shape_cast %23 : vector<256xf32> to vector<1x256xf32>
    %25 = vector.broadcast %24 : vector<1x256xf32> to vector<256x256xf32>
    %26 = arith.cmpf oeq, %22, %25 : vector<256x256xf32>
    %cst_14 = arith.constant 0x7F800000 : f32
    %27 = vector.broadcast %cst_14 : f32 to vector<256x256xf32>
    %28 = arith.select %26, %27, %22 : vector<256x256xi1>, vector<256x256xf32>
    %cst_15 = arith.constant dense<0x7F800000> : vector<256xf32>
    %29 = vector.multi_reduction <minimumf>, %28, %cst_15 [0] : vector<256x256xf32> to vector<256xf32>
    %30 = vector.shape_cast %29 : vector<256xf32> to vector<1x256xf32>
    %cst_16 = arith.constant 0.000000e+00 : f32
    %31 = vector.broadcast %cst_16 : f32 to vector<1x256xf32>
    %32 = arith.maximumf %18, %31 : vector<1x256xf32>
    %33 = math.sqrt %32 : vector<1x256xf32>
    %cst_17 = arith.constant 0.000000e+00 : f32
    %34 = vector.broadcast %cst_17 : f32 to vector<1x256xf32>
    %35 = arith.maximumf %24, %34 : vector<1x256xf32>
    %36 = math.sqrt %35 : vector<1x256xf32>
    %cst_18 = arith.constant 0.000000e+00 : f32
    %37 = vector.broadcast %cst_18 : f32 to vector<1x256xf32>
    %38 = arith.maximumf %30, %37 : vector<1x256xf32>
    %39 = math.sqrt %38 : vector<1x256xf32>
    %40 = arith.subf %33, %36 : vector<1x256xf32>
    %41 = math.exp %40 : vector<1x256xf32>
    %cst_19 = arith.constant 1.000000e+00 : f32
    %42 = vector.broadcast %cst_19 : f32 to vector<1x256xf32>
    %43 = arith.addf %42, %41 : vector<1x256xf32>
    %44 = arith.subf %33, %39 : vector<1x256xf32>
    %45 = math.exp %44 : vector<1x256xf32>
    %46 = arith.addf %43, %45 : vector<1x256xf32>
    %47 = tpu.reciprocal %46 {approx = true} : vector<1x256xf32> -> vector<1x256xf32>
    %48 = arith.mulf %47, %33 : vector<1x256xf32>
    %c0_20 = arith.constant 0 : index
    %c0_21 = arith.constant 0 : index
    %49 = vector.load %arg6[%c0_20, %c0_21] : memref<1x256xf32, #tpu.memory_space<vmem>>, vector<1x256xf32>
    tpu.vector_store %arg6[%c0_20, %c0_21], %48 {strides = array<i32>} : memref<1x256xf32, #tpu.memory_space<vmem>>, vector<1x256xf32>,
    return
  }
  func.func @transform_0(%arg0: i32) -> (i32, i32) {
    %c0_i32 = arith.constant 0 : i32
    %c0_i32_0 = arith.constant 0 : i32
    return %c0_i32, %arg0 : i32, i32
  }
  func.func @transform_1(%arg0: i32) -> (i32, i32) {
    %c0_i32 = arith.constant 0 : i32
    %c0_i32_0 = arith.constant 0 : i32
    %c0_i32_1 = arith.constant 0 : i32
    return %c0_i32, %c0_i32_0 : i32, i32
  }
  func.func @transform_2(%arg0: i32) -> (i32, i32) {
    %c0_i32 = arith.constant 0 : i32
    %c0_i32_0 = arith.constant 0 : i32
    %c0_i32_1 = arith.constant 0 : i32
    return %c0_i32, %c0_i32_0 : i32, i32
  }
  func.func @transform_3(%arg0: i32) -> (i32, i32) {
    %c0_i32 = arith.constant 0 : i32
    %c0_i32_0 = arith.constant 0 : i32
    %c0_i32_1 = arith.constant 0 : i32
    return %c0_i32, %c0_i32_0 : i32, i32
  }
  func.func @transform_4(%arg0: i32) -> (i32, i32) {
    %c0_i32 = arith.constant 0 : i32
    %c0_i32_0 = arith.constant 0 : i32
    %c0_i32_1 = arith.constant 0 : i32
    return %c0_i32, %c0_i32_0 : i32, i32
  }
  func.func @transform_5(%arg0: i32) -> (i32, i32) {
    %c0_i32 = arith.constant 0 : i32
    %c0_i32_0 = arith.constant 0 : i32
    return %c0_i32, %arg0 : i32, i32
  }
}

</mosaic_0001>

<bundles_post_ra>
// kernel: squeeze.1
= control target key start
LH: loop header
LB: loop body
LE: loop exit
PB: predicated region body
PF: predicated region fallthrough
CT: control target
= control target key end

     0   :  { %s125_s0 = inlined_call_operand.vmem [shape: f32[512], index: 0, kind: input, shape index: {}]   ;;  %s126_s1 = inlined_call_operand.hbm [shape: f32[2,1,16,16], index: 1, kind: output, shape index: {}]  }
   0x1   :  { %v6_v0 = vld [vmem:[%s125_s0] sm:$0xf] }
   0x2   :  { %7 = vst [vmem:[#allocation2] sm:$0xf] %v6_v0 }
   0x3   :  { %2 = vsyncpa [#allocation1], 0  ;;  %s93_s0 = smov 112   ;;  %s94_s8 = smov 80   ;;  %vm9_vm0 = vcmask 130048  }
   0x4   :  { %s95_s9 = smov 96   ;;  %s96_s10 = smov 64  }
   0x5   :  { %s97_s11 = smov 48   ;;  %s98_s12 = smov 32  }
   0x6   :  { %s99_s13 = smov 16   ;;  %s100_s14 = smov [#allocation0]  }
   0x7   :  { %s57_s15 = sshll.u32 %s100_s14, 4  ;;  %s58_s15 = int_to_ptr.vmem [resolvable:$true] %s57_s15 }
   0x8   :  { %s71_s16 = scalar_lea.vmem %s58_s15, 512  ;;  %p76_p1 = scmp.lt.s32.totalorder %s58_s15, %s58_s15 }
   0x9   :  { %v11_v1 = vld [vmem:[#allocation2] sm:$0xf]   ;;  %p72_p0 = scmp.ne.s32.totalorder %s58_s15, %s71_s16  ;;  %p77_p2 = scmp.lt.s32.totalorder %s71_s16, %s71_s16 }
   0xa   :  { %v23_v2 = vld [vmem:[#allocation2] sm:$0xf]   ;;  %12 = vrot.lane.b32.xlu0 %v11_v1, %s93_s0 }
   0xb   :  { %24 = vrot.lane.b32.xlu1 %v23_v2, %s94_s8  ;;  %v17_v3 = vld [vmem:[#allocation2] sm:$0xf]   ;;  %p78_p3 = por %p77_p2, %p76_p1 }
   0xc   :  { %v29_v4 = vld [vmem:[#allocation2] sm:$0xf]  }
   0xd   :  { %v8_v5 = vld [vmem:[#allocation2] sm:$0xf]   ;;  %p79_p4 = pnand %p78_p3, %p72_p0 }
   0xe   :  { %10 = vst.msk [vmem:[#allocation0] ss:$8 sm:$0xf] %vm9_vm0, %v8_v5   ;;  %18 = vrot.lane.b32.xlu0 %v17_v3, %s95_s9  ;;  %v35_v6 = vld [vmem:[#allocation2] sm:$0xf]  }
   0xf   :  { %30 = vrot.lane.b32.xlu1 %v29_v4, %s96_s10  ;;  %v41_v7 = vld [vmem:[#allocation2] sm:$0xf]  }
  0x10   :  { %v47_v8 = vld [vmem:[#allocation2] sm:$0xf]  }
  0x12   :  { %36 = vrot.lane.b32.xlu0 %v35_v6, %s97_s11 }
  0x13   :  { %42 = vrot.lane.b32.xlu1 %v41_v7, %s98_s12 }
  0x16   :  { %48 = vrot.lane.b32.xlu0 %v47_v8, %s99_s13 }
  0x7c   :  { %v13_v9 = vpop.permute.xlu0 %12  }
  0x7d   :  { %v25_v10 = vpop.permute.xlu1 %24   ;;  %16 = vst.msk [vmem:[#allocation0 + $0x1] ss:$8 sm:$0xf] %vm9_vm0, %v13_v9  }
  0x7e   :  { %28 = vst.msk [vmem:[#allocation0 + $0x3] ss:$8 sm:$0xf] %vm9_vm0, %v25_v10  }
  0x80   :  { %v19_v11 = vpop.permute.xlu0 %18  }
  0x81   :  { %v31_v12 = vpop.permute.xlu1 %30   ;;  %22 = vst.msk [vmem:[#allocation0 + $0x2] ss:$8 sm:$0xf] %vm9_vm0, %v19_v11  }
  0x82   :  { %34 = vst.msk [vmem:[#allocation0 + $0x4] ss:$8 sm:$0xf] %vm9_vm0, %v31_v12  }
  0x84   :  { %v37_v13 = vpop.permute.xlu0 %36  }
  0x85   :  { %v43_v14 = vpop.permute.xlu1 %42   ;;  %40 = vst.msk [vmem:[#allocation0 + $0x5] ss:$8 sm:$0xf] %vm9_vm0, %v37_v13  }
  0x86   :  { %46 = vst.msk [vmem:[#allocation0 + $0x6] ss:$8 sm:$0xf] %vm9_vm0, %v43_v14  }
  0x88   :  { %v49_v15 = vpop.permute.xlu0 %48  }
  0x89   :  { %52 = vst.msk [vmem:[#allocation0 + $0x7] ss:$8 sm:$0xf] %vm9_vm0, %v49_v15  }
  0x8a   :  { %82 = shalt.err (!%p79_p4)
}
  0x8b   :  { %60 = dma.vmem_to_hbm [thread:$0]  %s58_s15, 512, %s126_s1, [#allocation1]  }
  0x8c   :  { %91 = dma.done.wait [#allocation1], 512  }
  0x8d   :  { %92 = vsyncadd [#allocation1], 4294966784 }
  0x8e   :  { %62 = vsyncpa [#allocation1], 1 }

// kernel: dsvdd_forward.1
= control target key start
LH: loop header
LB: loop body
LE: loop exit
PB: predicated region body
PF: predicated region fallthrough
CT: control target
= control target key end

     0   :  { %s1993_s18 = smov 0   ;;  %s1995_s19 = smov 0   ;;  %s3603_s0 = inlined_call_operand.vmem [shape: bf16[58,512], index: 0, kind: input, shape index: {}]   ;;  %s3604_s1 = inlined_call_operand.vmem [shape: bf16[56,58], index: 1, kind: input, shape index: {}]   ;;  %s3605_s2 = inlined_call_operand.vmem [shape: f32[56,1], index: 2, kind: input, shape index: {}]   ;;  %s3606_s3 = inlined_call_operand.vmem [shape: bf16[256,56], index: 3, kind: input, shape index: {}]   ;;  %s3607_s4 = inlined_call_operand.vmem [shape: f32[256,1], index: 4, kind: input, shape index: {}]   ;;  %s3608_s5 = inlined_call_operand.vmem [shape: f32[1,512], index: 5, kind: output, shape index: {}]  }
   0x1   :  { %s1997_s20 = smov 0  }
   0x2 LB: > { %s1782_s21 = sadd.s32 4294967295, %s1959_s20   ;;  %s2010_s22 = sadd.s32 1, %s1959_s20   ;;  %s1959_s20 = sphi %s1997_s20, %s3756_s20   ;;  %s1955_s19 = sphi %s1995_s19, %s3755_s19   ;;  %s1951_s18 = sphi %s1993_s18, %s3754_s18  }
   0x3   : > { %s19_s23 = ssub.s32 %s1959_s20, %s2010_s22  ;;  %s22_s24 = sadd.s32 1, %s1955_s19 }
   0x4   : > { %p20_p0 = scmp.eq.s32.totalorder %s19_s23, 0  ;;  %p29_p1 = scmp.ne.s32.totalorder %s1955_s19, %s1951_s18 }
   0x5   : > { %p30_p2 = scmp.eq.s32.totalorder %s1959_s20, 0  ;;  %p1785_p4 = scmp.ge.s32.totalorder %s1959_s20, 2 }
   0x6   : > { %s2019_s25 = scalar_select %p20_p0, %s1955_s19, %s22_s24  }
   0x7   : > { %p31_p3 = por %p30_p2, %p29_p1  ;;  %177 = sbr.rel (%p1785_p4) target bundleno = 20 (0x14), region = 32 }
   0xc   : > { %180 = sbr.rel (!%p31_p3) target bundleno = 20 (0x14), region = 36  ;;  %s182_s26 = sand.u32 (%p31_p3), 1, %s1955_s19  }
   0xd   : > { %s1844_s27 = sshll.u32 (%p31_p3), %s1959_s20, 3  ;;  %s1786_s28 = sshll.u32 (%p31_p3), %s182_s26, 6 }
   0xe   : > { %s187_s6 = scalar_lea.vmem (%p31_p3), %s3603_s0, %s1844_s27  ;;  %s184_s7 = scalar_lea.vmem (%p31_p3), [#allocation2], %s1786_s28 }
   0xf   : > { %v230_v0 = vld [vmem:[%s187_s6] sm:$0xff] (%p31_p3)  ;;  %v232_v1 = vld [vmem:[%s187_s6 + $0x10] sm:$0xff] (%p31_p3) }
  0x10   : > { %v234_v2 = vld [vmem:[%s187_s6 + $0x20] sm:$0xff] (%p31_p3)  ;;  %231 = vst [vmem:[%s184_s7] sm:$0xff] (%p31_p3), %v230_v0  ;;  %233 = vst [vmem:[%s184_s7 + $0x8] sm:$0xff] (%p31_p3), %v232_v1  ;;  %v236_v3 = vld [vmem:[%s187_s6 + $0x30] sm:$0xff] (%p31_p3) }
  0x11   : > { %235 = vst [vmem:[%s184_s7 + $0x10] sm:$0xff] %v234_v2  ;;  %v238_v4 = vld [vmem:[%s187_s6 + $0x40] sm:$0xff]  ;;  %v240_v5 = vld [vmem:[%s187_s6 + $0x50] sm:$0xff]  ;;  %237 = vst [vmem:[%s184_s7 + $0x18] sm:$0xff] %v236_v3 }
  0x12   : > { %239 = vst [vmem:[%s184_s7 + $0x20] sm:$0xff] %v238_v4  ;;  %241 = vst [vmem:[%s184_s7 + $0x28] sm:$0xff] %v240_v5  ;;  %v242_v6 = vld [vmem:[%s187_s6 + $0x60] sm:$0xff]  ;;  %v244_v7 = vld [vmem:[%s187_s6 + $0x70] sm:$0xff] }
  0x13   : > { %243 = vst [vmem:[%s184_s7 + $0x30] sm:$0xff] %v242_v6  ;;  %245 = vst [vmem:[%s184_s7 + $0x38] sm:$0xff] %v244_v7 }
  0x14 PF: > { %p1789_p5 = scmp.ge.s32.totalorder %s1959_s20, 1  ;;  %p250_p6 = scmp.lt.s32.totalorder %s1959_s20, 3 }
  0x16   : > { %p251_p7 = pnand %p1789_p5, %p250_p6 }
  0x18   : > { %254 = sbr.rel (%p251_p7) target bundleno = 781 (0x30d), region = 74 }
  0x1d   : > { %s257_s8 = sand.u32 1, %s1951_s18   ;;  %v1961_v8 = vmov 0   ;;  %vm480_vm0 = vcmask 1044480   ;;  %v311_v15 = vld [vmem:[%s3605_s2 + $0x30] sm:$0xff]  ;;  %v310_v16 = vld [vmem:[%s3605_s2 + $0x28] sm:$0xff]  ;;  %v309_v18 = vld [vmem:[%s3605_s2 + $0x20] sm:$0xff] }
  0x1e   : > { %s1790_s9 = sshll.u32 %s257_s8, 6  ;;  %519 = vmatprep.mubr.bf16.mxu0 %v1961_v8  ;;  %1879 = vset.pattern.permute.xlu0 %v1961_v8  ;;  %v307_v20 = vld [vmem:[%s3605_s2 + $0x10] sm:$0xff]  ;;  %v308_v22 = vld [vmem:[%s3605_s2 + $0x18] sm:$0xff]  ;;  %v305_v23 = vld [vmem:[%s3605_s2] sm:$0xff]  ;;  %vm467_vm1 = vcmask 474112   ;;  %vm733_vm2 = vcmask 1043456  }
  0x1f   : > { %1880 = vset.pattern.permute.xlu1 %v1961_v8  ;;  %832 = vmatprep.mubr.bf16.mxu1 %v1961_v8  ;;  %s259_s10 = scalar_lea.vmem [#allocation2], %s1790_s9  ;;  %v1893_v24 = vld [vmem:[%s3604_s1] sm:$0xff]   ;;  %v306_v25 = vld [vmem:[%s3605_s2 + $0x8] sm:$0xff]  ;;  %v346_v28 = vld [vmem:[%s3607_s4 + $0x10] sm:$0xff]  ;;  %vm684_vm3 = vcmask 457728   ;;  %s1791_s9 = sshll.u32 %s1782_s21, 1 }
  0x20   : > { %v1881_v9 = vld [vmem:[%s259_s10 + $0x34] ss:$8 sps:$4 sm:$0x1f]   ;;  %v1883_v10 = vld [vmem:[%s259_s10 + $0x30] ss:$8 sps:$4 sm:$0x1f]   ;;  %408 = vperm.xlu0 %1879, %v311_v15   ;;  %403 = vperm.xlu1 %1880, %v310_v16  }
  0x21   : > { %1804 = vmatprep.subr.msk.bf16.mxu0 %vm480_vm0, %v1881_v9  ;;  %v1884_v11 = vld [vmem:[%s259_s10 + $0x24] ss:$8 sps:$4 sm:$0xff]   ;;  %v482_v12 = vsel %vm480_vm0, %v1883_v10, 0  ;;  %v1886_v13 = vld [vmem:[%s259_s10 + $0x20] ss:$8 sps:$4 sm:$0xff]   ;;  %v347_v30 = vld [vmem:[%s3607_s4 + $0x18] sm:$0xff] }
  0x22   : > { %496 = vmatpush1.bf16.msra.mxu0 %v482_v12  ;;  %v1887_v14 = vld [vmem:[%s259_s10 + $0x14] ss:$8 sps:$4 sm:$0xff]   ;;  %v1889_v17 = vld [vmem:[%s259_s10 + $0x10] ss:$8 sps:$4 sm:$0xff]   ;;  %v1890_v19 = vld [vmem:[%s259_s10 + $0x4] ss:$8 sps:$4 sm:$0xff]  }
  0x23   : > { %497 = vmatprep.subr.bf16.mxu0 %v1884_v11  ;;  %v1892_v21 = vld [vmem:[%s259_s10] ss:$8 sps:$4 sm:$0xff]   ;;  %v350_v33 = vld [vmem:[%s3607_s4 + $0x30] sm:$0xff]  ;;  %v351_v35 = vld [vmem:[%s3607_s4 + $0x38] sm:$0xff]  ;;  %p285_p8 = scmp.lt.s32.totalorder %s1791_s9, 3 }
  0x24   : > { %398 = vperm.xlu0 %1879, %v309_v18   ;;  %388 = vperm.xlu1 %1880, %v307_v20   ;;  %v344_v26 = vld [vmem:[%s3607_s4] sm:$0xff]  ;;  %v345_v27 = vld [vmem:[%s3607_s4 + $0x8] sm:$0xff]  ;;  %v1895_v34 = vld [vmem:[%s3604_s1 + $0x10] sm:$0xff]  }
  0x25   : > { %v1894_v29 = vld [vmem:[%s3604_s1 + $0x8] sm:$0xff]   ;;  %v348_v31 = vld [vmem:[%s3607_s4 + $0x20] sm:$0xff]  ;;  %v354_v38 = vld [vmem:[%s3607_s4 + $0x50] sm:$0xff]  ;;  %s3758_s9 = smov (!%p285_p8, %s1791_s9), 3 }
  0x26   : > { %498 = vmatpush1.bf16.msra.mxu0 %v1886_v13  ;;  %v349_v32 = vld [vmem:[%s3607_s4 + $0x28] sm:$0xff]  ;;  %v352_v36 = vld [vmem:[%s3607_s4 + $0x40] sm:$0xff]  ;;  %v1896_v39 = vld [vmem:[%s3604_s1 + $0x18] ss:$0 sps:$4 sm:$0xff]   ;;  %s287_s12 = scalar_lea.vmem %s3608_s5, %s3758_s9 }
  0x27   : > { %499 = vmatprep.subr.bf16.mxu0 %v1887_v14  ;;  %v353_v37 = vld [vmem:[%s3607_s4 + $0x48] sm:$0xff]  ;;  %v355_v40 = vld [vmem:[%s3607_s4 + $0x58] sm:$0xff]  ;;  %v356_v41 = vld [vmem:[%s3607_s4 + $0x60] sm:$0xff] }
  0x28   : > { %393 = vperm.xlu0 %1879, %v308_v22   ;;  %378 = vperm.xlu1 %1880, %v305_v23   ;;  %v357_v42 = vld [vmem:[%s3607_s4 + $0x68] sm:$0xff]  ;;  %v358_v43 = vld [vmem:[%s3607_s4 + $0x70] sm:$0xff]  ;;  %v359_v44 = vld [vmem:[%s3607_s4 + $0x78] sm:$0xff] }
  0x29   : > { %v360_v45 = vld [vmem:[%s3607_s4 + $0x80] sm:$0xff]  ;;  %v361_v46 = vld [vmem:[%s3607_s4 + $0x88] sm:$0xff]  ;;  %v362_v47 = vld [vmem:[%s3607_s4 + $0x90] sm:$0xff] }
  0x2a   : > { %500 = vmatpush1.bf16.msra.mxu0 %v1889_v17  ;;  %v363_v48 = vld [vmem:[%s3607_s4 + $0x98] sm:$0xff]  ;;  %v364_v49 = vld [vmem:[%s3607_s4 + $0xa0] sm:$0xff]  ;;  %v365_v50 = vld [vmem:[%s3607_s4 + $0xa8] sm:$0xff] }
  0x2b   : > { %501 = vmatprep.subr.bf16.mxu0 %v1890_v19  ;;  %v366_v51 = vld [vmem:[%s3607_s4 + $0xb0] sm:$0xff]  ;;  %v367_v52 = vld [vmem:[%s3607_s4 + $0xb8] sm:$0xff]  ;;  %v368_v53 = vld [vmem:[%s3607_s4 + $0xc0] sm:$0xff] }
  0x2c   : > { %383 = vperm.xlu0 %1879, %v306_v25   ;;  %935 = vperm.xlu1 %1880, %v344_v26   ;;  %v369_v54 = vld [vmem:[%s3607_s4 + $0xc8] sm:$0xff]  ;;  %v370_v55 = vld [vmem:[%s3607_s4 + $0xd0] sm:$0xff]  ;;  %v371_v56 = vld [vmem:[%s3607_s4 + $0xd8] sm:$0xff] }
  0x2d   : > { %v372_v57 = vld [vmem:[%s3607_s4 + $0xe0] sm:$0xff]  ;;  %v373_v58 = vld [vmem:[%s3607_s4 + $0xe8] sm:$0xff]  ;;  %v374_v59 = vld [vmem:[%s3607_s4 + $0xf0] sm:$0xff] }
  0x2e   : > { %502 = vmatpush1.bf16.msra.mxu0 %v1892_v21  ;;  %v375_v60 = vld [vmem:[%s3607_s4 + $0xf8] sm:$0xff] }
  0x30   : > { %940 = vperm.xlu0 %1879, %v345_v27   ;;  %945 = vperm.xlu1 %1880, %v346_v28  }
  0x31   : > { %1805 = vmatmul.mubr.msk.bf16.vlgmr.msra.gmra.mxu0 %vm467_vm1, %v1893_v24 }
  0x32   : > { %529 = vmatprep.mubr.bf16.mxu0 %v1961_v8 }
  0x34   : > { %950 = vperm.xlu0 %1879, %v347_v30   ;;  %955 = vperm.xlu1 %1880, %v348_v31  }
  0x38   : > { %960 = vperm.xlu0 %1879, %v349_v32   ;;  %965 = vperm.xlu1 %1880, %v350_v33  }
  0x39   : > { %1806 = vmatmul.mubr.msk.bf16.gmra.mxu0 %vm467_vm1, %v1894_v29 }
  0x3a   : > { %539 = vmatprep.mubr.bf16.mxu0 %v1961_v8 }
  0x3c   : > { %970 = vperm.xlu0 %1879, %v351_v35   ;;  %975 = vperm.xlu1 %1880, %v352_v36  }
  0x40   : > { %980 = vperm.xlu0 %1879, %v353_v37   ;;  %985 = vperm.xlu1 %1880, %v354_v38  }
  0x41   : > { %1807 = vmatmul.mubr.msk.bf16.gmra.mxu0 %vm467_vm1, %v1895_v34 }
  0x42   : > { %549 = vmatprep.mubr.bf16.mxu0 %v1961_v8 }
  0x44   : > { %990 = vperm.xlu0 %1879, %v355_v40   ;;  %995 = vperm.xlu1 %1880, %v356_v41  }
  0x48   : > { %1000 = vperm.xlu0 %1879, %v357_v42   ;;  %1005 = vperm.xlu1 %1880, %v358_v43  }
  0x49   : > { %1808 = vmatmul.mubr.msk.bf16.gmra.mxu0 %vm467_vm1, %v1896_v39 }
  0x4a   : > { %772 = vmatprep.mubr.bf16.mxu0 %v1961_v8 }
  0x4c   : > { %1010 = vperm.xlu0 %1879, %v359_v44   ;;  %1015 = vperm.xlu1 %1880, %v360_v45  }
  0x50   : > { %1020 = vperm.xlu0 %1879, %v361_v46   ;;  %1025 = vperm.xlu1 %1880, %v362_v47  }
  0x54   : > { %1030 = vperm.xlu0 %1879, %v363_v48   ;;  %1035 = vperm.xlu1 %1880, %v364_v49  }
  0x58   : > { %1040 = vperm.xlu0 %1879, %v365_v50   ;;  %1045 = vperm.xlu1 %1880, %v366_v51  }
  0x5c   : > { %1050 = vperm.xlu0 %1879, %v367_v52   ;;  %1055 = vperm.xlu1 %1880, %v368_v53  }
  0x60   : > { %1060 = vperm.xlu0 %1879, %v369_v54   ;;  %1065 = vperm.xlu1 %1880, %v370_v55  }
  0x64   : > { %1070 = vperm.xlu0 %1879, %v371_v56   ;;  %1075 = vperm.xlu1 %1880, %v372_v57  }
  0x68   : > { %1080 = vperm.xlu0 %1879, %v373_v58   ;;  %1085 = vperm.xlu1 %1880, %v374_v59  }
  0x6c   : > { %1090 = vperm.xlu0 %1879, %v375_v60  }
  0x9b   : > { %v409_v61 = vpop.permute.xlu0 %408  ;;  %v404_v62 = vpop.permute.xlu1 %403 }
  0x9f   : > { %v399_v63 = vpop.permute.xlu0 %398  ;;  %v389_v0 = vpop.permute.xlu1 %388 }
  0xa3   : > { %v394_v1 = vpop.permute.xlu0 %393  ;;  %v379_v3 = vpop.permute.xlu1 %378 }
  0xa7   : > { %v384_v6 = vpop.permute.xlu0 %383 }
  0xf1   : > { %v521_v2 = vpop.f32.mrf.mxu0 }
  0xf2   : > { %v2171_v5 = vadd.f32 %v521_v2, %v379_v3 }
  0xf3   : > { %v523_v4 = vpop.f32.mrf.mxu0 }
  0xf4   : > { %v2173_v9 = vadd.f32 %v523_v4, %v379_v3  ;;  %v558_v12 = vmul.f32 %v2171_v5, %v2171_v5 }
  0xf5   : > { %v525_v7 = vpop.f32.mrf.mxu0 }
  0xf6   : > { %v2175_v10 = vadd.f32 %v525_v7, %v384_v6  ;;  %v559_v16 = vmul.f32 %v2173_v9, %v2173_v9  ;;  %v1897_v7 = vld [vmem:[%s3606_s3] sm:$0xff]  }
  0xf7   : > { %v527_v11 = vpop.f32.mrf.mxu0 }
  0xf8   : > { %v560_v13 = vmul.f32 %v2175_v10, %v2175_v10  ;;  %v2181_v14 = vadd.f32 %v527_v11, %v384_v6  ;;  %v596_v6 = vpack.c.bf16 %v2175_v10, %v2171_v5  ;;  %v1898_v11 = vld [vmem:[%s3606_s3 + $0x30] sm:$0xff]   ;;  %v1899_v5 = vld [vmem:[%s3606_s3 + $0x8] sm:$0xff]  }
  0xf9   : > { %v531_v15 = vpop.f32.mrf.mxu0  ;;  %v1901_v10 = vld [vmem:[%s3606_s3 + $0x10] sm:$0xff]  }
  0xfa   : > { %v572_v17 = vadd.f32 %v560_v13, %v558_v12  ;;  %v561_v18 = vmul.f32 %v2181_v14, %v2181_v14  ;;  %v532_v19 = vadd.f32 %v531_v15, %v389_v0  ;;  %v597_v4 = vpack.c.bf16 %v2181_v14, %v2173_v9  ;;  %v1900_v9 = vld [vmem:[%s3606_s3 + $0x38] sm:$0xff]   ;;  %v1902_v12 = vld [vmem:[%s3606_s3 + $0x40] sm:$0xff]   ;;  %v1904_v14 = vld [vmem:[%s3606_s3 + $0x48] sm:$0xff]  }
  0xfb   : > { %v533_v20 = vpop.f32.mrf.mxu0  ;;  %v1903_v13 = vld [vmem:[%s3606_s3 + $0x18] sm:$0xff]   ;;  %v1905_v15 = vld [vmem:[%s3606_s3 + $0x20] sm:$0xff]  }
  0xfc   : > { %v584_v21 = vadd.f32 %v561_v18, %v559_v16  ;;  %v562_v22 = vmul.f32 %v532_v19, %v532_v19  ;;  %v534_v23 = vadd.f32 %v533_v20, %v389_v0  ;;  %v1906_v16 = vld [vmem:[%s3606_s3 + $0x50] sm:$0xff]   ;;  %v1908_v18 = vld [vmem:[%s3606_s3 + $0x58] sm:$0xff]   ;;  %v1910_v20 = vld [vmem:[%s3606_s3 + $0x68] sm:$0xff]  }
  0xfd   : > { %v535_v24 = vpop.f32.mrf.mxu0 }
  0xfe   : > { %v573_v25 = vadd.f32 %v572_v17, %v562_v22  ;;  %v563_v26 = vmul.f32 %v534_v23, %v534_v23  ;;  %v536_v27 = vadd.f32 %v535_v24, %v394_v1  ;;  %v1907_v17 = vld [vmem:[%s3606_s3 + $0x28] sm:$0xff]   ;;  %v1912_v22 = vld [vmem:[%s3606_s3 + $0x78] sm:$0xff]   ;;  %v2275_v24 = vpop.permute.xlu0 %940 }
  0xff   : > { %v537_v28 = vpop.f32.mrf.mxu0 }
 0x100   : > { %v585_v29 = vadd.f32 %v584_v21, %v563_v26  ;;  %v564_v30 = vmul.f32 %v536_v27, %v536_v27  ;;  %v538_v31 = vadd.f32 %v537_v28, %v394_v1  ;;  %v1911_v21 = vld [vmem:[%s3606_s3 + $0x70] sm:$0xff]  }
 0x101   : > { %v541_v32 = vpop.f32.mrf.mxu0 }
 0x102   : > { %v574_v33 = vadd.f32 %v573_v25, %v564_v30  ;;  %v565_v34 = vmul.f32 %v538_v31, %v538_v31  ;;  %v542_v35 = vadd.f32 %v541_v32, %v399_v63  ;;  %v599_v3 = vpack.c.bf16 %v538_v31, %v534_v23  ;;  %v2273_v23 = vpop.permute.xlu1 %935  ;;  %v2279_v26 = vpop.permute.xlu0 %950 }
 0x103   : > { %v543_v36 = vpop.f32.mrf.mxu0 }
 0x104   : > { %v586_v37 = vadd.f32 %v585_v29, %v565_v34  ;;  %v566_v38 = vmul.f32 %v542_v35, %v542_v35  ;;  %v544_v39 = vadd.f32 %v543_v36, %v399_v63 }
 0x105   : > { %v545_v40 = vpop.f32.mrf.mxu0 }
 0x106   : > { %v575_v41 = vadd.f32 %v574_v33, %v566_v38  ;;  %v567_v42 = vmul.f32 %v544_v39, %v544_v39  ;;  %v546_v43 = vadd.f32 %v545_v40, %v404_v62  ;;  %v2277_v25 = vpop.permute.xlu1 %945  ;;  %v2283_v28 = vpop.permute.xlu0 %960 }
 0x107   : > { %v547_v44 = vpop.f32.mrf.mxu0 }
 0x108   : > { %v587_v45 = vadd.f32 %v586_v37, %v567_v42  ;;  %v568_v46 = vmul.f32 %v546_v43, %v546_v43  ;;  %v548_v47 = vadd.f32 %v547_v44, %v404_v62  ;;  %v600_v2 = vpack.c.bf16 %v546_v43, %v542_v35 }
 0x109   : > { %v551_v48 = vpop.f32.mrf.mxu0 }
 0x10a   : > { %v576_v49 = vadd.f32 %v575_v41, %v568_v46  ;;  %v569_v50 = vmul.f32 %v548_v47, %v548_v47  ;;  %v552_v51 = vadd.f32 %v551_v48, %v409_v61  ;;  %v601_v0 = vpack.c.bf16 %v548_v47, %v544_v39  ;;  %v2289_v37 = vpop.permute.xlu0 %970 }
 0x10b   : > { %v553_v52 = vpop.f32.mrf.mxu0 }
 0x10c   : > { %v588_v53 = vadd.f32 %v587_v45, %v569_v50  ;;  %v570_v54 = vmul.f32 %v552_v51, %v552_v51  ;;  %v602_v55 = vpack.c.bf16 %v552_v51, %v552_v51  ;;  %v554_v56 = vadd.f32 %v553_v52, %v409_v61 }
 0x10d   : > { %v555_v57 = vpop.f32.mrf.mxu0  ;;  %v598_v61 = vpack.c.bf16 %v536_v27, %v532_v19  ;;  %v1909_v19 = vld [vmem:[%s3606_s3 + $0x60] sm:$0xff]   ;;  %v2281_v27 = vpop.permute.xlu1 %955 }
 0x10e   : > { %v2187_v58 = vadd.f32 %v576_v49, %v570_v54  ;;  %v571_v59 = vmul.f32 %v554_v56, %v554_v56  ;;  %v603_v60 = vpack.c.bf16 %v554_v56, %v554_v56  ;;  %v735_v62 = vsel %vm733_vm2, %v602_v55, 0  ;;  %v2295_v47 = vpop.permute.xlu0 %980 }
 0x10f   : > { %v556_v63 = vpop.f32.mrf.mxu0 }
 0x110   : > { %v2189_v1 = vadd.f32 %v588_v53, %v571_v59  ;;  %1825 = vmatprep.subr.msk.bf16.mxu0 %vm733_vm2, %v603_v60  ;;  %1845 = vmatprep.subr.msk.bf16.mxu1 %vm733_vm2, %v603_v60  ;;  %v578_v33 = vrot.slane %v2187_v58, 4 }
 0x111   : > { %749 = vmatpush1.bf16.msra.mxu0 %v735_v62  ;;  %1849 = vmatpush1.bf16.msra.mxu1 %v735_v62  ;;  %v2285_v32 = vpop.permute.xlu1 %965 }
 0x112   : > { %750 = vmatprep.subr.bf16.mxu0 %v601_v0  ;;  %1846 = vmatprep.subr.bf16.mxu1 %v601_v0  ;;  %v590_v34 = vrot.slane %v2189_v1, 4  ;;  %v579_v40 = vadd.f32 %v578_v33, %v2187_v58  ;;  %v2305_v59 = vpop.permute.xlu0 %990 }
 0x114   : > { %v591_v41 = vadd.f32 %v590_v34, %v2189_v1  ;;  %v580_v48 = vrot.slane %v579_v40, 2 }
 0x115   : > { %751 = vmatpush1.bf16.msra.mxu0 %v600_v2  ;;  %1850 = vmatpush1.bf16.msra.mxu1 %v600_v2  ;;  %v2293_v44 = vpop.permute.xlu1 %975 }
 0x116   : > { %752 = vmatprep.subr.bf16.mxu0 %v599_v3  ;;  %1847 = vmatprep.subr.bf16.mxu1 %v599_v3  ;;  %v592_v49 = vrot.slane %v591_v41, 2  ;;  %v581_v55 = vadd.f32 %v580_v48, %v579_v40 }
 0x118   : > { %v593_v56 = vadd.f32 %v592_v49, %v591_v41  ;;  %v582_v0 = vrot.slane %v581_v55, 1 }
 0x119   : > { %753 = vmatpush1.bf16.msra.mxu0 %v598_v61  ;;  %1851 = vmatpush1.bf16.msra.mxu1 %v598_v61  ;;  %v2301_v54 = vpop.permute.xlu1 %985 }
 0x11a   : > { %754 = vmatprep.subr.bf16.mxu0 %v597_v4  ;;  %1848 = vmatprep.subr.bf16.mxu1 %v597_v4  ;;  %v594_v1 = vrot.slane %v593_v56, 1 }
 0x11d   : > { %755 = vmatpush1.bf16.msra.mxu0 %v596_v6  ;;  %1852 = vmatpush1.bf16.msra.mxu1 %v596_v6  ;;  %v996_v3 = vpop.permute.xlu1 %995  ;;  %v1001_v6 = vpop.permute.xlu0 %1000 }
 0x120   : > { %1826 = vmatmul.mubr.msk.bf16.vlgmr.msra.gmra.mxu0 %vm684_vm3, %v1897_v7  ;;  %1832 = vmatmul.mubr.msk.bf16.vlgmr.msra.gmra.mxu1 %vm684_vm3, %v1898_v11  ;;  %v2315_v7 = vadd.f32 %v582_v0, %v581_v55  ;;  %v2317_v11 = vadd.f32 %v594_v1, %v593_v56 }
 0x121   : > { %782 = vmatprep.mubr.bf16.mxu0 %v1961_v8  ;;  %842 = vmatprep.mubr.bf16.mxu1 %v1961_v8 }
 0x128   : > { %1827 = vmatmul.mubr.msk.bf16.gmra.mxu0 %vm684_vm3, %v1899_v5  ;;  %1833 = vmatmul.mubr.msk.bf16.gmra.mxu1 %vm684_vm3, %v1900_v9 }
 0x129   : > { %792 = vmatprep.mubr.bf16.mxu0 %v1961_v8  ;;  %852 = vmatprep.mubr.bf16.mxu1 %v1961_v8 }
 0x130   : > { %1828 = vmatmul.mubr.msk.bf16.gmra.mxu0 %vm684_vm3, %v1901_v10  ;;  %1834 = vmatmul.mubr.msk.bf16.gmra.mxu1 %vm684_vm3, %v1902_v12 }
 0x131   : > { %802 = vmatprep.mubr.bf16.mxu0 %v1961_v8  ;;  %862 = vmatprep.mubr.bf16.mxu1 %v1961_v8 }
 0x138   : > { %1829 = vmatmul.mubr.msk.bf16.gmra.mxu0 %vm684_vm3, %v1903_v13  ;;  %1835 = vmatmul.mubr.msk.bf16.gmra.mxu1 %vm684_vm3, %v1904_v14 }
 0x139   : > { %812 = vmatprep.mubr.bf16.mxu0 %v1961_v8  ;;  %872 = vmatprep.mubr.bf16.mxu1 %v1961_v8 }
 0x140   : > { %1830 = vmatmul.mubr.msk.bf16.gmra.mxu0 %vm684_vm3, %v1905_v15  ;;  %1836 = vmatmul.mubr.msk.bf16.gmra.mxu1 %vm684_vm3, %v1906_v16  ;;  %v1006_v16 = vpop.permute.xlu1 %1005 }
 0x141   : > { %822 = vmatprep.mubr.bf16.mxu0 %v1961_v8  ;;  %882 = vmatprep.mubr.bf16.mxu1 %v1961_v8 }
 0x148   : > { %1831 = vmatmul.mubr.msk.bf16.gmra.mxu0 %vm684_vm3, %v1907_v17  ;;  %1837 = vmatmul.mubr.msk.bf16.gmra.mxu1 %vm684_vm3, %v1908_v18 }
 0x149   : > { %892 = vmatprep.mubr.bf16.mxu1 %v1961_v8 }
 0x150   : > { %1838 = vmatmul.mubr.msk.bf16.gmra.mxu1 %vm684_vm3, %v1909_v19 }
 0x151   : > { %902 = vmatprep.mubr.bf16.mxu1 %v1961_v8 }
 0x158   : > { %1839 = vmatmul.mubr.msk.bf16.gmra.mxu1 %vm684_vm3, %v1910_v20 }
 0x159   : > { %912 = vmatprep.mubr.bf16.mxu1 %v1961_v8 }
 0x160   : > { %1840 = vmatmul.mubr.msk.bf16.gmra.mxu1 %vm684_vm3, %v1911_v21 }
 0x161   : > { %922 = vmatprep.mubr.bf16.mxu1 %v1961_v8 }
 0x168   : > { %1841 = vmatmul.mubr.msk.bf16.gmra.mxu1 %vm684_vm3, %v1912_v22 }
 0x1e0   : > { %v774_v29 = vpop.f32.mrf.mxu0  ;;  %v834_v8 = vpop.f32.mrf.mxu1 }
 0x1e1   : > { %v775_v10 = vadd.f32 %v774_v29, %v2315_v7  ;;  %v835_v12 = vadd.f32 %v834_v8, %v2315_v7  ;;  %v2335_v8 = vpop.permute.xlu0 %1010 }
 0x1e2   : > { %v776_v30 = vpop.f32.mrf.mxu0  ;;  %v836_v31 = vpop.f32.mrf.mxu1 }
 0x1e3   : > { %v777_v17 = vadd.f32 %v776_v30, %v2317_v11  ;;  %v837_v19 = vadd.f32 %v836_v31, %v2317_v11  ;;  %v2338_v33 = vadd.f32 %v2273_v23, %v775_v10 }
 0x1e4   : > { %v778_v35 = vpop.f32.mrf.mxu0  ;;  %v838_v36 = vpop.f32.mrf.mxu1 }
 0x1e5   : > { %v779_v20 = vadd.f32 %v778_v35, %v2315_v7  ;;  %v839_v21 = vadd.f32 %v838_v36, %v2315_v7  ;;  %v2358_v49 = vadd.f32 %v996_v3, %v837_v19 }
 0x1e6   : > { %v780_v38 = vpop.f32.mrf.mxu0  ;;  %v840_v39 = vpop.f32.mrf.mxu1 }
 0x1e7   : > { %v841_v13 = vadd.f32 %v840_v39, %v2317_v11  ;;  %v781_v34 = vadd.f32 %v780_v38, %v2317_v11  ;;  %v2342_v39 = vadd.f32 %v996_v3, %v835_v12  ;;  %3675 = vst [vmem:[#allocation5_spill] sm:$0xff] %v2358_v49  ;;  %v2361_v55 = vadd.f32 %v2275_v24, %v779_v20 }
 0x1e8   : > { %v784_v42 = vpop.f32.mrf.mxu0  ;;  %v844_v43 = vpop.f32.mrf.mxu1 }
 0x1e9   : > { %v785_v18 = vadd.f32 %v784_v42, %v2315_v7  ;;  %v2344_v40 = vadd.f32 %v1001_v6, %v841_v13  ;;  %v2351_v42 = vadd.f32 %v2273_v23, %v777_v17  ;;  %v845_v38 = vadd.f32 %v844_v43, %v2315_v7  ;;  %v2368_v23 = vpop.permute.xlu1 %1015  ;;  %v2386_v17 = vpop.permute.xlu0 %1020 }
 0x1ea   : > { %v786_v45 = vpop.f32.mrf.mxu0  ;;  %v846_v46 = vpop.f32.mrf.mxu1  ;;  %v2371_v1 = vadd.f32 %v2275_v24, %v781_v34 }
 0x1eb   : > { %v787_v30 = vadd.f32 %v786_v45, %v2317_v11  ;;  %3673 = vst [vmem:[#allocation3_spill] sm:$0xff] %v2344_v40  ;;  %v847_v31 = vadd.f32 %v846_v46, %v2317_v11  ;;  %3674 = vst [vmem:[#allocation4_spill] sm:$0xff] %v2351_v42  ;;  %v2354_v48 = vadd.f32 %v2277_v25, %v785_v18 }
 0x1ec   : > { %v788_v50 = vpop.f32.mrf.mxu0  ;;  %v2297_v51 = vpop.f32.mrf.mxu1  ;;  %v2363_v46 = vadd.f32 %v1001_v6, %v839_v21  ;;  %v1204_v6 = vmin.f32 %v2344_v40, %v2358_v49 }
 0x1ed   : > { %v789_v35 = vadd.f32 %v788_v50, %v2315_v7  ;;  %v2374_v43 = vadd.f32 %v2277_v25, %v787_v30  ;;  %v2380_v10 = vadd.f32 %v1006_v16, %v847_v31  ;;  %v1157_v25 = vmin.f32 %v2338_v33, %v2354_v48 }
 0x1ee   : > { %v2299_v52 = vpop.f32.mrf.mxu0  ;;  %v850_v53 = vpop.f32.mrf.mxu1  ;;  %v2398_v19 = vadd.f32 %v2297_v51, %v2315_v7 }
 0x1ef   : > { %v851_v50 = vadd.f32 %v850_v53, %v2317_v11  ;;  %3676 = vst [vmem:[#allocation6_spill] sm:$0xff] %v2374_v43  ;;  %3677 = vst [vmem:[#allocation7_spill] sm:$0xff] %v2380_v10  ;;  %v2383_v53 = vadd.f32 %v2279_v26, %v789_v35  ;;  %v1194_v30 = vmin.f32 %v2351_v42, %v2374_v43 }
 0x1f0   : > { %v794_v57 = vpop.f32.mrf.mxu0  ;;  %v2303_v58 = vpop.f32.mrf.mxu1  ;;  %v1206_v35 = vmin.f32 %v1204_v6, %v2380_v10 }
 0x1f1   : > { %v795_v45 = vadd.f32 %v794_v57, %v2315_v7  ;;  %v2403_v20 = vadd.f32 %v2335_v8, %v851_v50 }
 0x1f2   : > { %v796_v60 = vpop.f32.mrf.mxu0  ;;  %v2307_v63 = vpop.f32.mrf.mxu1 }
 0x1f3   : > { %v797_v57 = vadd.f32 %v796_v60, %v2317_v11  ;;  %v2390_v60 = vadd.f32 %v1006_v16, %v845_v38  ;;  %3678 = vst [vmem:[#allocation8_spill] sm:$0xff] %v2403_v20  ;;  %v857_v21 = vadd.f32 %v2307_v63, %v2317_v11  ;;  %v1158_v38 = vmin.f32 %v2361_v55, %v2383_v53 }
 0x1f4   : > { %v798_v62 = vpop.f32.mrf.mxu0  ;;  %v2309_v2 = vpop.f32.mrf.mxu1  ;;  %v1208_v10 = vmin.f32 %v1206_v35, %v2403_v20 }
 0x1f5   : > { %v799_v12 = vadd.f32 %v798_v62, %v2315_v7  ;;  %v791_v62 = vadd.f32 %v2299_v52, %v2317_v11  ;;  %v2412_v31 = vadd.f32 %v2281_v27, %v797_v57 }
 0x1f6   : > { %v2311_v61 = vpop.f32.mrf.mxu0  ;;  %v2313_v4 = vpop.f32.mrf.mxu1 }
 0x1f7   : > { %3679 = vst [vmem:[#allocation9_spill] sm:$0xff] %v2412_v31  ;;  %v2422_v63 = vadd.f32 %v2283_v28, %v799_v12  ;;  %v2436_v12 = vadd.f32 %v2279_v26, %v791_v62 }
 0x1f8   : > { %v804_v5 = vpop.f32.mrf.mxu0  ;;  %v2319_v9 = vpop.f32.mrf.mxu1 }
 0x1f9   : > { %v805_v3 = vadd.f32 %v804_v5, %v2315_v7  ;;  %v2393_v5 = vadd.f32 %v2281_v27, %v795_v45  ;;  %v861_v45 = vadd.f32 %v2313_v4, %v2317_v11  ;;  %v2426_v27 = vpop.permute.xlu1 %1025  ;;  %v2440_v4 = vadd.f32 %v2368_v23, %v857_v21 }
 0x1fa   : > { %v2324_v14 = vpop.f32.mrf.mxu0  ;;  %v2326_v15 = vpop.f32.mrf.mxu1  ;;  %v1160_v21 = vmin.f32 %v1158_v38, %v2422_v63 }
 0x1fb   : > { %v2415_v51 = vadd.f32 %v2285_v32, %v805_v3  ;;  %v1159_v57 = vmin.f32 %v1157_v25, %v2393_v5  ;;  %3681 = vst [vmem:[#allocation11_spill] sm:$0xff] %v2440_v4  ;;  %v867_v40 = vadd.f32 %v2326_v15, %v2317_v11  ;;  %v2456_v35 = vadd.f32 %v2386_v17, %v861_v45 }
 0x1fc   : > { %v808_v22 = vpop.f32.mrf.mxu0  ;;  %v2333_v29 = vpop.f32.mrf.mxu1  ;;  %v1210_v38 = vmin.f32 %v1208_v10, %v2440_v4 }
 0x1fd   : > { %v809_v52 = vadd.f32 %v808_v22, %v2315_v7  ;;  %v807_v22 = vadd.f32 %v2324_v14, %v2317_v11  ;;  %v2446_v14 = vpop.permute.xlu0 %1030  ;;  %3682 = vst [vmem:[#allocation12_spill] sm:$0xff] %v2456_v35  ;;  %v2472_v45 = vadd.f32 %v2426_v27, %v867_v40  ;;  %v2483_v10 = vpop.permute.xlu1 %1035 }
 0x1fe   : > { %v2348_v36 = vpop.f32.mrf.mxu0  ;;  %v870_v41 = vpop.f32.mrf.mxu1  ;;  %v1212_v40 = vmin.f32 %v1210_v38, %v2456_v35 }
 0x1ff   : > { %v2451_v26 = vadd.f32 %v2289_v37, %v809_v52  ;;  %v871_v15 = vadd.f32 %v870_v41, %v2317_v11  ;;  %3683 = vst [vmem:[#allocation13_spill] sm:$0xff] %v2472_v45 }
 0x200   : > { %v814_v56 = vpop.f32.mrf.mxu0  ;;  %v2366_v0 = vpop.f32.mrf.mxu1 }
 0x201   : > { %v815_v18 = vadd.f32 %v814_v56, %v2315_v7  ;;  %v1041_v38 = vpop.permute.xlu0 %1040 }
 0x202   : > { %v816_v13 = vpop.f32.mrf.mxu0  ;;  %v876_v24 = vpop.f32.mrf.mxu1 }
 0x203   : > { %v2432_v3 = vadd.f32 %v2293_v44, %v815_v18  ;;  %v1196_v18 = vmin.f32 %v1194_v30, %v2412_v31  ;;  %v817_v43 = vadd.f32 %v816_v13, %v2317_v11  ;;  %v2461_v30 = vadd.f32 %v2285_v32, %v807_v22 }
 0x204   : > { %v818_v16 = vpop.f32.mrf.mxu0  ;;  %v2407_v34 = vpop.f32.mrf.mxu1  ;;  %v877_v41 = vadd.f32 %v876_v24, %v2317_v11  ;;  %v801_v22 = vadd.f32 %v2311_v61, %v2317_v11  ;;  %v2487_v24 = vadd.f32 %v2446_v14, %v871_v15  ;;  %v1214_v15 = vmin.f32 %v1212_v40, %v2472_v45 }
 0x205   : > { %3680 = vst [vmem:[#allocation10_spill] sm:$0xff] %v2432_v3  ;;  %v819_v6 = vadd.f32 %v818_v16, %v2315_v7  ;;  %v1161_v16 = vmin.f32 %v1159_v57, %v2415_v51  ;;  %v1198_v61 = vmin.f32 %v1196_v18, %v2461_v30 }
 0x206   : > { %v820_v50 = vpop.f32.mrf.mxu0  ;;  %v880_v56 = vpop.f32.mrf.mxu1  ;;  %3684 = vst [vmem:[#allocation14_spill] sm:$0xff] %v2487_v24 }
 0x207   : > { %v1163_v57 = vmin.f32 %v1161_v16, %v2432_v3  ;;  %v2465_v52 = vadd.f32 %v2295_v47, %v819_v6  ;;  %v1162_v6 = vmin.f32 %v1160_v21, %v2451_v26  ;;  %v881_v4 = vadd.f32 %v880_v56, %v2317_v11 }
 0x208   : > { %v824_v25 = vpop.f32.mrf.mxu0  ;;  %v2444_v49 = vpop.f32.mrf.mxu1  ;;  %v811_v21 = vadd.f32 %v2348_v36, %v2317_v11  ;;  %v2514_v36 = vadd.f32 %v2335_v8, %v2398_v19  ;;  %v1195_v8 = vmin.f32 %v2371_v1, %v2436_v12 }
 0x209   : > { %v825_v62 = vadd.f32 %v824_v25, %v2315_v7  ;;  %v2525_v45 = vadd.f32 %v1041_v38, %v881_v4 }
 0x20a   : > { %v826_v42 = vpop.f32.mrf.mxu0  ;;  %v886_v20 = vpop.f32.mrf.mxu1 }
 0x20b   : > { %v2468_v25 = vadd.f32 %v2301_v54, %v825_v62  ;;  %v827_v13 = vadd.f32 %v826_v42, %v2317_v11  ;;  %v2490_v42 = vadd.f32 %v2293_v44, %v817_v43  ;;  %v2504_v44 = vadd.f32 %v2483_v10, %v877_v41  ;;  %3687 = vst [vmem:[#allocation17_spill] sm:$0xff] %v2525_v45 }
 0x20c   : > { %v828_v31 = vpop.f32.mrf.mxu0  ;;  %v2476_v32 = vpop.f32.mrf.mxu1 }
 0x20d   : > { %v1165_v16 = vmin.f32 %v1163_v57, %v2468_v25  ;;  %v829_v62 = vadd.f32 %v828_v31, %v2315_v7  ;;  %v1164_v31 = vmin.f32 %v1162_v6, %v2465_v52  ;;  %3685 = vst [vmem:[#allocation15_spill] sm:$0xff] %v2504_v44  ;;  %v2508_v56 = vadd.f32 %v2301_v54, %v827_v13 }
 0x20e   : > { %v2493_v3 = vpop.f32.mrf.mxu1  ;;  %v855_v6 = vadd.f32 %v2303_v58, %v2315_v7  ;;  %v830_v40 = vpop.f32.mrf.mxu0  ;;  %v1200_v54 = vmin.f32 %v1198_v61, %v2490_v42  ;;  %v821_v13 = vadd.f32 %v820_v50, %v2317_v11  ;;  %v859_v58 = vadd.f32 %v2309_v2, %v2315_v7 }
 0x20f   : > { %v2500_v57 = vadd.f32 %v2305_v59, %v829_v62  ;;  %v1167_v43 = vmin.f32 %v1165_v16, %v2342_v39  ;;  %3686 = vst [vmem:[#allocation16_spill] sm:$0xff] %v2508_v56  ;;  %v2519_v62 = vadd.f32 %v2283_v28, %v801_v22  ;;  %v1205_v16 = vmin.f32 %v2487_v24, %v1214_v15  ;;  %v1046_v22 = vpop.permute.xlu1 %1045 }
 0x210   : > { %v2510_v18 = vpop.f32.mrf.mxu1  ;;  %v2532_v28 = vadd.f32 %v2289_v37, %v811_v21  ;;  %v1202_v50 = vmin.f32 %v1200_v54, %v2508_v56  ;;  %v831_v4 = vadd.f32 %v830_v40, %v2317_v11  ;;  %v2540_v24 = vadd.f32 %v2368_v23, %v855_v6  ;;  %v1051_v21 = vpop.permute.xlu0 %1050 }
 0x211   : > { %v1166_v41 = vmin.f32 %v1164_v31, %v2500_v57  ;;  %v1207_v31 = vmin.f32 %v1205_v16, %v2504_v44  ;;  %v1169_v61 = vmin.f32 %v1167_v43, %v2390_v60  ;;  %v865_v2 = vadd.f32 %v2319_v9, %v2315_v7 }
 0x212   : > { %v896_v35 = vpop.f32.mrf.mxu1  ;;  %v2547_v16 = vadd.f32 %v2295_v47, %v821_v13  ;;  %v887_v54 = vadd.f32 %v886_v20, %v2317_v11  ;;  %v2552_v44 = vadd.f32 %v2386_v17, %v859_v58  ;;  %v869_v23 = vadd.f32 %v2333_v29, %v2315_v7 }
 0x213   : > { %v1168_v19 = vmin.f32 %v1166_v41, %v2363_v46  ;;  %v1197_v41 = vmin.f32 %v1195_v8, %v2519_v62  ;;  %v1209_v43 = vmin.f32 %v1207_v31, %v2525_v45  ;;  %v1171_v6 = vmin.f32 %v1169_v61, %v2540_v24  ;;  %v1056_v31 = vpop.permute.xlu1 %1055 }
 0x214   : > { %v898_v15 = vpop.f32.mrf.mxu1  ;;  %v2559_v8 = vadd.f32 %v2305_v59, %v831_v4  ;;  %v2563_v20 = vadd.f32 %v2426_v27, %v865_v2  ;;  %v875_v17 = vadd.f32 %v2366_v0, %v2315_v7  ;;  %v2568_v58 = vadd.f32 %v1046_v22, %v887_v54 }
 0x215   : > { %v1170_v37 = vmin.f32 %v1168_v19, %v2514_v36  ;;  %v1199_v9 = vmin.f32 %v1197_v41, %v2532_v28  ;;  %v1211_v19 = vmin.f32 %v1209_v43, %v1202_v50  ;;  %v2571_v61 = vadd.f32 %v2446_v14, %v869_v23  ;;  %v1061_v50 = vpop.permute.xlu0 %1060 }
 0x216   : > { %v900_v40 = vpop.f32.mrf.mxu1  ;;  %3688 = vst [vmem:[#allocation18_spill] sm:$0xff] %v2559_v8  ;;  %3689 = vst [vmem:[#allocation19_spill] sm:$0xff] %v2568_v58  ;;  %v879_v59 = vadd.f32 %v2407_v34, %v2315_v7  ;;  %v1173_v4 = vmin.f32 %v1171_v6, %v2563_v20  ;;  %v2580_v43 = vadd.f32 %v2483_v10, %v875_v17 }
 0x217   : > { %v1172_v13 = vmin.f32 %v1170_v37, %v2552_v44  ;;  %v1201_v29 = vmin.f32 %v1199_v9, %v2547_v16  ;;  %v1213_v27 = vmin.f32 %v1211_v19, %v2568_v58  ;;  %v885_v14 = vadd.f32 %v2444_v49, %v2315_v7  ;;  %v1066_v6 = vpop.permute.xlu1 %1065 }
 0x218   : > { %v904_v47 = vpop.f32.mrf.mxu1  ;;  %v891_v54 = vadd.f32 %v2493_v3, %v2317_v11  ;;  %v2586_v23 = vadd.f32 %v1041_v38, %v879_v59  ;;  %v889_v9 = vadd.f32 %v2476_v32, %v2315_v7  ;;  %v1175_v19 = vmin.f32 %v1173_v4, %v2580_v43 }
 0x219   : > { %v1203_v2 = vmin.f32 %v1201_v29, %v2559_v8  ;;  %v1174_v0 = vmin.f32 %v1172_v13, %v2571_v61  ;;  %v1071_v17 = vpop.permute.xlu0 %1070  ;;  %v2592_v58 = vadd.f32 %v1046_v22, %v885_v14  ;;  %v895_v3 = vadd.f32 %v2510_v18, %v2315_v7 }
 0x21a   : > { %v906_v41 = vpop.f32.mrf.mxu1  ;;  %v2594_v49 = vadd.f32 %v1051_v21, %v891_v54  ;;  %v897_v38 = vadd.f32 %v896_v35, %v2317_v11  ;;  %v2599_v45 = vadd.f32 %v1051_v21, %v889_v9  ;;  %v899_v32 = vadd.f32 %v898_v15, %v2315_v7 }
 0x21b   : > { %v1215_v29 = vmin.f32 %v1213_v27, %v1203_v2  ;;  %v1176_v10 = vmin.f32 %v1174_v0, %v2586_v23  ;;  %v901_v4 = vadd.f32 %v900_v40, %v2317_v11  ;;  %v1177_v27 = vmin.f32 %v1175_v19, %v2592_v58  ;;  %v1076_v54 = vpop.permute.xlu1 %1075 }
 0x21c   : > { %v908_v37 = vpop.f32.mrf.mxu1  ;;  %3690 = vst [vmem:[#allocation20_spill] sm:$0xff] %v2594_v49  ;;  %v905_v22 = vadd.f32 %v904_v47, %v2315_v7  ;;  %v2608_v35 = vadd.f32 %v1056_v31, %v895_v3  ;;  %v2610_v21 = vadd.f32 %v1056_v31, %v897_v38  ;;  %v907_v15 = vadd.f32 %v906_v41, %v2317_v11 }
 0x21d   : > { %v1216_v2 = vmin.f32 %v2594_v49, %v1215_v29  ;;  %v1178_v14 = vmin.f32 %v1176_v10, %v2599_v45  ;;  %v909_v18 = vadd.f32 %v908_v37, %v2315_v7  ;;  %v2614_v19 = vadd.f32 %v1061_v50, %v899_v32  ;;  %v1081_v49 = vpop.permute.xlu0 %1080 }
 0x21e   : > { %v910_v34 = vpop.f32.mrf.mxu1  ;;  %3691 = vst [vmem:[#allocation21_spill] sm:$0xff] %v2610_v21  ;;  %v2616_v29 = vadd.f32 %v1061_v50, %v901_v4  ;;  %v1179_v10 = vmin.f32 %v1177_v27, %v2608_v35  ;;  %v2621_v3 = vadd.f32 %v1066_v6, %v905_v22  ;;  %v2628_v50 = vadd.f32 %v1066_v6, %v907_v15 }
 0x21f   : > { %v1217_v37 = vmin.f32 %v2610_v21, %v1216_v2  ;;  %v911_v31 = vadd.f32 %v910_v34, %v2317_v11  ;;  %v1180_v41 = vmin.f32 %v1178_v14, %v2614_v19  ;;  %v1086_v2 = vpop.permute.xlu1 %1085 }
 0x220   : > { %v914_v13 = vpop.f32.mrf.mxu1  ;;  %v1181_v34 = vmin.f32 %v1179_v10, %v2621_v3 }
 0x221   : > { %v915_v40 = vadd.f32 %v914_v13, %v2315_v7  ;;  %v2625_v13 = vadd.f32 %v1071_v17, %v909_v18  ;;  %v1218_v22 = vmin.f32 %v2616_v29, %v1217_v37  ;;  %v2637_v21 = vadd.f32 %v1071_v17, %v911_v31 }
 0x222   : > { %v916_v59 = vpop.f32.mrf.mxu1 }
 0x223   : > { %v2630_v4 = vadd.f32 %v1076_v54, %v915_v40  ;;  %v917_v27 = vadd.f32 %v916_v59, %v2317_v11  ;;  %3692 = vst [vmem:[#allocation22_spill] sm:$0xff] %v2637_v21  ;;  %v1182_v18 = vmin.f32 %v1180_v41, %v2625_v13  ;;  %v1219_v59 = vmin.f32 %v2628_v50, %v1218_v22 }
 0x224   : > { %v918_v0 = vpop.f32.mrf.mxu1 }
 0x225   : > { %v919_v47 = vadd.f32 %v918_v0, %v2315_v7  ;;  %v2646_v37 = vadd.f32 %v1076_v54, %v917_v27 }
 0x226   : > { %v920_v9 = vpop.f32.mrf.mxu1 }
 0x227   : > { %v2633_v8 = vadd.f32 %v1081_v49, %v919_v47  ;;  %v921_v6 = vadd.f32 %v920_v9, %v2317_v11  ;;  %v1183_v47 = vmin.f32 %v1181_v34, %v2630_v4  ;;  %v1220_v9 = vmin.f32 %v2637_v21, %v1219_v59 }
 0x228   : > { %v924_v38 = vpop.f32.mrf.mxu1 }
 0x229   : > { %v925_v32 = vadd.f32 %v924_v38, %v2315_v7  ;;  %v1091_v38 = vpop.permute.xlu0 %1090  ;;  %v1184_v17 = vmin.f32 %v1182_v18, %v2633_v8  ;;  %v2653_v41 = vadd.f32 %v1081_v49, %v921_v6  ;;  %v1221_v34 = vmin.f32 %v2646_v37, %v1220_v9 }
 0x22a   : > { %v926_v0 = vpop.f32.mrf.mxu1 }
 0x22b   : > { %v2641_v15 = vadd.f32 %v1086_v2, %v925_v32  ;;  %v927_v10 = vadd.f32 %v926_v0, %v2317_v11 }
 0x22c   : > { %v928_v14 = vpop.f32.mrf.mxu1 }
 0x22d   : > { %v929_v40 = vadd.f32 %v928_v14, %v2315_v7  ;;  %v1185_v7 = vmin.f32 %v1183_v47, %v2641_v15  ;;  %v2659_v54 = vadd.f32 %v1086_v2, %v927_v10  ;;  %v1222_v14 = vmin.f32 %v2653_v41, %v1221_v34 }
 0x22e   : > { %v930_v56 = vpop.f32.mrf.mxu1 }
 0x22f   : > { %v2650_v31 = vadd.f32 %v1091_v38, %v929_v40  ;;  %v931_v22 = vadd.f32 %v930_v56, %v2317_v11  ;;  %v1223_v40 = vmin.f32 %v2659_v54, %v1222_v14 }
 0x231   : > { %v1186_v32 = vmin.f32 %v1184_v17, %v2650_v31  ;;  %v2662_v18 = vadd.f32 %v1091_v38, %v931_v22 }
 0x233   : > { %v1187_v27 = vmin.f32 %v1185_v7, %v1186_v32  ;;  %v1224_v6 = vmin.f32 %v2662_v18, %v1223_v40 }
 0x235   : > { %v1188_v0 = vrot.slane %v1187_v27, 4  ;;  %v1225_v47 = vrot.slane %v1224_v6, 4 }
 0x237   : > { %v1189_v49 = vmin.f32 %v1187_v27, %v1188_v0  ;;  %v1226_v21 = vmin.f32 %v1224_v6, %v1225_v47 }
 0x239   : > { %v1190_v59 = vrot.slane %v1189_v49, 2  ;;  %v1227_v56 = vrot.slane %v1226_v21, 2 }
 0x23b   : > { %v1191_v17 = vmin.f32 %v1189_v49, %v1190_v59  ;;  %v1228_v2 = vmin.f32 %v1226_v21, %v1227_v56 }
 0x23d   : > { %v1192_v11 = vrot.slane %v1191_v17, 1  ;;  %v1229_v38 = vrot.slane %v1228_v2, 1 }
 0x23f   : > { %v2666_v9 = vmin.f32 %v1191_v17, %v1192_v11  ;;  %v2708_v34 = vmin.f32 %v1228_v2, %v1229_v38 }
 0x241   : > { %vm1231_vm4 = vcmp.eq.f32.partialorder %v2338_v33, %v2666_v9  ;;  %vm1233_vm5 = vcmp.eq.f32.partialorder %v2361_v55, %v2666_v9  ;;  %vm1235_vm6 = vcmp.eq.f32.partialorder %v2354_v48, %v2666_v9  ;;  %vm1237_vm7 = vcmp.eq.f32.partialorder %v2383_v53, %v2666_v9 }
 0x242   : > { %v2677_v10 = vsel %vm1231_vm4, inf, %v2338_v33  ;;  %v2680_v7 = vsel %vm1233_vm5, inf, %v2361_v55  ;;  %v2683_v21 = vsel %vm1235_vm6, inf, %v2354_v48  ;;  %v2686_v32 = vsel %vm1237_vm7, inf, %v2383_v53  ;;  %v3693_v55 = vld [vmem:[#allocation10_spill] sm:$0xff] }
 0x243   : > { %vm1239_vm8 = vcmp.eq.f32.partialorder %v2393_v5, %v2666_v9  ;;  %vm1241_vm9 = vcmp.eq.f32.partialorder %v2422_v63, %v2666_v9  ;;  %vm1243_vm10 = vcmp.eq.f32.partialorder %v2415_v51, %v2666_v9  ;;  %vm1245_vm11 = vcmp.eq.f32.partialorder %v2451_v26, %v2666_v9 }
 0x244   : > { %v1359_v33 = vmin.f32 %v2677_v10, %v2683_v21  ;;  %v1360_v48 = vmin.f32 %v2680_v7, %v2686_v32  ;;  %vm1247_vm12 = vcmp.eq.f32.partialorder %v3693_v55, %v2666_v9  ;;  %v2703_v53 = vsel %vm1239_vm8, inf, %v2393_v5 }
 0x245   : > { %v2706_v22 = vsel %vm1241_vm9, inf, %v2422_v63  ;;  %vm1249_vm13 = vcmp.eq.f32.partialorder %v2465_v52, %v2666_v9  ;;  %vm1251_vm14 = vcmp.eq.f32.partialorder %v2468_v25, %v2666_v9  ;;  %vm1253_vm15 = vcmp.eq.f32.partialorder %v2500_v57, %v2666_v9 }
 0x246   : > { %v1361_v27 = vmin.f32 %v1359_v33, %v2703_v53  ;;  %v1362_v14 = vmin.f32 %v1360_v48, %v2706_v22  ;;  %vm1255_vm0 = vcmp.eq.f32.partialorder %v2342_v39, %v2666_v9  ;;  %v2721_v5 = vsel %vm1243_vm10, inf, %v2415_v51 }
 0x247   : > { %v2724_v63 = vsel %vm1245_vm11, inf, %v2451_v26  ;;  %vm1257_vm1 = vcmp.eq.f32.partialorder %v2363_v46, %v2666_v9  ;;  %vm1259_vm2 = vcmp.eq.f32.partialorder %v2390_v60, %v2666_v9  ;;  %vm1261_vm3 = vcmp.eq.f32.partialorder %v2514_v36, %v2666_v9 }
 0x248   : > { %v1363_v0 = vmin.f32 %v1361_v27, %v2721_v5  ;;  %v1364_v40 = vmin.f32 %v1362_v14, %v2724_v63  ;;  %vm1263_vm4 = vcmp.eq.f32.partialorder %v2540_v24, %v2666_v9  ;;  %v2740_v51 = vsel %vm1247_vm12, inf, %v3693_v55  ;;  %v3694_v27 = vld [vmem:[#allocation8_spill] sm:$0xff]  ;;  %v3695_v14 = vld [vmem:[#allocation11_spill] sm:$0xff] }
 0x249   : > { %v2743_v26 = vsel %vm1249_vm13, inf, %v2465_v52  ;;  %vm1265_vm5 = vcmp.eq.f32.partialorder %v2552_v44, %v2666_v9  ;;  %vm1267_vm6 = vcmp.eq.f32.partialorder %v2563_v20, %v2666_v9  ;;  %vm1269_vm7 = vcmp.eq.f32.partialorder %v2571_v61, %v2666_v9 }
 0x24a   : > { %v1365_v49 = vmin.f32 %v1363_v0, %v2740_v51  ;;  %v1366_v6 = vmin.f32 %v1364_v40, %v2743_v26  ;;  %vm1271_vm8 = vcmp.eq.f32.partialorder %v2580_v43, %v2666_v9  ;;  %v2759_v52 = vsel %vm1251_vm14, inf, %v2468_v25  ;;  %v3696_v40 = vld [vmem:[#allocation4_spill] sm:$0xff] }
 0x24b   : > { %v2765_v59 = vsel %vm1253_vm15, inf, %v2500_v57  ;;  %vm1273_vm9 = vcmp.eq.f32.partialorder %v2586_v23, %v2666_v9  ;;  %vm1275_vm10 = vcmp.eq.f32.partialorder %v2592_v58, %v2666_v9  ;;  %vm1277_vm11 = vcmp.eq.f32.partialorder %v2599_v45, %v2666_v9 }
 0x24c   : > { %v1367_v47 = vmin.f32 %v1365_v49, %v2759_v52  ;;  %v1368_v17 = vmin.f32 %v1366_v6, %v2765_v59  ;;  %vm1279_vm12 = vcmp.eq.f32.partialorder %v2608_v35, %v2666_v9  ;;  %v2781_v25 = vsel %vm1255_vm0, inf, %v2342_v39  ;;  %v3697_v49 = vld [vmem:[#allocation6_spill] sm:$0xff] }
 0x24d   : > { %v2787_v57 = vsel %vm1257_vm1, inf, %v2363_v46  ;;  %vm1281_vm13 = vcmp.eq.f32.partialorder %v2614_v19, %v2666_v9  ;;  %vm1283_vm14 = vcmp.eq.f32.partialorder %v2621_v3, %v2666_v9  ;;  %vm1287_vm0 = vcmp.eq.f32.partialorder %v2630_v4, %v2666_v9 }
 0x24e   : > { %v1369_v11 = vmin.f32 %v1367_v47, %v2781_v25  ;;  %v1370_v56 = vmin.f32 %v1368_v17, %v2787_v57  ;;  %v2803_v39 = vsel %vm1259_vm2, inf, %v2390_v60  ;;  %v2809_v46 = vsel %vm1261_vm3, inf, %v2514_v36 }
 0x24f   : > { %vm1289_vm1 = vcmp.eq.f32.partialorder %v2633_v8, %v2666_v9  ;;  %vm1291_vm15 = vcmp.eq.f32.partialorder %v2641_v15, %v2666_v9  ;;  %vm1293_vm2 = vcmp.eq.f32.partialorder %v2650_v31, %v2666_v9  ;;  %v2823_v60 = vsel %vm1263_vm4, inf, %v2540_v24 }
 0x250   : > { %v1371_v2 = vmin.f32 %v1369_v11, %v2803_v39  ;;  %v1372_v38 = vmin.f32 %v1370_v56, %v2809_v46  ;;  %v2829_v36 = vsel %vm1265_vm5, inf, %v2552_v44  ;;  %v2835_v33 = vsel %vm1267_vm6, inf, %v2563_v20 }
 0x251   : > { %v2841_v48 = vsel %vm1269_vm7, inf, %v2571_v61  ;;  %vm1262_vm3 = vcmp.eq.f32.partialorder %v3694_v27, %v2708_v34  ;;  %v2851_v44 = vsel %vm1271_vm8, inf, %v2580_v43  ;;  %v2857_v20 = vsel %vm1273_vm9, inf, %v2586_v23 }
 0x252   : > { %v1373_v24 = vmin.f32 %v1371_v2, %v2823_v60  ;;  %v1374_v55 = vmin.f32 %v1372_v38, %v2829_v36  ;;  %v2863_v61 = vsel %vm1275_vm10, inf, %v2592_v58  ;;  %vm1264_vm4 = vcmp.eq.f32.partialorder %v3695_v14, %v2708_v34 }
 0x253   : > { %v2871_v43 = vsel %vm1277_vm11, inf, %v2599_v45  ;;  %v2877_v23 = vsel %vm1279_vm12, inf, %v2608_v35  ;;  %vm1232_vm5 = vcmp.eq.f32.partialorder %v3696_v40, %v2708_v34  ;;  %vm1234_vm6 = vcmp.eq.f32.partialorder %v2371_v1, %v2708_v34 }
 0x254   : > { %v1375_v0 = vmin.f32 %v1373_v24, %v2835_v33  ;;  %v1376_v58 = vmin.f32 %v1374_v55, %v2841_v48  ;;  %vm1236_vm7 = vcmp.eq.f32.partialorder %v3697_v49, %v2708_v34  ;;  %v2888_v45 = vsel %vm1262_vm3, inf, %v3694_v27 }
 0x255   : > { %3698 = vst [vmem:[#allocation10_spill] sm:$0xff] %v2888_v45  ;;  %vm1238_vm8 = vcmp.eq.f32.partialorder %v2436_v12, %v2708_v34  ;;  %v2895_v47 = vsel %vm1264_vm4, inf, %v3695_v14  ;;  %v2901_v17 = vsel %vm1281_vm13, inf, %v2614_v19  ;;  %v2907_v11 = vsel %vm1283_vm14, inf, %v2621_v3  ;;  %v3700_v14 = vld [vmem:[#allocation9_spill] sm:$0xff] }
 0x256   : > { %v1377_v6 = vmin.f32 %v1375_v0, %v2851_v44  ;;  %v1378_v35 = vmin.f32 %v1376_v58, %v2857_v20  ;;  %vm3699_vm9 = vcmp.eq.f32.partialorder %v2625_v13, %v2666_v9  ;;  %v2919_v2 = vsel %vm1287_vm0, inf, %v2630_v4 }
 0x257   : > { %v2913_v56 = vsel %vm3699_vm9, inf, %v2625_v13  ;;  %v2925_v19 = vsel %vm1289_vm1, inf, %v2633_v8  ;;  %v2931_v3 = vsel %vm1291_vm15, inf, %v2641_v15  ;;  %v2939_v4 = vsel %vm1232_vm5, inf, %v3696_v40 }
 0x258   : > { %v1379_v13 = vmin.f32 %v1377_v6, %v2863_v61  ;;  %v1380_v38 = vmin.f32 %v1378_v35, %v2871_v43  ;;  %v2945_v8 = vsel %vm1234_vm6, inf, %v2371_v1  ;;  %v2951_v15 = vsel %vm1236_vm7, inf, %v3697_v49 }
 0x259   : > { %v2954_v24 = vsel %vm1238_vm8, inf, %v2436_v12  ;;  %vm1240_vm10 = vcmp.eq.f32.partialorder %v3700_v14, %v2708_v34  ;;  %vm1242_vm11 = vcmp.eq.f32.partialorder %v2519_v62, %v2708_v34  ;;  %v2966_v1 = vsel %vm1293_vm2, inf, %v2650_v31 }
 0x25a   : > { %v1381_v55 = vmin.f32 %v1379_v13, %v2877_v23  ;;  %v1382_v27 = vmin.f32 %v1380_v38, %v2901_v17  ;;  %v2969_v0 = vmax.f32 %v2666_v9, 0.0  ;;  %vm1244_vm12 = vcmp.eq.f32.partialorder %v2461_v30, %v2708_v34 }
 0x25b   : > { %vm1246_vm13 = vcmp.eq.f32.partialorder %v2532_v28, %v2708_v34  ;;  %v1396_v40 = vmin.f32 %v2939_v4, %v2951_v15  ;;  %v1397_v31 = vmin.f32 %v2945_v8, %v2954_v24  ;;  %vm1248_vm14 = vcmp.eq.f32.partialorder %v2490_v42, %v2708_v34 }
 0x25c   : > { %v1383_v12 = vmin.f32 %v1381_v55, %v2907_v11  ;;  %v1384_v58 = vmin.f32 %v1382_v27, %v2913_v56  ;;  %vm1250_vm15 = vcmp.eq.f32.partialorder %v2547_v16, %v2708_v34  ;;  %v2986_v9 = vsel %vm1240_vm10, inf, %v3700_v14  ;;  %v3703_v55 = vld [vmem:[#allocation16_spill] sm:$0xff]  ;;  %v3704_v27 = vld [vmem:[#allocation18_spill] sm:$0xff] }
 0x25d   : > { %3701 = vst [vmem:[#allocation8_spill] sm:$0xff] %v2986_v9  ;;  %v2989_v49 = vsel %vm1242_vm11, inf, %v2519_v62  ;;  %v1398_v13 = vmin.f32 %v1396_v40, %v2986_v9  ;;  %vm1252_vm0 = vcmp.eq.f32.partialorder %v3703_v55, %v2708_v34  ;;  %vm1254_vm1 = vcmp.eq.f32.partialorder %v3704_v27, %v2708_v34 }
 0x25e   : > { %3702 = vst [vmem:[#allocation11_spill] sm:$0xff] %v2989_v49  ;;  %v1385_v6 = vmin.f32 %v1383_v12, %v2919_v2  ;;  %v1386_v35 = vmin.f32 %v1384_v58, %v2925_v19  ;;  %v1399_v38 = vmin.f32 %v1397_v31, %v2989_v49  ;;  %v3003_v62 = vsel %vm1244_vm12, inf, %v2461_v30  ;;  %v3707_v49 = vld [vmem:[#allocation5_spill] sm:$0xff] }
 0x25f   : > { %3705 = vst [vmem:[#allocation4_spill] sm:$0xff] %v3003_v62  ;;  %v3009_v14 = vsel %vm1246_vm13, inf, %v2532_v28  ;;  %v1400_v40 = vmin.f32 %v1398_v13, %v3003_v62  ;;  %1913 = vrsqrt.f32 %v2969_v0  ;;  %vm1256_vm2 = vcmp.eq.f32.partialorder %v3707_v49, %v2708_v34 }
 0x260   : > { %3706 = vst [vmem:[#allocation6_spill] sm:$0xff] %v3009_v14  ;;  %v1387_v12 = vmin.f32 %v1385_v6, %v2931_v3  ;;  %v1388_v58 = vmin.f32 %v1386_v35, %v2966_v1  ;;  %v1401_v31 = vmin.f32 %v1399_v38, %v3009_v14  ;;  %v3022_v30 = vsel %vm1248_vm14, inf, %v2490_v42  ;;  %v3710_v35 = vld [vmem:[#allocation3_spill] sm:$0xff]  ;;  %v3715_v14 = vld [vmem:[#allocation12_spill] sm:$0xff] }
 0x261   : > { %3708 = vst [vmem:[#allocation9_spill] sm:$0xff] %v3022_v30  ;;  %v3028_v28 = vsel %vm1250_vm15, inf, %v2547_v16  ;;  %vm1258_vm3 = vcmp.eq.f32.partialorder %v3710_v35, %v2708_v34  ;;  %v1402_v13 = vmin.f32 %v1400_v40, %v3022_v30  ;;  %v3038_v42 = vsel %vm1252_vm0, inf, %v3703_v55 }
 0x262   : > { %3709 = vst [vmem:[#allocation16_spill] sm:$0xff] %v3028_v28  ;;  %v1389_v6 = vmin.f32 %v1387_v12, %v1388_v58  ;;  %v1403_v38 = vmin.f32 %v1401_v31, %v3028_v28  ;;  %v3044_v16 = vsel %vm1254_vm1, inf, %v3704_v27  ;;  %v3712_v58 = vld [vmem:[#allocation7_spill] sm:$0xff]  ;;  %v3051_v28 = vsel %vm1256_vm2, inf, %v3707_v49  ;;  %v3718_v49 = vld [vmem:[#allocation14_spill] sm:$0xff] }
 0x263   : > { %3711 = vst [vmem:[#allocation18_spill] sm:$0xff] %v3044_v16  ;;  %vm1260_vm4 = vcmp.eq.f32.partialorder %v3712_v58, %v2708_v34  ;;  %v1404_v40 = vmin.f32 %v1402_v13, %v3038_v42  ;;  %3713 = vst [vmem:[#allocation5_spill] sm:$0xff] %v3051_v28  ;;  %v3054_v55 = vsel %vm1258_vm3, inf, %v3710_v35  ;;  %vm1266_vm5 = vcmp.eq.f32.partialorder %v3715_v14, %v2708_v34  ;;  %v3717_v13 = vld [vmem:[#allocation13_spill] sm:$0xff] }
 0x264   : > { %v1390_v12 = vrot.slane %v1389_v6, 4  ;;  %v1405_v31 = vmin.f32 %v1403_v38, %v3044_v16  ;;  %3714 = vst [vmem:[#allocation3_spill] sm:$0xff] %v3054_v55  ;;  %v3061_v9 = vsel %vm1260_vm4, inf, %v3712_v58  ;;  %vm1268_vm6 = vcmp.eq.f32.partialorder %v3717_v13, %v2708_v34  ;;  %v3719_v38 = vld [vmem:[#allocation15_spill] sm:$0xff]  ;;  %v3721_v58 = vld [vmem:[#allocation17_spill] sm:$0xff] }
 0x265   : > { %v1406_v27 = vmin.f32 %v1404_v40, %v3051_v28  ;;  %3716 = vst [vmem:[#allocation7_spill] sm:$0xff] %v3061_v9  ;;  %vm1270_vm7 = vcmp.eq.f32.partialorder %v3718_v49, %v2708_v34  ;;  %vm1272_vm8 = vcmp.eq.f32.partialorder %v3719_v38, %v2708_v34  ;;  %vm1274_vm9 = vcmp.eq.f32.partialorder %v3721_v58, %v2708_v34 }
 0x266   : > { %v1391_v30 = vmin.f32 %v1389_v6, %v1390_v12  ;;  %v1407_v62 = vmin.f32 %v1405_v31, %v3054_v55  ;;  %v3072_v12 = vsel %vm1266_vm5, inf, %v3715_v14  ;;  %v3079_v28 = vsel %vm1268_vm6, inf, %v3717_v13 }
 0x267   : > { %v1408_v35 = vmin.f32 %v1406_v27, %v3061_v9  ;;  %3720 = vst [vmem:[#allocation12_spill] sm:$0xff] %v3072_v12  ;;  %v3082_v27 = vsel %vm1270_vm7, inf, %v3718_v49  ;;  %v3087_v14 = vsel %vm1272_vm8, inf, %v3719_v38  ;;  %v3090_v9 = vsel %vm1274_vm9, inf, %v3721_v58 }
 0x268   : > { %v1409_v6 = vmin.f32 %v1407_v62, %v2888_v45  ;;  %v1392_v40 = vrot.slane %v1391_v30, 2  ;;  %vm1639_vm10 = vcmp.eq.f32.partialorder %v2969_v0, inf  ;;  %vm1641_vm11 = vcmp.eq.f32.partialorder %v2969_v0, 0.0 }
 0x269   : > { %v1410_v31 = vmin.f32 %v1408_v35, %v2895_v47  ;;  %vm1282_vm15 = vcmp.eq.f32.partialorder %v2616_v29, %v2708_v34  ;;  %vm1284_vm0 = vcmp.eq.f32.partialorder %v2628_v50, %v2708_v34  ;;  %vm1288_vm2 = vcmp.eq.f32.partialorder %v2646_v37, %v2708_v34 }
 0x26a   : > { %v1411_v55 = vmin.f32 %v1409_v6, %v3072_v12  ;;  %v1393_v35 = vmin.f32 %v1391_v30, %v1392_v40  ;;  %v3723_v30 = vld [vmem:[#allocation20_spill] sm:$0xff]  ;;  %v3724_v40 = vld [vmem:[#allocation21_spill] sm:$0xff]  ;;  %vm1290_vm3 = vcmp.eq.f32.partialorder %v2653_v41, %v2708_v34  ;;  %vm1292_vm4 = vcmp.eq.f32.partialorder %v2659_v54, %v2708_v34 }
 0x26b   : > { %v1412_v62 = vmin.f32 %v1410_v31, %v3079_v28  ;;  %vm1278_vm13 = vcmp.eq.f32.partialorder %v3723_v30, %v2708_v34  ;;  %vm1280_vm14 = vcmp.eq.f32.partialorder %v3724_v40, %v2708_v34  ;;  %vm1294_vm5 = vcmp.eq.f32.partialorder %v2662_v18, %v2708_v34 }
 0x26c   : > { %v1413_v45 = vmin.f32 %v1411_v55, %v3082_v27  ;;  %v1914_v16 = vpop.eup %1913  ;;  %v1394_v12 = vrot.slane %v1393_v35, 1  ;;  %v3722_v55 = vld [vmem:[#allocation19_spill] sm:$0xff]  ;;  %v3127_v31 = vsel %vm1278_vm13, inf, %v3723_v30  ;;  %v3158_v30 = vsel %vm1290_vm3, inf, %v2653_v41 }
 0x26d   : > { %v1414_v6 = vmin.f32 %v1412_v62, %v3087_v14  ;;  %v1638_v49 = vmul.f32 %v1914_v16, %v2969_v0  ;;  %vm1276_vm12 = vcmp.eq.f32.partialorder %v3722_v55, %v2708_v34  ;;  %v3725_v16 = vld [vmem:[#allocation22_spill] sm:$0xff]  ;;  %v3130_v62 = vsel %vm1280_vm14, inf, %v3724_v40 }
 0x26e   : > { %v1415_v13 = vmin.f32 %v1413_v45, %v3090_v9  ;;  %v3099_v38 = vmin.f32 %v1393_v35, %v1394_v12  ;;  %v1642_v45 = vand.u32 2147483648, %v2969_v0  ;;  %vm1286_vm1 = vcmp.eq.f32.partialorder %v3725_v16, %v2708_v34 }
 0x26f   : > { %v1640_v58 = vsel %vm1639_vm10, %v2969_v0, %v1638_v49  ;;  %v3124_v12 = vsel %vm1276_vm12, inf, %v3722_v55  ;;  %v3141_v35 = vsel %vm1282_vm15, inf, %v2616_v29  ;;  %v3144_v49 = vsel %vm1284_vm0, inf, %v2628_v50 }
 0x270   : > { %v3121_v0 = vsel %vm1641_vm11, %v1642_v45, %v1640_v58  ;;  %vm1433_vm6 = vcmp.eq.f32.partialorder %v2677_v10, %v3099_v38  ;;  %vm1435_vm7 = vcmp.eq.f32.partialorder %v2680_v7, %v3099_v38  ;;  %vm1437_vm8 = vcmp.eq.f32.partialorder %v2683_v21, %v3099_v38 }
 0x271   : > { %vm1439_vm9 = vcmp.eq.f32.partialorder %v2686_v32, %v3099_v38  ;;  %v3147_v55 = vsel %vm1286_vm1, inf, %v3725_v16  ;;  %v3150_v58 = vsel %vm1288_vm2, inf, %v2646_v37  ;;  %vm1441_vm10 = vcmp.eq.f32.partialorder %v2703_v53, %v3099_v38 }
 0x272   : > { %v3164_v29 = vsel %vm1292_vm4, inf, %v2659_v54  ;;  %v3170_v50 = vsel %vm1294_vm5, inf, %v2662_v18  ;;  %v1497_v37 = vsel %vm1433_vm6, inf, %v2677_v10  ;;  %v1499_v40 = vsel %vm1435_vm7, inf, %v2680_v7 }
 0x273   : > { %v1501_v45 = vsel %vm1437_vm8, inf, %v2683_v21  ;;  %v1503_v41 = vsel %vm1439_vm9, inf, %v2686_v32  ;;  %vm1443_vm11 = vcmp.eq.f32.partialorder %v2706_v22, %v3099_v38  ;;  %vm1445_vm12 = vcmp.eq.f32.partialorder %v2721_v5, %v3099_v38 }
 0x274   : > { %vm1447_vm13 = vcmp.eq.f32.partialorder %v2724_v63, %v3099_v38  ;;  %vm1449_vm14 = vcmp.eq.f32.partialorder %v2740_v51, %v3099_v38  ;;  %vm1451_vm15 = vcmp.eq.f32.partialorder %v2743_v26, %v3099_v38  ;;  %vm1453_vm0 = vcmp.eq.f32.partialorder %v2759_v52, %v3099_v38 }
 0x275   : > { %vm1455_vm1 = vcmp.eq.f32.partialorder %v2765_v59, %v3099_v38  ;;  %vm1457_vm2 = vcmp.eq.f32.partialorder %v2781_v25, %v3099_v38  ;;  %v1561_v54 = vmin.f32 %v1497_v37, %v1501_v45  ;;  %v1562_v18 = vmin.f32 %v1499_v40, %v1503_v41 }
 0x276   : > { %v3193_v10 = vmax.f32 %v3099_v38, 0.0  ;;  %v1416_v7 = vmin.f32 %v1414_v6, %v3124_v12  ;;  %vm1459_vm3 = vcmp.eq.f32.partialorder %v2787_v57, %v3099_v38  ;;  %v1505_v21 = vsel %vm1441_vm10, inf, %v2703_v53 }
 0x277   : > { %v1507_v32 = vsel %vm1443_vm11, inf, %v2706_v22  ;;  %v1417_v16 = vmin.f32 %v1415_v13, %v3127_v31  ;;  %vm1461_vm4 = vcmp.eq.f32.partialorder %v2803_v39, %v3099_v38  ;;  %v1563_v37 = vmin.f32 %v1561_v54, %v1505_v21 }
 0x278   : > { %v1564_v40 = vmin.f32 %v1562_v18, %v1507_v32  ;;  %1915 = vrsqrt.f32 %v3193_v10  ;;  %v1509_v6 = vsel %vm1445_vm12, inf, %v2721_v5  ;;  %v1511_v53 = vsel %vm1447_vm13, inf, %v2724_v63 }
 0x279   : > { %v1418_v22 = vmin.f32 %v1416_v7, %v3130_v62  ;;  %v1419_v13 = vmin.f32 %v1417_v16, %v3141_v35  ;;  %vm1463_vm5 = vcmp.eq.f32.partialorder %v2809_v46, %v3099_v38  ;;  %vm1465_vm6 = vcmp.eq.f32.partialorder %v2823_v60, %v3099_v38 }
 0x27a   : > { %v1565_v45 = vmin.f32 %v1563_v37, %v1509_v6  ;;  %v1566_v41 = vmin.f32 %v1564_v40, %v1511_v53  ;;  %v1513_v5 = vsel %vm1449_vm14, inf, %v2740_v51  ;;  %v1515_v63 = vsel %vm1451_vm15, inf, %v2743_v26 }
 0x27b   : > { %v1420_v54 = vmin.f32 %v1418_v22, %v3144_v49  ;;  %v1421_v18 = vmin.f32 %v1419_v13, %v3147_v55  ;;  %vm1467_vm7 = vcmp.eq.f32.partialorder %v2829_v36, %v3099_v38  ;;  %vm1469_vm8 = vcmp.eq.f32.partialorder %v2835_v33, %v3099_v38 }
 0x27c   : > { %v1567_v7 = vmin.f32 %v1565_v45, %v1513_v5  ;;  %v1568_v21 = vmin.f32 %v1566_v41, %v1515_v63  ;;  %v1517_v51 = vsel %vm1453_vm0, inf, %v2759_v52  ;;  %v1519_v26 = vsel %vm1455_vm1, inf, %v2765_v59 }
 0x27d   : > { %v1422_v32 = vmin.f32 %v1420_v54, %v3150_v58  ;;  %v1423_v16 = vmin.f32 %v1421_v18, %v3158_v30  ;;  %vm1471_vm9 = vcmp.eq.f32.partialorder %v2841_v48, %v3099_v38  ;;  %vm1473_vm10 = vcmp.eq.f32.partialorder %v2851_v44, %v3099_v38 }
 0x27e   : > { %v1569_v37 = vmin.f32 %v1567_v7, %v1517_v51  ;;  %v1570_v40 = vmin.f32 %v1568_v21, %v1519_v26  ;;  %v1521_v52 = vsel %vm1457_vm2, inf, %v2781_v25  ;;  %v1523_v59 = vsel %vm1459_vm3, inf, %v2787_v57 }
 0x27f   : > { %v1424_v6 = vmin.f32 %v1422_v32, %v3164_v29  ;;  %v1425_v53 = vmin.f32 %v1423_v16, %v3170_v50  ;;  %vm1475_vm11 = vcmp.eq.f32.partialorder %v2857_v20, %v3099_v38  ;;  %vm1477_vm12 = vcmp.eq.f32.partialorder %v2863_v61, %v3099_v38 }
 0x280   : > { %v1571_v22 = vmin.f32 %v1569_v37, %v1521_v52  ;;  %v1572_v13 = vmin.f32 %v1570_v40, %v1523_v59  ;;  %vm1479_vm13 = vcmp.eq.f32.partialorder %v2871_v43, %v3099_v38  ;;  %v1525_v25 = vsel %vm1461_vm4, inf, %v2803_v39 }
 0x281   : > { %v1527_v57 = vsel %vm1463_vm5, inf, %v2809_v46  ;;  %v1426_v45 = vmin.f32 %v1424_v6, %v1425_v53  ;;  %vm1481_vm14 = vcmp.eq.f32.partialorder %v2877_v23, %v3099_v38  ;;  %vm1483_vm15 = vcmp.eq.f32.partialorder %v2901_v17, %v3099_v38 }
 0x282   : > { %v1573_v41 = vmin.f32 %v1571_v22, %v1525_v25  ;;  %v1574_v5 = vmin.f32 %v1572_v13, %v1527_v57  ;;  %vm1485_vm0 = vcmp.eq.f32.partialorder %v2907_v11, %v3099_v38  ;;  %v1529_v39 = vsel %vm1465_vm6, inf, %v2823_v60 }
 0x283   : > { %v1531_v46 = vsel %vm1467_vm7, inf, %v2829_v36  ;;  %v1427_v63 = vrot.slane %v1426_v45, 4  ;;  %vm1487_vm1 = vcmp.eq.f32.partialorder %v2913_v56, %v3099_v38  ;;  %vm1489_vm2 = vcmp.eq.f32.partialorder %v2919_v2, %v3099_v38 }
 0x284   : > { %v1575_v54 = vmin.f32 %v1573_v41, %v1529_v39  ;;  %v1576_v18 = vmin.f32 %v1574_v5, %v1531_v46  ;;  %vm1491_vm3 = vcmp.eq.f32.partialorder %v2925_v19, %v3099_v38  ;;  %v1533_v60 = vsel %vm1469_vm8, inf, %v2835_v33 }
 0x285   : > { %v1916_v7 = vpop.eup %1915  ;;  %v1535_v36 = vsel %vm1471_vm9, inf, %v2841_v48  ;;  %v1428_v21 = vmin.f32 %v1426_v45, %v1427_v63  ;;  %v1537_v51 = vsel %vm1473_vm10, inf, %v2851_v44  ;;  %v1539_v33 = vsel %vm1475_vm11, inf, %v2857_v20 }
 0x286   : > { %v1577_v26 = vmin.f32 %v1575_v54, %v1533_v60  ;;  %v1578_v32 = vmin.f32 %v1576_v18, %v1535_v36  ;;  %v1654_v16 = vmul.f32 %v1916_v7, %v3193_v10  ;;  %vm1655_vm4 = vcmp.eq.f32.partialorder %v3193_v10, inf  ;;  %v3729_v54 = vld [vmem:[#allocation6_spill] sm:$0xff]  ;;  %v3730_v18 = vld [vmem:[#allocation9_spill] sm:$0xff]  ;;  %v3731_v7 = vld [vmem:[#allocation16_spill] sm:$0xff] }
 0x287   : > { %v1658_v37 = vand.u32 2147483648, %v3193_v10  ;;  %v1429_v48 = vrot.slane %v1428_v21, 2  ;;  %vm1657_vm5 = vcmp.eq.f32.partialorder %v3193_v10, 0.0  ;;  %v1541_v44 = vsel %vm1477_vm12, inf, %v2863_v61 }
 0x288   : > { %v1579_v40 = vmin.f32 %v1577_v26, %v1537_v51  ;;  %v1580_v52 = vmin.f32 %v1578_v32, %v1539_v33  ;;  %v1656_v59 = vsel %vm1655_vm4, %v3193_v10, %v1654_v16  ;;  %v1543_v20 = vsel %vm1479_vm13, inf, %v2871_v43  ;;  %v3733_v51 = vld [vmem:[#allocation5_spill] sm:$0xff]  ;;  %v3734_v26 = vld [vmem:[#allocation3_spill] sm:$0xff]  ;;  %v3736_v16 = vld [vmem:[#allocation10_spill] sm:$0xff] }
 0x289   : > { %v3322_v6 = vsel %vm1657_vm5, %v1658_v37, %v1656_v59  ;;  %v1430_v53 = vmin.f32 %v1428_v21, %v1429_v48  ;;  %vm1493_vm6 = vcmp.eq.f32.partialorder %v2931_v3, %v3099_v38  ;;  %vm1495_vm7 = vcmp.eq.f32.partialorder %v2966_v1, %v3099_v38  ;;  %v3728_v38 = vld [vmem:[#allocation4_spill] sm:$0xff]  ;;  %v3732_v21 = vld [vmem:[#allocation18_spill] sm:$0xff]  ;;  %v3735_v32 = vld [vmem:[#allocation7_spill] sm:$0xff] }
 0x28a   : > { %v1581_v22 = vmin.f32 %v1579_v40, %v1541_v44  ;;  %v1582_v13 = vmin.f32 %v1580_v52, %v1543_v20  ;;  %v1683_v10 = vsub.f32 %v3121_v0, %v3322_v6  ;;  %v1545_v61 = vsel %vm1481_vm14, inf, %v2877_v23  ;;  %v3737_v37 = vld [vmem:[#allocation12_spill] sm:$0xff] }
 0x28b   : > { %v1547_v43 = vsel %vm1483_vm15, inf, %v2901_v17  ;;  %v1431_v25 = vrot.slane %v1430_v53, 1  ;;  %v1549_v57 = vsel %vm1485_vm0, inf, %v2907_v11  ;;  %v3343_v5 = vmax.f32 %v2708_v34, 0.0 }
 0x28c   : > { %v1583_v45 = vmin.f32 %v1581_v22, %v1545_v61  ;;  %v1584_v41 = vmin.f32 %v1582_v13, %v1547_v43  ;;  %v1551_v23 = vsel %vm1487_vm1, inf, %v2913_v56  ;;  %v1553_v17 = vsel %vm1489_vm2, inf, %v2919_v2 }
 0x28d   : > { %v1555_v11 = vsel %vm1491_vm3, inf, %v2925_v19  ;;  %v3357_v39 = vmin.f32 %v1430_v53, %v1431_v25  ;;  %v1557_v34 = vsel %vm1493_vm6, inf, %v2931_v3  ;;  %v1559_v46 = vsel %vm1495_vm7, inf, %v2966_v1  ;;  %v3726_v3 = vld [vmem:[#allocation8_spill] sm:$0xff]  ;;  %v3727_v1 = vld [vmem:[#allocation11_spill] sm:$0xff] }
 0x28e   : > { %v1585_v56 = vmin.f32 %v1583_v45, %v1549_v57  ;;  %v1586_v63 = vmin.f32 %v1584_v41, %v1551_v23  ;;  %1917 = vrsqrt.f32 %v3343_v5 }
 0x28f   : > { %vm1434_vm8 = vcmp.eq.f32.partialorder %v2939_v4, %v3357_v39  ;;  %vm1436_vm9 = vcmp.eq.f32.partialorder %v2945_v8, %v3357_v39  ;;  %vm1438_vm10 = vcmp.eq.f32.partialorder %v2951_v15, %v3357_v39  ;;  %vm1440_vm11 = vcmp.eq.f32.partialorder %v2954_v24, %v3357_v39 }
 0x290   : > { %v1587_v2 = vmin.f32 %v1585_v56, %v1553_v17  ;;  %v1588_v19 = vmin.f32 %v1586_v63, %v1555_v11  ;;  %vm1442_vm12 = vcmp.eq.f32.partialorder %v3726_v3, %v3357_v39  ;;  %vm1444_vm13 = vcmp.eq.f32.partialorder %v3727_v1, %v3357_v39 }
 0x291   : > { %vm1446_vm14 = vcmp.eq.f32.partialorder %v3728_v38, %v3357_v39  ;;  %vm1448_vm15 = vcmp.eq.f32.partialorder %v3729_v54, %v3357_v39  ;;  %vm1450_vm0 = vcmp.eq.f32.partialorder %v3730_v18, %v3357_v39  ;;  %vm1484_vm3 = vcmp.eq.f32.partialorder %v3141_v35, %v3357_v39 }
 0x292   : > { %v1589_v60 = vmin.f32 %v1587_v2, %v1557_v34  ;;  %v1590_v36 = vmin.f32 %v1588_v19, %v1559_v46  ;;  %vm1486_vm4 = vcmp.eq.f32.partialorder %v3144_v49, %v3357_v39  ;;  %vm1488_vm5 = vcmp.eq.f32.partialorder %v3147_v55, %v3357_v39 }
 0x293   : > { %vm1490_vm6 = vcmp.eq.f32.partialorder %v3150_v58, %v3357_v39  ;;  %vm1492_vm7 = vcmp.eq.f32.partialorder %v3158_v30, %v3357_v39  ;;  %vm1494_vm1 = vcmp.eq.f32.partialorder %v3164_v29, %v3357_v39  ;;  %vm1496_vm2 = vcmp.eq.f32.partialorder %v3170_v50, %v3357_v39 }
 0x294   : > { %v1591_v33 = vmin.f32 %v1589_v60, %v1590_v36  ;;  %v1498_v52 = vsel %vm1434_vm8, inf, %v2939_v4  ;;  %v1500_v59 = vsel %vm1436_vm9, inf, %v2945_v8  ;;  %v1502_v44 = vsel %vm1438_vm10, inf, %v2951_v15 }
 0x295   : > { %v1504_v20 = vsel %vm1440_vm11, inf, %v2954_v24  ;;  %v1506_v4 = vsel %vm1442_vm12, inf, %v3726_v3  ;;  %v1508_v8 = vsel %vm1444_vm13, inf, %v3727_v1  ;;  %v1510_v15 = vsel %vm1446_vm14, inf, %v3728_v38 }
 0x296   : > { %v1592_v48 = vrot.slane %v1591_v33, 4  ;;  %v1512_v24 = vsel %vm1448_vm15, inf, %v3729_v54  ;;  %v1514_v22 = vsel %vm1450_vm0, inf, %v3730_v18  ;;  %vm3738_vm8 = vcmp.eq.f32.partialorder %v3731_v7, %v3357_v39 }
 0x297   : > { %v1516_v13 = vsel %vm3738_vm8, inf, %v3731_v7  ;;  %vm3739_vm9 = vcmp.eq.f32.partialorder %v3038_v42, %v3357_v39  ;;  %vm3740_vm10 = vcmp.eq.f32.partialorder %v3732_v21, %v3357_v39  ;;  %vm3741_vm11 = vcmp.eq.f32.partialorder %v3733_v51, %v3357_v39 }
 0x298   : > { %v1593_v40 = vmin.f32 %v1591_v33, %v1592_v48  ;;  %v1518_v61 = vsel %vm3739_vm9, inf, %v3038_v42  ;;  %v1520_v43 = vsel %vm3740_vm10, inf, %v3732_v21  ;;  %v1522_v57 = vsel %vm3741_vm11, inf, %v3733_v51 }
 0x299   : > { %vm3742_vm12 = vcmp.eq.f32.partialorder %v3734_v26, %v3357_v39  ;;  %vm3743_vm13 = vcmp.eq.f32.partialorder %v3735_v32, %v3357_v39  ;;  %vm3744_vm14 = vcmp.eq.f32.partialorder %v3736_v16, %v3357_v39  ;;  %vm3745_vm15 = vcmp.eq.f32.partialorder %v2895_v47, %v3357_v39 }
 0x29a   : > { %v1594_v53 = vrot.slane %v1593_v40, 2  ;;  %v1524_v45 = vsel %vm3742_vm12, inf, %v3734_v26  ;;  %v1526_v42 = vsel %vm3743_vm13, inf, %v3735_v32  ;;  %v1528_v41 = vsel %vm3744_vm14, inf, %v3736_v16 }
 0x29b   : > { %v1530_v23 = vsel %vm3745_vm15, inf, %v2895_v47  ;;  %vm3746_vm0 = vcmp.eq.f32.partialorder %v3737_v37, %v3357_v39  ;;  %vm3747_vm8 = vcmp.eq.f32.partialorder %v3079_v28, %v3357_v39  ;;  %vm3748_vm9 = vcmp.eq.f32.partialorder %v3082_v27, %v3357_v39  ;;  %v1918_v18 = vpop.eup %1917 }
 0x29c   : > { %v1595_v25 = vmin.f32 %v1593_v40, %v1594_v53  ;;  %v1532_v17 = vsel %vm3746_vm0, inf, %v3737_v37  ;;  %v1534_v34 = vsel %vm3747_vm8, inf, %v3079_v28  ;;  %v1536_v46 = vsel %vm3748_vm9, inf, %v3082_v27 }
 0x29d   : > { %vm3749_vm10 = vcmp.eq.f32.partialorder %v3087_v14, %v3357_v39  ;;  %vm3750_vm11 = vcmp.eq.f32.partialorder %v3090_v9, %v3357_v39  ;;  %vm3751_vm12 = vcmp.eq.f32.partialorder %v3124_v12, %v3357_v39  ;;  %vm3752_vm13 = vcmp.eq.f32.partialorder %v3127_v31, %v3357_v39 }
 0x29e   : > { %v1596_v11 = vrot.slane %v1595_v25, 1  ;;  %v1538_v47 = vsel %vm3749_vm10, inf, %v3087_v14  ;;  %v1540_v56 = vsel %vm3750_vm11, inf, %v3090_v9  ;;  %v3521_v28 = vsel %vm3751_vm12, inf, %v3124_v12 }
 0x29f   : > { %v3527_v27 = vsel %vm3752_vm13, inf, %v3127_v31  ;;  %vm3753_vm14 = vcmp.eq.f32.partialorder %v3130_v62, %v3357_v39  ;;  %v1548_v9 = vsel %vm1484_vm3, inf, %v3141_v35  ;;  %v3541_v12 = vsel %vm1486_vm4, inf, %v3144_v49 }
 0x2a0   : > { %v1546_v14 = vsel %vm3753_vm14, inf, %v3130_v62  ;;  %v1597_v63 = vmin.f32 %v1595_v25, %v1596_v11  ;;  %v3547_v31 = vsel %vm1488_vm5, inf, %v3147_v55  ;;  %v1554_v62 = vsel %vm1490_vm6, inf, %v3150_v58 }
 0x2a1   : > { %v1556_v35 = vsel %vm1492_vm7, inf, %v3158_v30  ;;  %v3561_v49 = vsel %vm1494_vm1, inf, %v3164_v29  ;;  %v3567_v55 = vsel %vm1496_vm2, inf, %v3170_v50  ;;  %v1598_v19 = vmin.f32 %v1498_v52, %v1502_v44 }
 0x2a2   : > { %v1667_v2 = vmax.f32 %v1597_v63, 0.0  ;;  %v1599_v58 = vmin.f32 %v1500_v59, %v1504_v20  ;;  %v1652_v3 = vmax.f32 %v3357_v39, 0.0  ;;  %v1645_v50 = vmul.f32 %v1918_v18, %v3343_v5 }
 0x2a3   : > { %v1600_v1 = vmin.f32 %v1598_v19, %v1506_v4  ;;  %vm1646_vm1 = vcmp.eq.f32.partialorder %v3343_v5, inf  ;;  %vm1648_vm2 = vcmp.eq.f32.partialorder %v3343_v5, 0.0  ;;  %v1649_v48 = vand.u32 2147483648, %v3343_v5 }
 0x2a4   : > { %1919 = vrsqrt.f32 %v1667_v2  ;;  %v1601_v30 = vmin.f32 %v1599_v58, %v1508_v8  ;;  %v1647_v37 = vsel %vm1646_vm1, %v3343_v5, %v1645_v50  ;;  %vm1671_vm3 = vcmp.eq.f32.partialorder %v1667_v2, inf }
 0x2a5   : > { %1921 = vrsqrt.f32 %v1652_v3  ;;  %v1602_v38 = vmin.f32 %v1600_v1, %v1510_v15  ;;  %vm1673_vm4 = vcmp.eq.f32.partialorder %v1667_v2, 0.0  ;;  %v1685_v59 = vmul.f32 1.442695, %v1683_v10 }
 0x2a6   : > { %v1603_v54 = vmin.f32 %v1601_v30, %v1512_v24  ;;  %v1674_v44 = vand.u32 2147483648, %v1667_v2  ;;  %vm1662_vm5 = vcmp.eq.f32.partialorder %v1652_v3, inf  ;;  %vm1664_vm6 = vcmp.eq.f32.partialorder %v1652_v3, 0.0 }
 0x2a7   : > { %v1604_v29 = vmin.f32 %v1602_v38, %v1514_v22  ;;  %v1665_v15 = vand.u32 2147483648, %v1652_v3  ;;  %1923 = vpow2.f32 %v1685_v59  ;;  %v1650_v25 = vsel %vm1648_vm2, %v1649_v48, %v1647_v37 }
 0x2a8   : > { %v1605_v7 = vmin.f32 %v1603_v54, %v1516_v13  ;;  %v1709_v50 = vlaneseq }
 0x2a9   : > { %v1606_v60 = vmin.f32 %v1604_v29, %v1518_v61 }
 0x2aa   : > { %v1607_v36 = vmin.f32 %v1605_v7, %v1520_v43  ;;  %vm1723_vm0 = vcmp.lt.s32.totalorder %v1709_v50, 256 }
 0x2ab   : > { %v1608_v21 = vmin.f32 %v1606_v60, %v1522_v57 }
 0x2ac   : > { %v1609_v51 = vmin.f32 %v1607_v36, %v1524_v45 }
 0x2ad   : > { %v1610_v26 = vmin.f32 %v1608_v21, %v1526_v42 }
 0x2ae   : > { %v1611_v32 = vmin.f32 %v1609_v51, %v1528_v41  ;;  %v1962_v51 = vmov 1966171168  }
 0x2af   : > { %v1612_v16 = vmin.f32 %v1610_v26, %v1530_v23 }
 0x2b0   : > { %v1613_v33 = vmin.f32 %v1611_v32, %v1532_v17  ;;  %v1710_v32 = vshrl.u32 %v1709_v50, 7 }
 0x2b1   : > { %v1920_v39 = vpop.eup %1919  ;;  %v1614_v20 = vmin.f32 %v1612_v16, %v1534_v34 }
 0x2b2   : > { %v1922_v40 = vpop.eup %1921  ;;  %v1670_v52 = vmul.f32 %v1920_v39, %v1667_v2  ;;  %v1615_v4 = vmin.f32 %v1613_v33, %v1536_v46 }
 0x2b3   : > { %v1661_v53 = vmul.f32 %v1922_v40, %v1652_v3  ;;  %v1616_v22 = vmin.f32 %v1614_v20, %v1538_v47 }
 0x2b4   : > { %v1672_v8 = vsel %vm1671_vm3, %v1667_v2, %v1670_v52  ;;  %v1617_v13 = vmin.f32 %v1615_v4, %v1540_v56  ;;  %v1924_v63 = vpop.eup %1923 }
 0x2b5   : > { %v1675_v24 = vsel %vm1673_vm4, %v1674_v44, %v1672_v8  ;;  %v1663_v61 = vsel %vm1662_vm5, %v1652_v3, %v1661_v53  ;;  %v1618_v10 = vmin.f32 %v1616_v22, %v3521_v28 }
 0x2b6   : > { %v1691_v43 = vsub.f32 %v3121_v0, %v1675_v24  ;;  %v1666_v6 = vsel %vm1664_vm6, %v1665_v15, %v1663_v61  ;;  %v1619_v57 = vmin.f32 %v1617_v13, %v3527_v27  ;;  %v1689_v27 = vadd.f32 1.0, %v1924_v63 }
 0x2b7   : > { %v1684_v45 = vsub.f32 %v1650_v25, %v1666_v6  ;;  %v1620_v41 = vmin.f32 %v1618_v10, %v1546_v14 }
 0x2b8   : > { %v1693_v42 = vmul.f32 1.442695, %v1691_v43  ;;  %v1621_v23 = vmin.f32 %v1619_v57, %v1548_v9 }
 0x2b9   : > { %v1622_v17 = vmin.f32 %v1620_v41, %v3541_v12 }
 0x2ba   : > { %1925 = vpow2.f32 %v1693_v42  ;;  %v1623_v11 = vmin.f32 %v1621_v23, %v3547_v31 }
 0x2bb   : > { %v1624_v34 = vmin.f32 %v1622_v17, %v1554_v62 }
 0x2bc   : > { %v1625_v46 = vmin.f32 %v1623_v11, %v1556_v35 }
 0x2bd   : > { %v1626_v47 = vmin.f32 %v1624_v34, %v3561_v49 }
 0x2be   : > { %v1627_v5 = vmin.f32 %v1625_v46, %v3567_v55  ;;  %v1687_v55 = vmul.f32 1.442695, %v1684_v45 }
 0x2c0   : > { %v1628_v56 = vmin.f32 %v1626_v47, %v1627_v5 }
 0x2c2   : > { %v1629_v28 = vrot.slane %v1628_v56, 4 }
 0x2c4   : > { %v1630_v2 = vmin.f32 %v1628_v56, %v1629_v28 }
 0x2c6   : > { %v1631_v58 = vrot.slane %v1630_v2, 2 }
 0x2c7   : > { %v1926_v19 = vpop.eup %1925 }
 0x2c8   : > { %v1697_v14 = vadd.f32 %v1926_v19, %v1689_v27  ;;  %v1632_v9 = vmin.f32 %v1630_v2, %v1631_v58 }
 0x2ca   : > { %1927 = vrcp.f32 %v1697_v14  ;;  %v1633_v3 = vrot.slane %v1632_v9, 1 }
 0x2cc   : > { %v1634_v12 = vmin.f32 %v1632_v9, %v1633_v3 }
 0x2ce   : > { %v1668_v1 = vmax.f32 %v1634_v12, 0.0 }
 0x2d0   : > { %1929 = vrsqrt.f32 %v1668_v1  ;;  %vm1678_vm7 = vcmp.eq.f32.partialorder %v1668_v1, inf  ;;  %v1681_v30 = vand.u32 2147483648, %v1668_v1  ;;  %vm1680_vm15 = vcmp.eq.f32.partialorder %v1668_v1, 0.0 }
 0x2d1   : > { %1931 = vpow2.f32 %v1687_v55 }
 0x2d7   : > { %v1928_v31 = vpop.eup %1927 }
 0x2d8   : > { %v1701_v62 = vmul.f32 %v1928_v31, %v3121_v0  ;;  %v1707_v0 = vunpack.c.l.s4 %v1962_v51 }
 0x2da   : > { %v1708_v26 = vunpack.c.0.s8 %v1707_v0 }
 0x2dc   : > { %v1711_v33 = vsub.s32 %v1708_v26, %v1710_v32 }
 0x2dd   : > { %v1930_v35 = vpop.eup %1929 }
 0x2de   : > { %v1677_v49 = vmul.f32 %v1930_v35, %v1668_v1  ;;  %v1932_v7 = vpop.eup %1931 }
 0x2df   : > { %v1690_v60 = vadd.f32 1.0, %v1932_v7 }
 0x2e0   : > { %v1679_v38 = vsel %vm1678_vm7, %v1668_v1, %v1677_v49 }
 0x2e1   : > { %v1682_v54 = vsel %vm1680_vm15, %v1681_v30, %v1679_v38 }
 0x2e2   : > { %v1692_v18 = vsub.f32 %v1650_v25, %v1682_v54 }
 0x2e4   : > { %v1695_v29 = vmul.f32 1.442695, %v1692_v18 }
 0x2e6   : > { %1933 = vpow2.f32 %v1695_v29 }
 0x2f3   : > { %v1934_v36 = vpop.eup %1933 }
 0x2f4   : > { %v1698_v21 = vadd.f32 %v1934_v36, %v1690_v60 }
 0x2f6   : > { %1935 = vrcp.f32 %v1698_v21 }
 0x303   : > { %v1936_v39 = vpop.eup %1935 }
 0x304   : > { %v1702_v16 = vmul.f32 %v1936_v39, %v1650_v25 }
 0x306   : > { %v1705_v37 = vcombine.low %v1701_v62, %v1702_v16 }
 0x308   : > { %v1712_v48 = vrot.slane %v1705_v37, %v1711_v33 }
 0x30a   : > { %v1719_v40 = vrot.slane %v1712_v48, %v1711_v33 }
 0x30c   : > { %1725 = vst.msk [vmem:[%s287_s12] sm:$0x3] %vm1723_vm0, %v1719_v40 }
 0x30d PF: > { %p12_p9 = scmp.ge.s32.totalorder %s2010_s22, 4   ;;  %s3754_s18 = smov %s1955_s19 }
 0x30e   : > { %s3755_s19 = smov %s2019_s25  ;;  %s3756_s20 = smov %s2010_s22 }
 0x30f   :  { %14 = sbr.rel (!%p12_p9) target bundleno = 2 (0x2), region = 113 }

// kernel: squeeze.1
= control target key start
LH: loop header
LB: loop body
LE: loop exit
PB: predicated region body
PF: predicated region fallthrough
CT: control target
= control target key end

     0   :  { %s125_s0 = inlined_call_operand.vmem [shape: f32[512], index: 0, kind: input, shape index: {}]   ;;  %s126_s1 = inlined_call_operand.hbm [shape: f32[2,1,16,16], index: 1, kind: output, shape index: {}]  }
   0x1   :  { %v6_v0 = vld [vmem:[%s125_s0] sm:$0xf] }
   0x2   :  { %7 = vst [vmem:[#allocation2] sm:$0xf] %v6_v0 }
   0x3   :  { %2 = vsyncpa [#allocation1], 0  ;;  %s93_s0 = smov 112   ;;  %s94_s8 = smov 80   ;;  %vm9_vm0 = vcmask 130048  }
   0x4   :  { %s95_s9 = smov 96   ;;  %s96_s10 = smov 64  }
   0x5   :  { %s97_s11 = smov 48   ;;  %s98_s12 = smov 32  }
   0x6   :  { %s99_s13 = smov 16   ;;  %s100_s14 = smov [#allocation0]  }
   0x7   :  { %s57_s15 = sshll.u32 %s100_s14, 4  ;;  %s58_s15 = int_to_ptr.vmem [resolvable:$true] %s57_s15 }
   0x8   :  { %s71_s16 = scalar_lea.vmem %s58_s15, 512  ;;  %p76_p1 = scmp.lt.s32.totalorder %s58_s15, %s58_s15 }
   0x9   :  { %v11_v1 = vld [vmem:[#allocation2] sm:$0xf]   ;;  %p72_p0 = scmp.ne.s32.totalorder %s58_s15, %s71_s16  ;;  %p77_p2 = scmp.lt.s32.totalorder %s71_s16, %s71_s16 }
   0xa   :  { %v23_v2 = vld [vmem:[#allocation2] sm:$0xf]   ;;  %12 = vrot.lane.b32.xlu0 %v11_v1, %s93_s0 }
   0xb   :  { %24 = vrot.lane.b32.xlu1 %v23_v2, %s94_s8  ;;  %v17_v3 = vld [vmem:[#allocation2] sm:$0xf]   ;;  %p78_p3 = por %p77_p2, %p76_p1 }
   0xc   :  { %v29_v4 = vld [vmem:[#allocation2] sm:$0xf]  }
   0xd   :  { %v8_v5 = vld [vmem:[#allocation2] sm:$0xf]   ;;  %p79_p4 = pnand %p78_p3, %p72_p0 }
   0xe   :  { %10 = vst.msk [vmem:[#allocation0] ss:$8 sm:$0xf] %vm9_vm0, %v8_v5   ;;  %18 = vrot.lane.b32.xlu0 %v17_v3, %s95_s9  ;;  %v35_v6 = vld [vmem:[#allocation2] sm:$0xf]  }
   0xf   :  { %30 = vrot.lane.b32.xlu1 %v29_v4, %s96_s10  ;;  %v41_v7 = vld [vmem:[#allocation2] sm:$0xf]  }
  0x10   :  { %v47_v8 = vld [vmem:[#allocation2] sm:$0xf]  }
  0x12   :  { %36 = vrot.lane.b32.xlu0 %v35_v6, %s97_s11 }
  0x13   :  { %42 = vrot.lane.b32.xlu1 %v41_v7, %s98_s12 }
  0x16   :  { %48 = vrot.lane.b32.xlu0 %v47_v8, %s99_s13 }
  0x7c   :  { %v13_v9 = vpop.permute.xlu0 %12  }
  0x7d   :  { %v25_v10 = vpop.permute.xlu1 %24   ;;  %16 = vst.msk [vmem:[#allocation0 + $0x1] ss:$8 sm:$0xf] %vm9_vm0, %v13_v9  }
  0x7e   :  { %28 = vst.msk [vmem:[#allocation0 + $0x3] ss:$8 sm:$0xf] %vm9_vm0, %v25_v10  }
  0x80   :  { %v19_v11 = vpop.permute.xlu0 %18  }
  0x81   :  { %v31_v12 = vpop.permute.xlu1 %30   ;;  %22 = vst.msk [vmem:[#allocation0 + $0x2] ss:$8 sm:$0xf] %vm9_vm0, %v19_v11  }
  0x82   :  { %34 = vst.msk [vmem:[#allocation0 + $0x4] ss:$8 sm:$0xf] %vm9_vm0, %v31_v12  }
  0x84   :  { %v37_v13 = vpop.permute.xlu0 %36  }
  0x85   :  { %v43_v14 = vpop.permute.xlu1 %42   ;;  %40 = vst.msk [vmem:[#allocation0 + $0x5] ss:$8 sm:$0xf] %vm9_vm0, %v37_v13  }
  0x86   :  { %46 = vst.msk [vmem:[#allocation0 + $0x6] ss:$8 sm:$0xf] %vm9_vm0, %v43_v14  }
  0x88   :  { %v49_v15 = vpop.permute.xlu0 %48  }
  0x89   :  { %52 = vst.msk [vmem:[#allocation0 + $0x7] ss:$8 sm:$0xf] %vm9_vm0, %v49_v15  }
  0x8a   :  { %82 = shalt.err (!%p79_p4)
}
  0x8b   :  { %60 = dma.vmem_to_hbm [thread:$0]  %s58_s15, 512, %s126_s1, [#allocation1]  }
  0x8c   :  { %91 = dma.done.wait [#allocation1], 512  }
  0x8d   :  { %92 = vsyncadd [#allocation1], 4294966784 }
  0x8e   :  { %62 = vsyncpa [#allocation1], 1 }

// kernel: dsvdd_forward.1
= control target key start
LH: loop header
LB: loop body
LE: loop exit
PB: predicated region body
PF: predicated region fallthrough
CT: control target
= control target key end

     0   :  { %s1993_s18 = smov 0   ;;  %s1995_s19 = smov 0   ;;  %s3603_s0 = inlined_call_operand.vmem [shape: bf16[58,512], index: 0, kind: input, shape index: {}]   ;;  %s3604_s1 = inlined_call_operand.vmem [shape: bf16[56,58], index: 1, kind: input, shape index: {}]   ;;  %s3605_s2 = inlined_call_operand.vmem [shape: f32[56,1], index: 2, kind: input, shape index: {}]   ;;  %s3606_s3 = inlined_call_operand.vmem [shape: bf16[256,56], index: 3, kind: input, shape index: {}]   ;;  %s3607_s4 = inlined_call_operand.vmem [shape: f32[256,1], index: 4, kind: input, shape index: {}]   ;;  %s3608_s5 = inlined_call_operand.vmem [shape: f32[1,512], index: 5, kind: output, shape index: {}]  }
   0x1   :  { %s1997_s20 = smov 0  }
   0x2 LB: > { %s1782_s21 = sadd.s32 4294967295, %s1959_s20   ;;  %s2010_s22 = sadd.s32 1, %s1959_s20   ;;  %s1959_s20 = sphi %s1997_s20, %s3756_s20   ;;  %s1955_s19 = sphi %s1995_s19, %s3755_s19   ;;  %s1951_s18 = sphi %s1993_s18, %s3754_s18  }
   0x3   : > { %s19_s23 = ssub.s32 %s1959_s20, %s2010_s22  ;;  %s22_s24 = sadd.s32 1, %s1955_s19 }
   0x4   : > { %p20_p0 = scmp.eq.s32.totalorder %s19_s23, 0  ;;  %p29_p1 = scmp.ne.s32.totalorder %s1955_s19, %s1951_s18 }
   0x5   : > { %p30_p2 = scmp.eq.s32.totalorder %s1959_s20, 0  ;;  %p1785_p4 = scmp.ge.s32.totalorder %s1959_s20, 2 }
   0x6   : > { %s2019_s25 = scalar_select %p20_p0, %s1955_s19, %s22_s24  }
   0x7   : > { %p31_p3 = por %p30_p2, %p29_p1  ;;  %177 = sbr.rel (%p1785_p4) target bundleno = 20 (0x14), region = 32 }
   0xc   : > { %180 = sbr.rel (!%p31_p3) target bundleno = 20 (0x14), region = 36  ;;  %s182_s26 = sand.u32 (%p31_p3), 1, %s1955_s19  }
   0xd   : > { %s1844_s27 = sshll.u32 (%p31_p3), %s1959_s20, 3  ;;  %s1786_s28 = sshll.u32 (%p31_p3), %s182_s26, 6 }
   0xe   : > { %s187_s6 = scalar_lea.vmem (%p31_p3), %s3603_s0, %s1844_s27  ;;  %s184_s7 = scalar_lea.vmem (%p31_p3), [#allocation2], %s1786_s28 }
   0xf   : > { %v230_v0 = vld [vmem:[%s187_s6] sm:$0xff] (%p31_p3)  ;;  %v232_v1 = vld [vmem:[%s187_s6 + $0x10] sm:$0xff] (%p31_p3) }
  0x10   : > { %v234_v2 = vld [vmem:[%s187_s6 + $0x20] sm:$0xff] (%p31_p3)  ;;  %231 = vst [vmem:[%s184_s7] sm:$0xff] (%p31_p3), %v230_v0  ;;  %233 = vst [vmem:[%s184_s7 + $0x8] sm:$0xff] (%p31_p3), %v232_v1  ;;  %v236_v3 = vld [vmem:[%s187_s6 + $0x30] sm:$0xff] (%p31_p3) }
  0x11   : > { %235 = vst [vmem:[%s184_s7 + $0x10] sm:$0xff] %v234_v2  ;;  %v238_v4 = vld [vmem:[%s187_s6 + $0x40] sm:$0xff]  ;;  %v240_v5 = vld [vmem:[%s187_s6 + $0x50] sm:$0xff]  ;;  %237 = vst [vmem:[%s184_s7 + $0x18] sm:$0xff] %v236_v3 }
  0x12   : > { %239 = vst [vmem:[%s184_s7 + $0x20] sm:$0xff] %v238_v4  ;;  %241 = vst [vmem:[%s184_s7 + $0x28] sm:$0xff] %v240_v5  ;;  %v242_v6 = vld [vmem:[%s187_s6 + $0x60] sm:$0xff]  ;;  %v244_v7 = vld [vmem:[%s187_s6 + $0x70] sm:$0xff] }
  0x13   : > { %243 = vst [vmem:[%s184_s7 + $0x30] sm:$0xff] %v242_v6  ;;  %245 = vst [vmem:[%s184_s7 + $0x38] sm:$0xff] %v244_v7 }
  0x14 PF: > { %p1789_p5 = scmp.ge.s32.totalorder %s1959_s20, 1  ;;  %p250_p6 = scmp.lt.s32.totalorder %s1959_s20, 3 }
  0x16   : > { %p251_p7 = pnand %p1789_p5, %p250_p6 }
  0x18   : > { %254 = sbr.rel (%p251_p7) target bundleno = 781 (0x30d), region = 74 }
  0x1d   : > { %s257_s8 = sand.u32 1, %s1951_s18   ;;  %v1961_v8 = vmov 0   ;;  %vm480_vm0 = vcmask 1044480   ;;  %v311_v15 = vld [vmem:[%s3605_s2 + $0x30] sm:$0xff]  ;;  %v310_v16 = vld [vmem:[%s3605_s2 + $0x28] sm:$0xff]  ;;  %v309_v18 = vld [vmem:[%s3605_s2 + $0x20] sm:$0xff] }
  0x1e   : > { %s1790_s9 = sshll.u32 %s257_s8, 6  ;;  %519 = vmatprep.mubr.bf16.mxu0 %v1961_v8  ;;  %1879 = vset.pattern.permute.xlu0 %v1961_v8  ;;  %v307_v20 = vld [vmem:[%s3605_s2 + $0x10] sm:$0xff]  ;;  %v308_v22 = vld [vmem:[%s3605_s2 + $0x18] sm:$0xff]  ;;  %v305_v23 = vld [vmem:[%s3605_s2] sm:$0xff]  ;;  %vm467_vm1 = vcmask 474112   ;;  %vm733_vm2 = vcmask 1043456  }
  0x1f   : > { %1880 = vset.pattern.permute.xlu1 %v1961_v8  ;;  %832 = vmatprep.mubr.bf16.mxu1 %v1961_v8  ;;  %s259_s10 = scalar_lea.vmem [#allocation2], %s1790_s9  ;;  %v1893_v24 = vld [vmem:[%s3604_s1] sm:$0xff]   ;;  %v306_v25 = vld [vmem:[%s3605_s2 + $0x8] sm:$0xff]  ;;  %v346_v28 = vld [vmem:[%s3607_s4 + $0x10] sm:$0xff]  ;;  %vm684_vm3 = vcmask 457728   ;;  %s1791_s9 = sshll.u32 %s1782_s21, 1 }
  0x20   : > { %v1881_v9 = vld [vmem:[%s259_s10 + $0x34] ss:$8 sps:$4 sm:$0x1f]   ;;  %v1883_v10 = vld [vmem:[%s259_s10 + $0x30] ss:$8 sps:$4 sm:$0x1f]   ;;  %408 = vperm.xlu0 %1879, %v311_v15   ;;  %403 = vperm.xlu1 %1880, %v310_v16  }
  0x21   : > { %1804 = vmatprep.subr.msk.bf16.mxu0 %vm480_vm0, %v1881_v9  ;;  %v1884_v11 = vld [vmem:[%s259_s10 + $0x24] ss:$8 sps:$4 sm:$0xff]   ;;  %v482_v12 = vsel %vm480_vm0, %v1883_v10, 0  ;;  %v1886_v13 = vld [vmem:[%s259_s10 + $0x20] ss:$8 sps:$4 sm:$0xff]   ;;  %v347_v30 = vld [vmem:[%s3607_s4 + $0x18] sm:$0xff] }
  0x22   : > { %496 = vmatpush1.bf16.msra.mxu0 %v482_v12  ;;  %v1887_v14 = vld [vmem:[%s259_s10 + $0x14] ss:$8 sps:$4 sm:$0xff]   ;;  %v1889_v17 = vld [vmem:[%s259_s10 + $0x10] ss:$8 sps:$4 sm:$0xff]   ;;  %v1890_v19 = vld [vmem:[%s259_s10 + $0x4] ss:$8 sps:$4 sm:$0xff]  }
  0x23   : > { %497 = vmatprep.subr.bf16.mxu0 %v1884_v11  ;;  %v1892_v21 = vld [vmem:[%s259_s10] ss:$8 sps:$4 sm:$0xff]   ;;  %v350_v33 = vld [vmem:[%s3607_s4 + $0x30] sm:$0xff]  ;;  %v351_v35 = vld [vmem:[%s3607_s4 + $0x38] sm:$0xff]  ;;  %p285_p8 = scmp.lt.s32.totalorder %s1791_s9, 3 }
  0x24   : > { %398 = vperm.xlu0 %1879, %v309_v18   ;;  %388 = vperm.xlu1 %1880, %v307_v20   ;;  %v344_v26 = vld [vmem:[%s3607_s4] sm:$0xff]  ;;  %v345_v27 = vld [vmem:[%s3607_s4 + $0x8] sm:$0xff]  ;;  %v1895_v34 = vld [vmem:[%s3604_s1 + $0x10] sm:$0xff]  }
  0x25   : > { %v1894_v29 = vld [vmem:[%s3604_s1 + $0x8] sm:$0xff]   ;;  %v348_v31 = vld [vmem:[%s3607_s4 + $0x20] sm:$0xff]  ;;  %v354_v38 = vld [vmem:[%s3607_s4 + $0x50] sm:$0xff]  ;;  %s3758_s9 = smov (!%p285_p8, %s1791_s9), 3 }
  0x26   : > { %498 = vmatpush1.bf16.msra.mxu0 %v1886_v13  ;;  %v349_v32 = vld [vmem:[%s3607_s4 + $0x28] sm:$0xff]  ;;  %v352_v36 = vld [vmem:[%s3607_s4 + $0x40] sm:$0xff]  ;;  %v1896_v39 = vld [vmem:[%s3604_s1 + $0x18] ss:$0 sps:$4 sm:$0xff]   ;;  %s287_s12 = scalar_lea.vmem %s3608_s5, %s3758_s9 }
  0x27   : > { %499 = vmatprep.subr.bf16.mxu0 %v1887_v14  ;;  %v353_v37 = vld [vmem:[%s3607_s4 + $0x48] sm:$0xff]  ;;  %v355_v40 = vld [vmem:[%s3607_s4 + $0x58] sm:$0xff]  ;;  %v356_v41 = vld [vmem:[%s3607_s4 + $0x60] sm:$0xff] }
  0x28   : > { %393 = vperm.xlu0 %1879, %v308_v22   ;;  %378 = vperm.xlu1 %1880, %v305_v23   ;;  %v357_v42 = vld [vmem:[%s3607_s4 + $0x68] sm:$0xff]  ;;  %v358_v43 = vld [vmem:[%s3607_s4 + $0x70] sm:$0xff]  ;;  %v359_v44 = vld [vmem:[%s3607_s4 + $0x78] sm:$0xff] }
  0x29   : > { %v360_v45 = vld [vmem:[%s3607_s4 + $0x80] sm:$0xff]  ;;  %v361_v46 = vld [vmem:[%s3607_s4 + $0x88] sm:$0xff]  ;;  %v362_v47 = vld [vmem:[%s3607_s4 + $0x90] sm:$0xff] }
  0x2a   : > { %500 = vmatpush1.bf16.msra.mxu0 %v1889_v17  ;;  %v363_v48 = vld [vmem:[%s3607_s4 + $0x98] sm:$0xff]  ;;  %v364_v49 = vld [vmem:[%s3607_s4 + $0xa0] sm:$0xff]  ;;  %v365_v50 = vld [vmem:[%s3607_s4 + $0xa8] sm:$0xff] }
  0x2b   : > { %501 = vmatprep.subr.bf16.mxu0 %v1890_v19  ;;  %v366_v51 = vld [vmem:[%s3607_s4 + $0xb0] sm:$0xff]  ;;  %v367_v52 = vld [vmem:[%s3607_s4 + $0xb8] sm:$0xff]  ;;  %v368_v53 = vld [vmem:[%s3607_s4 + $0xc0] sm:$0xff] }
  0x2c   : > { %383 = vperm.xlu0 %1879, %v306_v25   ;;  %935 = vperm.xlu1 %1880, %v344_v26   ;;  %v369_v54 = vld [vmem:[%s3607_s4 + $0xc8] sm:$0xff]  ;;  %v370_v55 = vld [vmem:[%s3607_s4 + $0xd0] sm:$0xff]  ;;  %v371_v56 = vld [vmem:[%s3607_s4 + $0xd8] sm:$0xff] }
  0x2d   : > { %v372_v57 = vld [vmem:[%s3607_s4 + $0xe0] sm:$0xff]  ;;  %v373_v58 = vld [vmem:[%s3607_s4 + $0xe8] sm:$0xff]  ;;  %v374_v59 = vld [vmem:[%s3607_s4 + $0xf0] sm:$0xff] }
  0x2e   : > { %502 = vmatpush1.bf16.msra.mxu0 %v1892_v21  ;;  %v375_v60 = vld [vmem:[%s3607_s4 + $0xf8] sm:$0xff] }
  0x30   : > { %940 = vperm.xlu0 %1879, %v345_v27   ;;  %945 = vperm.xlu1 %1880, %v346_v28  }
  0x31   : > { %1805 = vmatmul.mubr.msk.bf16.vlgmr.msra.gmra.mxu0 %vm467_vm1, %v1893_v24 }
  0x32   : > { %529 = vmatprep.mubr.bf16.mxu0 %v1961_v8 }
  0x34   : > { %950 = vperm.xlu0 %1879, %v347_v30   ;;  %955 = vperm.xlu1 %1880, %v348_v31  }
  0x38   : > { %960 = vperm.xlu0 %1879, %v349_v32   ;;  %965 = vperm.xlu1 %1880, %v350_v33  }
  0x39   : > { %1806 = vmatmul.mubr.msk.bf16.gmra.mxu0 %vm467_vm1, %v1894_v29 }
  0x3a   : > { %539 = vmatprep.mubr.bf16.mxu0 %v1961_v8 }
  0x3c   : > { %970 = vperm.xlu0 %1879, %v351_v35   ;;  %975 = vperm.xlu1 %1880, %v352_v36  }
  0x40   : > { %980 = vperm.xlu0 %1879, %v353_v37   ;;  %985 = vperm.xlu1 %1880, %v354_v38  }
  0x41   : > { %1807 = vmatmul.mubr.msk.bf16.gmra.mxu0 %vm467_vm1, %v1895_v34 }
  0x42   : > { %549 = vmatprep.mubr.bf16.mxu0 %v1961_v8 }
  0x44   : > { %990 = vperm.xlu0 %1879, %v355_v40   ;;  %995 = vperm.xlu1 %1880, %v356_v41  }
  0x48   : > { %1000 = vperm.xlu0 %1879, %v357_v42   ;;  %1005 = vperm.xlu1 %1880, %v358_v43  }
  0x49   : > { %1808 = vmatmul.mubr.msk.bf16.gmra.mxu0 %vm467_vm1, %v1896_v39 }
  0x4a   : > { %772 = vmatprep.mubr.bf16.mxu0 %v1961_v8 }
  0x4c   : > { %1010 = vperm.xlu0 %1879, %v359_v44   ;;  %1015 = vperm.xlu1 %1880, %v360_v45  }
  0x50   : > { %1020 = vperm.xlu0 %1879, %v361_v46   ;;  %1025 = vperm.xlu1 %1880, %v362_v47  }
  0x54   : > { %1030 = vperm.xlu0 %1879, %v363_v48   ;;  %1035 = vperm.xlu1 %1880, %v364_v49  }
  0x58   : > { %1040 = vperm.xlu0 %1879, %v365_v50   ;;  %1045 = vperm.xlu1 %1880, %v366_v51  }
  0x5c   : > { %1050 = vperm.xlu0 %1879, %v367_v52   ;;  %1055 = vperm.xlu1 %1880, %v368_v53  }
  0x60   : > { %1060 = vperm.xlu0 %1879, %v369_v54   ;;  %1065 = vperm.xlu1 %1880, %v370_v55  }
  0x64   : > { %1070 = vperm.xlu0 %1879, %v371_v56   ;;  %1075 = vperm.xlu1 %1880, %v372_v57  }
  0x68   : > { %1080 = vperm.xlu0 %1879, %v373_v58   ;;  %1085 = vperm.xlu1 %1880, %v374_v59  }
  0x6c   : > { %1090 = vperm.xlu0 %1879, %v375_v60  }
  0x9b   : > { %v409_v61 = vpop.permute.xlu0 %408  ;;  %v404_v62 = vpop.permute.xlu1 %403 }
  0x9f   : > { %v399_v63 = vpop.permute.xlu0 %398  ;;  %v389_v0 = vpop.permute.xlu1 %388 }
  0xa3   : > { %v394_v1 = vpop.permute.xlu0 %393  ;;  %v379_v3 = vpop.permute.xlu1 %378 }
  0xa7   : > { %v384_v6 = vpop.permute.xlu0 %383 }
  0xf1   : > { %v521_v2 = vpop.f32.mrf.mxu0 }
  0xf2   : > { %v2171_v5 = vadd.f32 %v521_v2, %v379_v3 }
  0xf3   : > { %v523_v4 = vpop.f32.mrf.mxu0 }
  0xf4   : > { %v2173_v9 = vadd.f32 %v523_v4, %v379_v3  ;;  %v558_v12 = vmul.f32 %v2171_v5, %v2171_v5 }
  0xf5   : > { %v525_v7 = vpop.f32.mrf.mxu0 }
  0xf6   : > { %v2175_v10 = vadd.f32 %v525_v7, %v384_v6  ;;  %v559_v16 = vmul.f32 %v2173_v9, %v2173_v9  ;;  %v1897_v7 = vld [vmem:[%s3606_s3] sm:$0xff]  }
  0xf7   : > { %v527_v11 = vpop.f32.mrf.mxu0 }
  0xf8   : > { %v560_v13 = vmul.f32 %v2175_v10, %v2175_v10  ;;  %v2181_v14 = vadd.f32 %v527_v11, %v384_v6  ;;  %v596_v6 = vpack.c.bf16 %v2175_v10, %v2171_v5  ;;  %v1898_v11 = vld [vmem:[%s3606_s3 + $0x30] sm:$0xff]   ;;  %v1899_v5 = vld [vmem:[%s3606_s3 + $0x8] sm:$0xff]  }
  0xf9   : > { %v531_v15 = vpop.f32.mrf.mxu0  ;;  %v1901_v10 = vld [vmem:[%s3606_s3 + $0x10] sm:$0xff]  }
  0xfa   : > { %v572_v17 = vadd.f32 %v560_v13, %v558_v12  ;;  %v561_v18 = vmul.f32 %v2181_v14, %v2181_v14  ;;  %v532_v19 = vadd.f32 %v531_v15, %v389_v0  ;;  %v597_v4 = vpack.c.bf16 %v2181_v14, %v2173_v9  ;;  %v1900_v9 = vld [vmem:[%s3606_s3 + $0x38] sm:$0xff]   ;;  %v1902_v12 = vld [vmem:[%s3606_s3 + $0x40] sm:$0xff]   ;;  %v1904_v14 = vld [vmem:[%s3606_s3 + $0x48] sm:$0xff]  }
  0xfb   : > { %v533_v20 = vpop.f32.mrf.mxu0  ;;  %v1903_v13 = vld [vmem:[%s3606_s3 + $0x18] sm:$0xff]   ;;  %v1905_v15 = vld [vmem:[%s3606_s3 + $0x20] sm:$0xff]  }
  0xfc   : > { %v584_v21 = vadd.f32 %v561_v18, %v559_v16  ;;  %v562_v22 = vmul.f32 %v532_v19, %v532_v19  ;;  %v534_v23 = vadd.f32 %v533_v20, %v389_v0  ;;  %v1906_v16 = vld [vmem:[%s3606_s3 + $0x50] sm:$0xff]   ;;  %v1908_v18 = vld [vmem:[%s3606_s3 + $0x58] sm:$0xff]   ;;  %v1910_v20 = vld [vmem:[%s3606_s3 + $0x68] sm:$0xff]  }
  0xfd   : > { %v535_v24 = vpop.f32.mrf.mxu0 }
  0xfe   : > { %v573_v25 = vadd.f32 %v572_v17, %v562_v22  ;;  %v563_v26 = vmul.f32 %v534_v23, %v534_v23  ;;  %v536_v27 = vadd.f32 %v535_v24, %v394_v1  ;;  %v1907_v17 = vld [vmem:[%s3606_s3 + $0x28] sm:$0xff]   ;;  %v1912_v22 = vld [vmem:[%s3606_s3 + $0x78] sm:$0xff]   ;;  %v2275_v24 = vpop.permute.xlu0 %940 }
  0xff   : > { %v537_v28 = vpop.f32.mrf.mxu0 }
 0x100   : > { %v585_v29 = vadd.f32 %v584_v21, %v563_v26  ;;  %v564_v30 = vmul.f32 %v536_v27, %v536_v27  ;;  %v538_v31 = vadd.f32 %v537_v28, %v394_v1  ;;  %v1911_v21 = vld [vmem:[%s3606_s3 + $0x70] sm:$0xff]  }
 0x101   : > { %v541_v32 = vpop.f32.mrf.mxu0 }
 0x102   : > { %v574_v33 = vadd.f32 %v573_v25, %v564_v30  ;;  %v565_v34 = vmul.f32 %v538_v31, %v538_v31  ;;  %v542_v35 = vadd.f32 %v541_v32, %v399_v63  ;;  %v599_v3 = vpack.c.bf16 %v538_v31, %v534_v23  ;;  %v2273_v23 = vpop.permute.xlu1 %935  ;;  %v2279_v26 = vpop.permute.xlu0 %950 }
 0x103   : > { %v543_v36 = vpop.f32.mrf.mxu0 }
 0x104   : > { %v586_v37 = vadd.f32 %v585_v29, %v565_v34  ;;  %v566_v38 = vmul.f32 %v542_v35, %v542_v35  ;;  %v544_v39 = vadd.f32 %v543_v36, %v399_v63 }
 0x105   : > { %v545_v40 = vpop.f32.mrf.mxu0 }
 0x106   : > { %v575_v41 = vadd.f32 %v574_v33, %v566_v38  ;;  %v567_v42 = vmul.f32 %v544_v39, %v544_v39  ;;  %v546_v43 = vadd.f32 %v545_v40, %v404_v62  ;;  %v2277_v25 = vpop.permute.xlu1 %945  ;;  %v2283_v28 = vpop.permute.xlu0 %960 }
 0x107   : > { %v547_v44 = vpop.f32.mrf.mxu0 }
 0x108   : > { %v587_v45 = vadd.f32 %v586_v37, %v567_v42  ;;  %v568_v46 = vmul.f32 %v546_v43, %v546_v43  ;;  %v548_v47 = vadd.f32 %v547_v44, %v404_v62  ;;  %v600_v2 = vpack.c.bf16 %v546_v43, %v542_v35 }
 0x109   : > { %v551_v48 = vpop.f32.mrf.mxu0 }
 0x10a   : > { %v576_v49 = vadd.f32 %v575_v41, %v568_v46  ;;  %v569_v50 = vmul.f32 %v548_v47, %v548_v47  ;;  %v552_v51 = vadd.f32 %v551_v48, %v409_v61  ;;  %v601_v0 = vpack.c.bf16 %v548_v47, %v544_v39  ;;  %v2289_v37 = vpop.permute.xlu0 %970 }
 0x10b   : > { %v553_v52 = vpop.f32.mrf.mxu0 }
 0x10c   : > { %v588_v53 = vadd.f32 %v587_v45, %v569_v50  ;;  %v570_v54 = vmul.f32 %v552_v51, %v552_v51  ;;  %v602_v55 = vpack.c.bf16 %v552_v51, %v552_v51  ;;  %v554_v56 = vadd.f32 %v553_v52, %v409_v61 }
 0x10d   : > { %v555_v57 = vpop.f32.mrf.mxu0  ;;  %v598_v61 = vpack.c.bf16 %v536_v27, %v532_v19  ;;  %v1909_v19 = vld [vmem:[%s3606_s3 + $0x60] sm:$0xff]   ;;  %v2281_v27 = vpop.permute.xlu1 %955 }
 0x10e   : > { %v2187_v58 = vadd.f32 %v576_v49, %v570_v54  ;;  %v571_v59 = vmul.f32 %v554_v56, %v554_v56  ;;  %v603_v60 = vpack.c.bf16 %v554_v56, %v554_v56  ;;  %v735_v62 = vsel %vm733_vm2, %v602_v55, 0  ;;  %v2295_v47 = vpop.permute.xlu0 %980 }
 0x10f   : > { %v556_v63 = vpop.f32.mrf.mxu0 }
 0x110   : > { %v2189_v1 = vadd.f32 %v588_v53, %v571_v59  ;;  %1825 = vmatprep.subr.msk.bf16.mxu0 %vm733_vm2, %v603_v60  ;;  %1845 = vmatprep.subr.msk.bf16.mxu1 %vm733_vm2, %v603_v60  ;;  %v578_v33 = vrot.slane %v2187_v58, 4 }
 0x111   : > { %749 = vmatpush1.bf16.msra.mxu0 %v735_v62  ;;  %1849 = vmatpush1.bf16.msra.mxu1 %v735_v62  ;;  %v2285_v32 = vpop.permute.xlu1 %965 }
 0x112   : > { %750 = vmatprep.subr.bf16.mxu0 %v601_v0  ;;  %1846 = vmatprep.subr.bf16.mxu1 %v601_v0  ;;  %v590_v34 = vrot.slane %v2189_v1, 4  ;;  %v579_v40 = vadd.f32 %v578_v33, %v2187_v58  ;;  %v2305_v59 = vpop.permute.xlu0 %990 }
 0x114   : > { %v591_v41 = vadd.f32 %v590_v34, %v2189_v1  ;;  %v580_v48 = vrot.slane %v579_v40, 2 }
 0x115   : > { %751 = vmatpush1.bf16.msra.mxu0 %v600_v2  ;;  %1850 = vmatpush1.bf16.msra.mxu1 %v600_v2  ;;  %v2293_v44 = vpop.permute.xlu1 %975 }
 0x116   : > { %752 = vmatprep.subr.bf16.mxu0 %v599_v3  ;;  %1847 = vmatprep.subr.bf16.mxu1 %v599_v3  ;;  %v592_v49 = vrot.slane %v591_v41, 2  ;;  %v581_v55 = vadd.f32 %v580_v48, %v579_v40 }
 0x118   : > { %v593_v56 = vadd.f32 %v592_v49, %v591_v41  ;;  %v582_v0 = vrot.slane %v581_v55, 1 }
 0x119   : > { %753 = vmatpush1.bf16.msra.mxu0 %v598_v61  ;;  %1851 = vmatpush1.bf16.msra.mxu1 %v598_v61  ;;  %v2301_v54 = vpop.permute.xlu1 %985 }
 0x11a   : > { %754 = vmatprep.subr.bf16.mxu0 %v597_v4  ;;  %1848 = vmatprep.subr.bf16.mxu1 %v597_v4  ;;  %v594_v1 = vrot.slane %v593_v56, 1 }
 0x11d   : > { %755 = vmatpush1.bf16.msra.mxu0 %v596_v6  ;;  %1852 = vmatpush1.bf16.msra.mxu1 %v596_v6  ;;  %v996_v3 = vpop.permute.xlu1 %995  ;;  %v1001_v6 = vpop.permute.xlu0 %1000 }
 0x120   : > { %1826 = vmatmul.mubr.msk.bf16.vlgmr.msra.gmra.mxu0 %vm684_vm3, %v1897_v7  ;;  %1832 = vmatmul.mubr.msk.bf16.vlgmr.msra.gmra.mxu1 %vm684_vm3, %v1898_v11  ;;  %v2315_v7 = vadd.f32 %v582_v0, %v581_v55  ;;  %v2317_v11 = vadd.f32 %v594_v1, %v593_v56 }
 0x121   : > { %782 = vmatprep.mubr.bf16.mxu0 %v1961_v8  ;;  %842 = vmatprep.mubr.bf16.mxu1 %v1961_v8 }
 0x128   : > { %1827 = vmatmul.mubr.msk.bf16.gmra.mxu0 %vm684_vm3, %v1899_v5  ;;  %1833 = vmatmul.mubr.msk.bf16.gmra.mxu1 %vm684_vm3, %v1900_v9 }
 0x129   : > { %792 = vmatprep.mubr.bf16.mxu0 %v1961_v8  ;;  %852 = vmatprep.mubr.bf16.mxu1 %v1961_v8 }
 0x130   : > { %1828 = vmatmul.mubr.msk.bf16.gmra.mxu0 %vm684_vm3, %v1901_v10  ;;  %1834 = vmatmul.mubr.msk.bf16.gmra.mxu1 %vm684_vm3, %v1902_v12 }
 0x131   : > { %802 = vmatprep.mubr.bf16.mxu0 %v1961_v8  ;;  %862 = vmatprep.mubr.bf16.mxu1 %v1961_v8 }
 0x138   : > { %1829 = vmatmul.mubr.msk.bf16.gmra.mxu0 %vm684_vm3, %v1903_v13  ;;  %1835 = vmatmul.mubr.msk.bf16.gmra.mxu1 %vm684_vm3, %v1904_v14 }
 0x139   : > { %812 = vmatprep.mubr.bf16.mxu0 %v1961_v8  ;;  %872 = vmatprep.mubr.bf16.mxu1 %v1961_v8 }
 0x140   : > { %1830 = vmatmul.mubr.msk.bf16.gmra.mxu0 %vm684_vm3, %v1905_v15  ;;  %1836 = vmatmul.mubr.msk.bf16.gmra.mxu1 %vm684_vm3, %v1906_v16  ;;  %v1006_v16 = vpop.permute.xlu1 %1005 }
 0x141   : > { %822 = vmatprep.mubr.bf16.mxu0 %v1961_v8  ;;  %882 = vmatprep.mubr.bf16.mxu1 %v1961_v8 }
 0x148   : > { %1831 = vmatmul.mubr.msk.bf16.gmra.mxu0 %vm684_vm3, %v1907_v17  ;;  %1837 = vmatmul.mubr.msk.bf16.gmra.mxu1 %vm684_vm3, %v1908_v18 }
 0x149   : > { %892 = vmatprep.mubr.bf16.mxu1 %v1961_v8 }
 0x150   : > { %1838 = vmatmul.mubr.msk.bf16.gmra.mxu1 %vm684_vm3, %v1909_v19 }
 0x151   : > { %902 = vmatprep.mubr.bf16.mxu1 %v1961_v8 }
 0x158   : > { %1839 = vmatmul.mubr.msk.bf16.gmra.mxu1 %vm684_vm3, %v1910_v20 }
 0x159   : > { %912 = vmatprep.mubr.bf16.mxu1 %v1961_v8 }
 0x160   : > { %1840 = vmatmul.mubr.msk.bf16.gmra.mxu1 %vm684_vm3, %v1911_v21 }
 0x161   : > { %922 = vmatprep.mubr.bf16.mxu1 %v1961_v8 }
 0x168   : > { %1841 = vmatmul.mubr.msk.bf16.gmra.mxu1 %vm684_vm3, %v1912_v22 }
 0x1e0   : > { %v774_v29 = vpop.f32.mrf.mxu0  ;;  %v834_v8 = vpop.f32.mrf.mxu1 }
 0x1e1   : > { %v775_v10 = vadd.f32 %v774_v29, %v2315_v7  ;;  %v835_v12 = vadd.f32 %v834_v8, %v2315_v7  ;;  %v2335_v8 = vpop.permute.xlu0 %1010 }
 0x1e2   : > { %v776_v30 = vpop.f32.mrf.mxu0  ;;  %v836_v31 = vpop.f32.mrf.mxu1 }
 0x1e3   : > { %v777_v17 = vadd.f32 %v776_v30, %v2317_v11  ;;  %v837_v19 = vadd.f32 %v836_v31, %v2317_v11  ;;  %v2338_v33 = vadd.f32 %v2273_v23, %v775_v10 }
 0x1e4   : > { %v778_v35 = vpop.f32.mrf.mxu0  ;;  %v838_v36 = vpop.f32.mrf.mxu1 }
 0x1e5   : > { %v779_v20 = vadd.f32 %v778_v35, %v2315_v7  ;;  %v839_v21 = vadd.f32 %v838_v36, %v2315_v7  ;;  %v2358_v49 = vadd.f32 %v996_v3, %v837_v19 }
 0x1e6   : > { %v780_v38 = vpop.f32.mrf.mxu0  ;;  %v840_v39 = vpop.f32.mrf.mxu1 }
 0x1e7   : > { %v841_v13 = vadd.f32 %v840_v39, %v2317_v11  ;;  %v781_v34 = vadd.f32 %v780_v38, %v2317_v11  ;;  %v2342_v39 = vadd.f32 %v996_v3, %v835_v12  ;;  %3675 = vst [vmem:[#allocation5_spill] sm:$0xff] %v2358_v49  ;;  %v2361_v55 = vadd.f32 %v2275_v24, %v779_v20 }
 0x1e8   : > { %v784_v42 = vpop.f32.mrf.mxu0  ;;  %v844_v43 = vpop.f32.mrf.mxu1 }
 0x1e9   : > { %v785_v18 = vadd.f32 %v784_v42, %v2315_v7  ;;  %v2344_v40 = vadd.f32 %v1001_v6, %v841_v13  ;;  %v2351_v42 = vadd.f32 %v2273_v23, %v777_v17  ;;  %v845_v38 = vadd.f32 %v844_v43, %v2315_v7  ;;  %v2368_v23 = vpop.permute.xlu1 %1015  ;;  %v2386_v17 = vpop.permute.xlu0 %1020 }
 0x1ea   : > { %v786_v45 = vpop.f32.mrf.mxu0  ;;  %v846_v46 = vpop.f32.mrf.mxu1  ;;  %v2371_v1 = vadd.f32 %v2275_v24, %v781_v34 }
 0x1eb   : > { %v787_v30 = vadd.f32 %v786_v45, %v2317_v11  ;;  %3673 = vst [vmem:[#allocation3_spill] sm:$0xff] %v2344_v40  ;;  %v847_v31 = vadd.f32 %v846_v46, %v2317_v11  ;;  %3674 = vst [vmem:[#allocation4_spill] sm:$0xff] %v2351_v42  ;;  %v2354_v48 = vadd.f32 %v2277_v25, %v785_v18 }
 0x1ec   : > { %v788_v50 = vpop.f32.mrf.mxu0  ;;  %v2297_v51 = vpop.f32.mrf.mxu1  ;;  %v2363_v46 = vadd.f32 %v1001_v6, %v839_v21  ;;  %v1204_v6 = vmin.f32 %v2344_v40, %v2358_v49 }
 0x1ed   : > { %v789_v35 = vadd.f32 %v788_v50, %v2315_v7  ;;  %v2374_v43 = vadd.f32 %v2277_v25, %v787_v30  ;;  %v2380_v10 = vadd.f32 %v1006_v16, %v847_v31  ;;  %v1157_v25 = vmin.f32 %v2338_v33, %v2354_v48 }
 0x1ee   : > { %v2299_v52 = vpop.f32.mrf.mxu0  ;;  %v850_v53 = vpop.f32.mrf.mxu1  ;;  %v2398_v19 = vadd.f32 %v2297_v51, %v2315_v7 }
 0x1ef   : > { %v851_v50 = vadd.f32 %v850_v53, %v2317_v11  ;;  %3676 = vst [vmem:[#allocation6_spill] sm:$0xff] %v2374_v43  ;;  %3677 = vst [vmem:[#allocation7_spill] sm:$0xff] %v2380_v10  ;;  %v2383_v53 = vadd.f32 %v2279_v26, %v789_v35  ;;  %v1194_v30 = vmin.f32 %v2351_v42, %v2374_v43 }
 0x1f0   : > { %v794_v57 = vpop.f32.mrf.mxu0  ;;  %v2303_v58 = vpop.f32.mrf.mxu1  ;;  %v1206_v35 = vmin.f32 %v1204_v6, %v2380_v10 }
 0x1f1   : > { %v795_v45 = vadd.f32 %v794_v57, %v2315_v7  ;;  %v2403_v20 = vadd.f32 %v2335_v8, %v851_v50 }
 0x1f2   : > { %v796_v60 = vpop.f32.mrf.mxu0  ;;  %v2307_v63 = vpop.f32.mrf.mxu1 }
 0x1f3   : > { %v797_v57 = vadd.f32 %v796_v60, %v2317_v11  ;;  %v2390_v60 = vadd.f32 %v1006_v16, %v845_v38  ;;  %3678 = vst [vmem:[#allocation8_spill] sm:$0xff] %v2403_v20  ;;  %v857_v21 = vadd.f32 %v2307_v63, %v2317_v11  ;;  %v1158_v38 = vmin.f32 %v2361_v55, %v2383_v53 }
 0x1f4   : > { %v798_v62 = vpop.f32.mrf.mxu0  ;;  %v2309_v2 = vpop.f32.mrf.mxu1  ;;  %v1208_v10 = vmin.f32 %v1206_v35, %v2403_v20 }
 0x1f5   : > { %v799_v12 = vadd.f32 %v798_v62, %v2315_v7  ;;  %v791_v62 = vadd.f32 %v2299_v52, %v2317_v11  ;;  %v2412_v31 = vadd.f32 %v2281_v27, %v797_v57 }
 0x1f6   : > { %v2311_v61 = vpop.f32.mrf.mxu0  ;;  %v2313_v4 = vpop.f32.mrf.mxu1 }
 0x1f7   : > { %3679 = vst [vmem:[#allocation9_spill] sm:$0xff] %v2412_v31  ;;  %v2422_v63 = vadd.f32 %v2283_v28, %v799_v12  ;;  %v2436_v12 = vadd.f32 %v2279_v26, %v791_v62 }
 0x1f8   : > { %v804_v5 = vpop.f32.mrf.mxu0  ;;  %v2319_v9 = vpop.f32.mrf.mxu1 }
 0x1f9   : > { %v805_v3 = vadd.f32 %v804_v5, %v2315_v7  ;;  %v2393_v5 = vadd.f32 %v2281_v27, %v795_v45  ;;  %v861_v45 = vadd.f32 %v2313_v4, %v2317_v11  ;;  %v2426_v27 = vpop.permute.xlu1 %1025  ;;  %v2440_v4 = vadd.f32 %v2368_v23, %v857_v21 }
 0x1fa   : > { %v2324_v14 = vpop.f32.mrf.mxu0  ;;  %v2326_v15 = vpop.f32.mrf.mxu1  ;;  %v1160_v21 = vmin.f32 %v1158_v38, %v2422_v63 }
 0x1fb   : > { %v2415_v51 = vadd.f32 %v2285_v32, %v805_v3  ;;  %v1159_v57 = vmin.f32 %v1157_v25, %v2393_v5  ;;  %3681 = vst [vmem:[#allocation11_spill] sm:$0xff] %v2440_v4  ;;  %v867_v40 = vadd.f32 %v2326_v15, %v2317_v11  ;;  %v2456_v35 = vadd.f32 %v2386_v17, %v861_v45 }
 0x1fc   : > { %v808_v22 = vpop.f32.mrf.mxu0  ;;  %v2333_v29 = vpop.f32.mrf.mxu1  ;;  %v1210_v38 = vmin.f32 %v1208_v10, %v2440_v4 }
 0x1fd   : > { %v809_v52 = vadd.f32 %v808_v22, %v2315_v7  ;;  %v807_v22 = vadd.f32 %v2324_v14, %v2317_v11  ;;  %v2446_v14 = vpop.permute.xlu0 %1030  ;;  %3682 = vst [vmem:[#allocation12_spill] sm:$0xff] %v2456_v35  ;;  %v2472_v45 = vadd.f32 %v2426_v27, %v867_v40  ;;  %v2483_v10 = vpop.permute.xlu1 %1035 }
 0x1fe   : > { %v2348_v36 = vpop.f32.mrf.mxu0  ;;  %v870_v41 = vpop.f32.mrf.mxu1  ;;  %v1212_v40 = vmin.f32 %v1210_v38, %v2456_v35 }
 0x1ff   : > { %v2451_v26 = vadd.f32 %v2289_v37, %v809_v52  ;;  %v871_v15 = vadd.f32 %v870_v41, %v2317_v11  ;;  %3683 = vst [vmem:[#allocation13_spill] sm:$0xff] %v2472_v45 }
 0x200   : > { %v814_v56 = vpop.f32.mrf.mxu0  ;;  %v2366_v0 = vpop.f32.mrf.mxu1 }
 0x201   : > { %v815_v18 = vadd.f32 %v814_v56, %v2315_v7  ;;  %v1041_v38 = vpop.permute.xlu0 %1040 }
 0x202   : > { %v816_v13 = vpop.f32.mrf.mxu0  ;;  %v876_v24 = vpop.f32.mrf.mxu1 }
 0x203   : > { %v2432_v3 = vadd.f32 %v2293_v44, %v815_v18  ;;  %v1196_v18 = vmin.f32 %v1194_v30, %v2412_v31  ;;  %v817_v43 = vadd.f32 %v816_v13, %v2317_v11  ;;  %v2461_v30 = vadd.f32 %v2285_v32, %v807_v22 }
 0x204   : > { %v818_v16 = vpop.f32.mrf.mxu0  ;;  %v2407_v34 = vpop.f32.mrf.mxu1  ;;  %v877_v41 = vadd.f32 %v876_v24, %v2317_v11  ;;  %v801_v22 = vadd.f32 %v2311_v61, %v2317_v11  ;;  %v2487_v24 = vadd.f32 %v2446_v14, %v871_v15  ;;  %v1214_v15 = vmin.f32 %v1212_v40, %v2472_v45 }
 0x205   : > { %3680 = vst [vmem:[#allocation10_spill] sm:$0xff] %v2432_v3  ;;  %v819_v6 = vadd.f32 %v818_v16, %v2315_v7  ;;  %v1161_v16 = vmin.f32 %v1159_v57, %v2415_v51  ;;  %v1198_v61 = vmin.f32 %v1196_v18, %v2461_v30 }
 0x206   : > { %v820_v50 = vpop.f32.mrf.mxu0  ;;  %v880_v56 = vpop.f32.mrf.mxu1  ;;  %3684 = vst [vmem:[#allocation14_spill] sm:$0xff] %v2487_v24 }
 0x207   : > { %v1163_v57 = vmin.f32 %v1161_v16, %v2432_v3  ;;  %v2465_v52 = vadd.f32 %v2295_v47, %v819_v6  ;;  %v1162_v6 = vmin.f32 %v1160_v21, %v2451_v26  ;;  %v881_v4 = vadd.f32 %v880_v56, %v2317_v11 }
 0x208   : > { %v824_v25 = vpop.f32.mrf.mxu0  ;;  %v2444_v49 = vpop.f32.mrf.mxu1  ;;  %v811_v21 = vadd.f32 %v2348_v36, %v2317_v11  ;;  %v2514_v36 = vadd.f32 %v2335_v8, %v2398_v19  ;;  %v1195_v8 = vmin.f32 %v2371_v1, %v2436_v12 }
 0x209   : > { %v825_v62 = vadd.f32 %v824_v25, %v2315_v7  ;;  %v2525_v45 = vadd.f32 %v1041_v38, %v881_v4 }
 0x20a   : > { %v826_v42 = vpop.f32.mrf.mxu0  ;;  %v886_v20 = vpop.f32.mrf.mxu1 }
 0x20b   : > { %v2468_v25 = vadd.f32 %v2301_v54, %v825_v62  ;;  %v827_v13 = vadd.f32 %v826_v42, %v2317_v11  ;;  %v2490_v42 = vadd.f32 %v2293_v44, %v817_v43  ;;  %v2504_v44 = vadd.f32 %v2483_v10, %v877_v41  ;;  %3687 = vst [vmem:[#allocation17_spill] sm:$0xff] %v2525_v45 }
 0x20c   : > { %v828_v31 = vpop.f32.mrf.mxu0  ;;  %v2476_v32 = vpop.f32.mrf.mxu1 }
 0x20d   : > { %v1165_v16 = vmin.f32 %v1163_v57, %v2468_v25  ;;  %v829_v62 = vadd.f32 %v828_v31, %v2315_v7  ;;  %v1164_v31 = vmin.f32 %v1162_v6, %v2465_v52  ;;  %3685 = vst [vmem:[#allocation15_spill] sm:$0xff] %v2504_v44  ;;  %v2508_v56 = vadd.f32 %v2301_v54, %v827_v13 }
 0x20e   : > { %v2493_v3 = vpop.f32.mrf.mxu1  ;;  %v855_v6 = vadd.f32 %v2303_v58, %v2315_v7  ;;  %v830_v40 = vpop.f32.mrf.mxu0  ;;  %v1200_v54 = vmin.f32 %v1198_v61, %v2490_v42  ;;  %v821_v13 = vadd.f32 %v820_v50, %v2317_v11  ;;  %v859_v58 = vadd.f32 %v2309_v2, %v2315_v7 }
 0x20f   : > { %v2500_v57 = vadd.f32 %v2305_v59, %v829_v62  ;;  %v1167_v43 = vmin.f32 %v1165_v16, %v2342_v39  ;;  %3686 = vst [vmem:[#allocation16_spill] sm:$0xff] %v2508_v56  ;;  %v2519_v62 = vadd.f32 %v2283_v28, %v801_v22  ;;  %v1205_v16 = vmin.f32 %v2487_v24, %v1214_v15  ;;  %v1046_v22 = vpop.permute.xlu1 %1045 }
 0x210   : > { %v2510_v18 = vpop.f32.mrf.mxu1  ;;  %v2532_v28 = vadd.f32 %v2289_v37, %v811_v21  ;;  %v1202_v50 = vmin.f32 %v1200_v54, %v2508_v56  ;;  %v831_v4 = vadd.f32 %v830_v40, %v2317_v11  ;;  %v2540_v24 = vadd.f32 %v2368_v23, %v855_v6  ;;  %v1051_v21 = vpop.permute.xlu0 %1050 }
 0x211   : > { %v1166_v41 = vmin.f32 %v1164_v31, %v2500_v57  ;;  %v1207_v31 = vmin.f32 %v1205_v16, %v2504_v44  ;;  %v1169_v61 = vmin.f32 %v1167_v43, %v2390_v60  ;;  %v865_v2 = vadd.f32 %v2319_v9, %v2315_v7 }
 0x212   : > { %v896_v35 = vpop.f32.mrf.mxu1  ;;  %v2547_v16 = vadd.f32 %v2295_v47, %v821_v13  ;;  %v887_v54 = vadd.f32 %v886_v20, %v2317_v11  ;;  %v2552_v44 = vadd.f32 %v2386_v17, %v859_v58  ;;  %v869_v23 = vadd.f32 %v2333_v29, %v2315_v7 }
 0x213   : > { %v1168_v19 = vmin.f32 %v1166_v41, %v2363_v46  ;;  %v1197_v41 = vmin.f32 %v1195_v8, %v2519_v62  ;;  %v1209_v43 = vmin.f32 %v1207_v31, %v2525_v45  ;;  %v1171_v6 = vmin.f32 %v1169_v61, %v2540_v24  ;;  %v1056_v31 = vpop.permute.xlu1 %1055 }
 0x214   : > { %v898_v15 = vpop.f32.mrf.mxu1  ;;  %v2559_v8 = vadd.f32 %v2305_v59, %v831_v4  ;;  %v2563_v20 = vadd.f32 %v2426_v27, %v865_v2  ;;  %v875_v17 = vadd.f32 %v2366_v0, %v2315_v7  ;;  %v2568_v58 = vadd.f32 %v1046_v22, %v887_v54 }
 0x215   : > { %v1170_v37 = vmin.f32 %v1168_v19, %v2514_v36  ;;  %v1199_v9 = vmin.f32 %v1197_v41, %v2532_v28  ;;  %v1211_v19 = vmin.f32 %v1209_v43, %v1202_v50  ;;  %v2571_v61 = vadd.f32 %v2446_v14, %v869_v23  ;;  %v1061_v50 = vpop.permute.xlu0 %1060 }
 0x216   : > { %v900_v40 = vpop.f32.mrf.mxu1  ;;  %3688 = vst [vmem:[#allocation18_spill] sm:$0xff] %v2559_v8  ;;  %3689 = vst [vmem:[#allocation19_spill] sm:$0xff] %v2568_v58  ;;  %v879_v59 = vadd.f32 %v2407_v34, %v2315_v7  ;;  %v1173_v4 = vmin.f32 %v1171_v6, %v2563_v20  ;;  %v2580_v43 = vadd.f32 %v2483_v10, %v875_v17 }
 0x217   : > { %v1172_v13 = vmin.f32 %v1170_v37, %v2552_v44  ;;  %v1201_v29 = vmin.f32 %v1199_v9, %v2547_v16  ;;  %v1213_v27 = vmin.f32 %v1211_v19, %v2568_v58  ;;  %v885_v14 = vadd.f32 %v2444_v49, %v2315_v7  ;;  %v1066_v6 = vpop.permute.xlu1 %1065 }
 0x218   : > { %v904_v47 = vpop.f32.mrf.mxu1  ;;  %v891_v54 = vadd.f32 %v2493_v3, %v2317_v11  ;;  %v2586_v23 = vadd.f32 %v1041_v38, %v879_v59  ;;  %v889_v9 = vadd.f32 %v2476_v32, %v2315_v7  ;;  %v1175_v19 = vmin.f32 %v1173_v4, %v2580_v43 }
 0x219   : > { %v1203_v2 = vmin.f32 %v1201_v29, %v2559_v8  ;;  %v1174_v0 = vmin.f32 %v1172_v13, %v2571_v61  ;;  %v1071_v17 = vpop.permute.xlu0 %1070  ;;  %v2592_v58 = vadd.f32 %v1046_v22, %v885_v14  ;;  %v895_v3 = vadd.f32 %v2510_v18, %v2315_v7 }
 0x21a   : > { %v906_v41 = vpop.f32.mrf.mxu1  ;;  %v2594_v49 = vadd.f32 %v1051_v21, %v891_v54  ;;  %v897_v38 = vadd.f32 %v896_v35, %v2317_v11  ;;  %v2599_v45 = vadd.f32 %v1051_v21, %v889_v9  ;;  %v899_v32 = vadd.f32 %v898_v15, %v2315_v7 }
 0x21b   : > { %v1215_v29 = vmin.f32 %v1213_v27, %v1203_v2  ;;  %v1176_v10 = vmin.f32 %v1174_v0, %v2586_v23  ;;  %v901_v4 = vadd.f32 %v900_v40, %v2317_v11  ;;  %v1177_v27 = vmin.f32 %v1175_v19, %v2592_v58  ;;  %v1076_v54 = vpop.permute.xlu1 %1075 }
 0x21c   : > { %v908_v37 = vpop.f32.mrf.mxu1  ;;  %3690 = vst [vmem:[#allocation20_spill] sm:$0xff] %v2594_v49  ;;  %v905_v22 = vadd.f32 %v904_v47, %v2315_v7  ;;  %v2608_v35 = vadd.f32 %v1056_v31, %v895_v3  ;;  %v2610_v21 = vadd.f32 %v1056_v31, %v897_v38  ;;  %v907_v15 = vadd.f32 %v906_v41, %v2317_v11 }
 0x21d   : > { %v1216_v2 = vmin.f32 %v2594_v49, %v1215_v29  ;;  %v1178_v14 = vmin.f32 %v1176_v10, %v2599_v45  ;;  %v909_v18 = vadd.f32 %v908_v37, %v2315_v7  ;;  %v2614_v19 = vadd.f32 %v1061_v50, %v899_v32  ;;  %v1081_v49 = vpop.permute.xlu0 %1080 }
 0x21e   : > { %v910_v34 = vpop.f32.mrf.mxu1  ;;  %3691 = vst [vmem:[#allocation21_spill] sm:$0xff] %v2610_v21  ;;  %v2616_v29 = vadd.f32 %v1061_v50, %v901_v4  ;;  %v1179_v10 = vmin.f32 %v1177_v27, %v2608_v35  ;;  %v2621_v3 = vadd.f32 %v1066_v6, %v905_v22  ;;  %v2628_v50 = vadd.f32 %v1066_v6, %v907_v15 }
 0x21f   : > { %v1217_v37 = vmin.f32 %v2610_v21, %v1216_v2  ;;  %v911_v31 = vadd.f32 %v910_v34, %v2317_v11  ;;  %v1180_v41 = vmin.f32 %v1178_v14, %v2614_v19  ;;  %v1086_v2 = vpop.permute.xlu1 %1085 }
 0x220   : > { %v914_v13 = vpop.f32.mrf.mxu1  ;;  %v1181_v34 = vmin.f32 %v1179_v10, %v2621_v3 }
 0x221   : > { %v915_v40 = vadd.f32 %v914_v13, %v2315_v7  ;;  %v2625_v13 = vadd.f32 %v1071_v17, %v909_v18  ;;  %v1218_v22 = vmin.f32 %v2616_v29, %v1217_v37  ;;  %v2637_v21 = vadd.f32 %v1071_v17, %v911_v31 }
 0x222   : > { %v916_v59 = vpop.f32.mrf.mxu1 }
 0x223   : > { %v2630_v4 = vadd.f32 %v1076_v54, %v915_v40  ;;  %v917_v27 = vadd.f32 %v916_v59, %v2317_v11  ;;  %3692 = vst [vmem:[#allocation22_spill] sm:$0xff] %v2637_v21  ;;  %v1182_v18 = vmin.f32 %v1180_v41, %v2625_v13  ;;  %v1219_v59 = vmin.f32 %v2628_v50, %v1218_v22 }
 0x224   : > { %v918_v0 = vpop.f32.mrf.mxu1 }
 0x225   : > { %v919_v47 = vadd.f32 %v918_v0, %v2315_v7  ;;  %v2646_v37 = vadd.f32 %v1076_v54, %v917_v27 }
 0x226   : > { %v920_v9 = vpop.f32.mrf.mxu1 }
 0x227   : > { %v2633_v8 = vadd.f32 %v1081_v49, %v919_v47  ;;  %v921_v6 = vadd.f32 %v920_v9, %v2317_v11  ;;  %v1183_v47 = vmin.f32 %v1181_v34, %v2630_v4  ;;  %v1220_v9 = vmin.f32 %v2637_v21, %v1219_v59 }
 0x228   : > { %v924_v38 = vpop.f32.mrf.mxu1 }
 0x229   : > { %v925_v32 = vadd.f32 %v924_v38, %v2315_v7  ;;  %v1091_v38 = vpop.permute.xlu0 %1090  ;;  %v1184_v17 = vmin.f32 %v1182_v18, %v2633_v8  ;;  %v2653_v41 = vadd.f32 %v1081_v49, %v921_v6  ;;  %v1221_v34 = vmin.f32 %v2646_v37, %v1220_v9 }
 0x22a   : > { %v926_v0 = vpop.f32.mrf.mxu1 }
 0x22b   : > { %v2641_v15 = vadd.f32 %v1086_v2, %v925_v32  ;;  %v927_v10 = vadd.f32 %v926_v0, %v2317_v11 }
 0x22c   : > { %v928_v14 = vpop.f32.mrf.mxu1 }
 0x22d   : > { %v929_v40 = vadd.f32 %v928_v14, %v2315_v7  ;;  %v1185_v7 = vmin.f32 %v1183_v47, %v2641_v15  ;;  %v2659_v54 = vadd.f32 %v1086_v2, %v927_v10  ;;  %v1222_v14 = vmin.f32 %v2653_v41, %v1221_v34 }
 0x22e   : > { %v930_v56 = vpop.f32.mrf.mxu1 }
 0x22f   : > { %v2650_v31 = vadd.f32 %v1091_v38, %v929_v40  ;;  %v931_v22 = vadd.f32 %v930_v56, %v2317_v11  ;;  %v1223_v40 = vmin.f32 %v2659_v54, %v1222_v14 }
 0x231   : > { %v1186_v32 = vmin.f32 %v1184_v17, %v2650_v31  ;;  %v2662_v18 = vadd.f32 %v1091_v38, %v931_v22 }
 0x233   : > { %v1187_v27 = vmin.f32 %v1185_v7, %v1186_v32  ;;  %v1224_v6 = vmin.f32 %v2662_v18, %v1223_v40 }
 0x235   : > { %v1188_v0 = vrot.slane %v1187_v27, 4  ;;  %v1225_v47 = vrot.slane %v1224_v6, 4 }
 0x237   : > { %v1189_v49 = vmin.f32 %v1187_v27, %v1188_v0  ;;  %v1226_v21 = vmin.f32 %v1224_v6, %v1225_v47 }
 0x239   : > { %v1190_v59 = vrot.slane %v1189_v49, 2  ;;  %v1227_v56 = vrot.slane %v1226_v21, 2 }
 0x23b   : > { %v1191_v17 = vmin.f32 %v1189_v49, %v1190_v59  ;;  %v1228_v2 = vmin.f32 %v1226_v21, %v1227_v56 }
 0x23d   : > { %v1192_v11 = vrot.slane %v1191_v17, 1  ;;  %v1229_v38 = vrot.slane %v1228_v2, 1 }
 0x23f   : > { %v2666_v9 = vmin.f32 %v1191_v17, %v1192_v11  ;;  %v2708_v34 = vmin.f32 %v1228_v2, %v1229_v38 }
 0x241   : > { %vm1231_vm4 = vcmp.eq.f32.partialorder %v2338_v33, %v2666_v9  ;;  %vm1233_vm5 = vcmp.eq.f32.partialorder %v2361_v55, %v2666_v9  ;;  %vm1235_vm6 = vcmp.eq.f32.partialorder %v2354_v48, %v2666_v9  ;;  %vm1237_vm7 = vcmp.eq.f32.partialorder %v2383_v53, %v2666_v9 }
 0x242   : > { %v2677_v10 = vsel %vm1231_vm4, inf, %v2338_v33  ;;  %v2680_v7 = vsel %vm1233_vm5, inf, %v2361_v55  ;;  %v2683_v21 = vsel %vm1235_vm6, inf, %v2354_v48  ;;  %v2686_v32 = vsel %vm1237_vm7, inf, %v2383_v53  ;;  %v3693_v55 = vld [vmem:[#allocation10_spill] sm:$0xff] }
 0x243   : > { %vm1239_vm8 = vcmp.eq.f32.partialorder %v2393_v5, %v2666_v9  ;;  %vm1241_vm9 = vcmp.eq.f32.partialorder %v2422_v63, %v2666_v9  ;;  %vm1243_vm10 = vcmp.eq.f32.partialorder %v2415_v51, %v2666_v9  ;;  %vm1245_vm11 = vcmp.eq.f32.partialorder %v2451_v26, %v2666_v9 }
 0x244   : > { %v1359_v33 = vmin.f32 %v2677_v10, %v2683_v21  ;;  %v1360_v48 = vmin.f32 %v2680_v7, %v2686_v32  ;;  %vm1247_vm12 = vcmp.eq.f32.partialorder %v3693_v55, %v2666_v9  ;;  %v2703_v53 = vsel %vm1239_vm8, inf, %v2393_v5 }
 0x245   : > { %v2706_v22 = vsel %vm1241_vm9, inf, %v2422_v63  ;;  %vm1249_vm13 = vcmp.eq.f32.partialorder %v2465_v52, %v2666_v9  ;;  %vm1251_vm14 = vcmp.eq.f32.partialorder %v2468_v25, %v2666_v9  ;;  %vm1253_vm15 = vcmp.eq.f32.partialorder %v2500_v57, %v2666_v9 }
 0x246   : > { %v1361_v27 = vmin.f32 %v1359_v33, %v2703_v53  ;;  %v1362_v14 = vmin.f32 %v1360_v48, %v2706_v22  ;;  %vm1255_vm0 = vcmp.eq.f32.partialorder %v2342_v39, %v2666_v9  ;;  %v2721_v5 = vsel %vm1243_vm10, inf, %v2415_v51 }
 0x247   : > { %v2724_v63 = vsel %vm1245_vm11, inf, %v2451_v26  ;;  %vm1257_vm1 = vcmp.eq.f32.partialorder %v2363_v46, %v2666_v9  ;;  %vm1259_vm2 = vcmp.eq.f32.partialorder %v2390_v60, %v2666_v9  ;;  %vm1261_vm3 = vcmp.eq.f32.partialorder %v2514_v36, %v2666_v9 }
 0x248   : > { %v1363_v0 = vmin.f32 %v1361_v27, %v2721_v5  ;;  %v1364_v40 = vmin.f32 %v1362_v14, %v2724_v63  ;;  %vm1263_vm4 = vcmp.eq.f32.partialorder %v2540_v24, %v2666_v9  ;;  %v2740_v51 = vsel %vm1247_vm12, inf, %v3693_v55  ;;  %v3694_v27 = vld [vmem:[#allocation8_spill] sm:$0xff]  ;;  %v3695_v14 = vld [vmem:[#allocation11_spill] sm:$0xff] }
 0x249   : > { %v2743_v26 = vsel %vm1249_vm13, inf, %v2465_v52  ;;  %vm1265_vm5 = vcmp.eq.f32.partialorder %v2552_v44, %v2666_v9  ;;  %vm1267_vm6 = vcmp.eq.f32.partialorder %v2563_v20, %v2666_v9  ;;  %vm1269_vm7 = vcmp.eq.f32.partialorder %v2571_v61, %v2666_v9 }
 0x24a   : > { %v1365_v49 = vmin.f32 %v1363_v0, %v2740_v51  ;;  %v1366_v6 = vmin.f32 %v1364_v40, %v2743_v26  ;;  %vm1271_vm8 = vcmp.eq.f32.partialorder %v2580_v43, %v2666_v9  ;;  %v2759_v52 = vsel %vm1251_vm14, inf, %v2468_v25  ;;  %v3696_v40 = vld [vmem:[#allocation4_spill] sm:$0xff] }
 0x24b   : > { %v2765_v59 = vsel %vm1253_vm15, inf, %v2500_v57  ;;  %vm1273_vm9 = vcmp.eq.f32.partialorder %v2586_v23, %v2666_v9  ;;  %vm1275_vm10 = vcmp.eq.f32.partialorder %v2592_v58, %v2666_v9  ;;  %vm1277_vm11 = vcmp.eq.f32.partialorder %v2599_v45, %v2666_v9 }
 0x24c   : > { %v1367_v47 = vmin.f32 %v1365_v49, %v2759_v52  ;;  %v1368_v17 = vmin.f32 %v1366_v6, %v2765_v59  ;;  %vm1279_vm12 = vcmp.eq.f32.partialorder %v2608_v35, %v2666_v9  ;;  %v2781_v25 = vsel %vm1255_vm0, inf, %v2342_v39  ;;  %v3697_v49 = vld [vmem:[#allocation6_spill] sm:$0xff] }
 0x24d   : > { %v2787_v57 = vsel %vm1257_vm1, inf, %v2363_v46  ;;  %vm1281_vm13 = vcmp.eq.f32.partialorder %v2614_v19, %v2666_v9  ;;  %vm1283_vm14 = vcmp.eq.f32.partialorder %v2621_v3, %v2666_v9  ;;  %vm1287_vm0 = vcmp.eq.f32.partialorder %v2630_v4, %v2666_v9 }
 0x24e   : > { %v1369_v11 = vmin.f32 %v1367_v47, %v2781_v25  ;;  %v1370_v56 = vmin.f32 %v1368_v17, %v2787_v57  ;;  %v2803_v39 = vsel %vm1259_vm2, inf, %v2390_v60  ;;  %v2809_v46 = vsel %vm1261_vm3, inf, %v2514_v36 }
 0x24f   : > { %vm1289_vm1 = vcmp.eq.f32.partialorder %v2633_v8, %v2666_v9  ;;  %vm1291_vm15 = vcmp.eq.f32.partialorder %v2641_v15, %v2666_v9  ;;  %vm1293_vm2 = vcmp.eq.f32.partialorder %v2650_v31, %v2666_v9  ;;  %v2823_v60 = vsel %vm1263_vm4, inf, %v2540_v24 }
 0x250   : > { %v1371_v2 = vmin.f32 %v1369_v11, %v2803_v39  ;;  %v1372_v38 = vmin.f32 %v1370_v56, %v2809_v46  ;;  %v2829_v36 = vsel %vm1265_vm5, inf, %v2552_v44  ;;  %v2835_v33 = vsel %vm1267_vm6, inf, %v2563_v20 }
 0x251   : > { %v2841_v48 = vsel %vm1269_vm7, inf, %v2571_v61  ;;  %vm1262_vm3 = vcmp.eq.f32.partialorder %v3694_v27, %v2708_v34  ;;  %v2851_v44 = vsel %vm1271_vm8, inf, %v2580_v43  ;;  %v2857_v20 = vsel %vm1273_vm9, inf, %v2586_v23 }
 0x252   : > { %v1373_v24 = vmin.f32 %v1371_v2, %v2823_v60  ;;  %v1374_v55 = vmin.f32 %v1372_v38, %v2829_v36  ;;  %v2863_v61 = vsel %vm1275_vm10, inf, %v2592_v58  ;;  %vm1264_vm4 = vcmp.eq.f32.partialorder %v3695_v14, %v2708_v34 }
 0x253   : > { %v2871_v43 = vsel %vm1277_vm11, inf, %v2599_v45  ;;  %v2877_v23 = vsel %vm1279_vm12, inf, %v2608_v35  ;;  %vm1232_vm5 = vcmp.eq.f32.partialorder %v3696_v40, %v2708_v34  ;;  %vm1234_vm6 = vcmp.eq.f32.partialorder %v2371_v1, %v2708_v34 }
 0x254   : > { %v1375_v0 = vmin.f32 %v1373_v24, %v2835_v33  ;;  %v1376_v58 = vmin.f32 %v1374_v55, %v2841_v48  ;;  %vm1236_vm7 = vcmp.eq.f32.partialorder %v3697_v49, %v2708_v34  ;;  %v2888_v45 = vsel %vm1262_vm3, inf, %v3694_v27 }
 0x255   : > { %3698 = vst [vmem:[#allocation10_spill] sm:$0xff] %v2888_v45  ;;  %vm1238_vm8 = vcmp.eq.f32.partialorder %v2436_v12, %v2708_v34  ;;  %v2895_v47 = vsel %vm1264_vm4, inf, %v3695_v14  ;;  %v2901_v17 = vsel %vm1281_vm13, inf, %v2614_v19  ;;  %v2907_v11 = vsel %vm1283_vm14, inf, %v2621_v3  ;;  %v3700_v14 = vld [vmem:[#allocation9_spill] sm:$0xff] }
 0x256   : > { %v1377_v6 = vmin.f32 %v1375_v0, %v2851_v44  ;;  %v1378_v35 = vmin.f32 %v1376_v58, %v2857_v20  ;;  %vm3699_vm9 = vcmp.eq.f32.partialorder %v2625_v13, %v2666_v9  ;;  %v2919_v2 = vsel %vm1287_vm0, inf, %v2630_v4 }
 0x257   : > { %v2913_v56 = vsel %vm3699_vm9, inf, %v2625_v13  ;;  %v2925_v19 = vsel %vm1289_vm1, inf, %v2633_v8  ;;  %v2931_v3 = vsel %vm1291_vm15, inf, %v2641_v15  ;;  %v2939_v4 = vsel %vm1232_vm5, inf, %v3696_v40 }
 0x258   : > { %v1379_v13 = vmin.f32 %v1377_v6, %v2863_v61  ;;  %v1380_v38 = vmin.f32 %v1378_v35, %v2871_v43  ;;  %v2945_v8 = vsel %vm1234_vm6, inf, %v2371_v1  ;;  %v2951_v15 = vsel %vm1236_vm7, inf, %v3697_v49 }
 0x259   : > { %v2954_v24 = vsel %vm1238_vm8, inf, %v2436_v12  ;;  %vm1240_vm10 = vcmp.eq.f32.partialorder %v3700_v14, %v2708_v34  ;;  %vm1242_vm11 = vcmp.eq.f32.partialorder %v2519_v62, %v2708_v34  ;;  %v2966_v1 = vsel %vm1293_vm2, inf, %v2650_v31 }
 0x25a   : > { %v1381_v55 = vmin.f32 %v1379_v13, %v2877_v23  ;;  %v1382_v27 = vmin.f32 %v1380_v38, %v2901_v17  ;;  %v2969_v0 = vmax.f32 %v2666_v9, 0.0  ;;  %vm1244_vm12 = vcmp.eq.f32.partialorder %v2461_v30, %v2708_v34 }
 0x25b   : > { %vm1246_vm13 = vcmp.eq.f32.partialorder %v2532_v28, %v2708_v34  ;;  %v1396_v40 = vmin.f32 %v2939_v4, %v2951_v15  ;;  %v1397_v31 = vmin.f32 %v2945_v8, %v2954_v24  ;;  %vm1248_vm14 = vcmp.eq.f32.partialorder %v2490_v42, %v2708_v34 }
 0x25c   : > { %v1383_v12 = vmin.f32 %v1381_v55, %v2907_v11  ;;  %v1384_v58 = vmin.f32 %v1382_v27, %v2913_v56  ;;  %vm1250_vm15 = vcmp.eq.f32.partialorder %v2547_v16, %v2708_v34  ;;  %v2986_v9 = vsel %vm1240_vm10, inf, %v3700_v14  ;;  %v3703_v55 = vld [vmem:[#allocation16_spill] sm:$0xff]  ;;  %v3704_v27 = vld [vmem:[#allocation18_spill] sm:$0xff] }
 0x25d   : > { %3701 = vst [vmem:[#allocation8_spill] sm:$0xff] %v2986_v9  ;;  %v2989_v49 = vsel %vm1242_vm11, inf, %v2519_v62  ;;  %v1398_v13 = vmin.f32 %v1396_v40, %v2986_v9  ;;  %vm1252_vm0 = vcmp.eq.f32.partialorder %v3703_v55, %v2708_v34  ;;  %vm1254_vm1 = vcmp.eq.f32.partialorder %v3704_v27, %v2708_v34 }
 0x25e   : > { %3702 = vst [vmem:[#allocation11_spill] sm:$0xff] %v2989_v49  ;;  %v1385_v6 = vmin.f32 %v1383_v12, %v2919_v2  ;;  %v1386_v35 = vmin.f32 %v1384_v58, %v2925_v19  ;;  %v1399_v38 = vmin.f32 %v1397_v31, %v2989_v49  ;;  %v3003_v62 = vsel %vm1244_vm12, inf, %v2461_v30  ;;  %v3707_v49 = vld [vmem:[#allocation5_spill] sm:$0xff] }
 0x25f   : > { %3705 = vst [vmem:[#allocation4_spill] sm:$0xff] %v3003_v62  ;;  %v3009_v14 = vsel %vm1246_vm13, inf, %v2532_v28  ;;  %v1400_v40 = vmin.f32 %v1398_v13, %v3003_v62  ;;  %1913 = vrsqrt.f32 %v2969_v0  ;;  %vm1256_vm2 = vcmp.eq.f32.partialorder %v3707_v49, %v2708_v34 }
 0x260   : > { %3706 = vst [vmem:[#allocation6_spill] sm:$0xff] %v3009_v14  ;;  %v1387_v12 = vmin.f32 %v1385_v6, %v2931_v3  ;;  %v1388_v58 = vmin.f32 %v1386_v35, %v2966_v1  ;;  %v1401_v31 = vmin.f32 %v1399_v38, %v3009_v14  ;;  %v3022_v30 = vsel %vm1248_vm14, inf, %v2490_v42  ;;  %v3710_v35 = vld [vmem:[#allocation3_spill] sm:$0xff]  ;;  %v3715_v14 = vld [vmem:[#allocation12_spill] sm:$0xff] }
 0x261   : > { %3708 = vst [vmem:[#allocation9_spill] sm:$0xff] %v3022_v30  ;;  %v3028_v28 = vsel %vm1250_vm15, inf, %v2547_v16  ;;  %vm1258_vm3 = vcmp.eq.f32.partialorder %v3710_v35, %v2708_v34  ;;  %v1402_v13 = vmin.f32 %v1400_v40, %v3022_v30  ;;  %v3038_v42 = vsel %vm1252_vm0, inf, %v3703_v55 }
 0x262   : > { %3709 = vst [vmem:[#allocation16_spill] sm:$0xff] %v3028_v28  ;;  %v1389_v6 = vmin.f32 %v1387_v12, %v1388_v58  ;;  %v1403_v38 = vmin.f32 %v1401_v31, %v3028_v28  ;;  %v3044_v16 = vsel %vm1254_vm1, inf, %v3704_v27  ;;  %v3712_v58 = vld [vmem:[#allocation7_spill] sm:$0xff]  ;;  %v3051_v28 = vsel %vm1256_vm2, inf, %v3707_v49  ;;  %v3718_v49 = vld [vmem:[#allocation14_spill] sm:$0xff] }
 0x263   : > { %3711 = vst [vmem:[#allocation18_spill] sm:$0xff] %v3044_v16  ;;  %vm1260_vm4 = vcmp.eq.f32.partialorder %v3712_v58, %v2708_v34  ;;  %v1404_v40 = vmin.f32 %v1402_v13, %v3038_v42  ;;  %3713 = vst [vmem:[#allocation5_spill] sm:$0xff] %v3051_v28  ;;  %v3054_v55 = vsel %vm1258_vm3, inf, %v3710_v35  ;;  %vm1266_vm5 = vcmp.eq.f32.partialorder %v3715_v14, %v2708_v34  ;;  %v3717_v13 = vld [vmem:[#allocation13_spill] sm:$0xff] }
 0x264   : > { %v1390_v12 = vrot.slane %v1389_v6, 4  ;;  %v1405_v31 = vmin.f32 %v1403_v38, %v3044_v16  ;;  %3714 = vst [vmem:[#allocation3_spill] sm:$0xff] %v3054_v55  ;;  %v3061_v9 = vsel %vm1260_vm4, inf, %v3712_v58  ;;  %vm1268_vm6 = vcmp.eq.f32.partialorder %v3717_v13, %v2708_v34  ;;  %v3719_v38 = vld [vmem:[#allocation15_spill] sm:$0xff]  ;;  %v3721_v58 = vld [vmem:[#allocation17_spill] sm:$0xff] }
 0x265   : > { %v1406_v27 = vmin.f32 %v1404_v40, %v3051_v28  ;;  %3716 = vst [vmem:[#allocation7_spill] sm:$0xff] %v3061_v9  ;;  %vm1270_vm7 = vcmp.eq.f32.partialorder %v3718_v49, %v2708_v34  ;;  %vm1272_vm8 = vcmp.eq.f32.partialorder %v3719_v38, %v2708_v34  ;;  %vm1274_vm9 = vcmp.eq.f32.partialorder %v3721_v58, %v2708_v34 }
 0x266   : > { %v1391_v30 = vmin.f32 %v1389_v6, %v1390_v12  ;;  %v1407_v62 = vmin.f32 %v1405_v31, %v3054_v55  ;;  %v3072_v12 = vsel %vm1266_vm5, inf, %v3715_v14  ;;  %v3079_v28 = vsel %vm1268_vm6, inf, %v3717_v13 }
 0x267   : > { %v1408_v35 = vmin.f32 %v1406_v27, %v3061_v9  ;;  %3720 = vst [vmem:[#allocation12_spill] sm:$0xff] %v3072_v12  ;;  %v3082_v27 = vsel %vm1270_vm7, inf, %v3718_v49  ;;  %v3087_v14 = vsel %vm1272_vm8, inf, %v3719_v38  ;;  %v3090_v9 = vsel %vm1274_vm9, inf, %v3721_v58 }
 0x268   : > { %v1409_v6 = vmin.f32 %v1407_v62, %v2888_v45  ;;  %v1392_v40 = vrot.slane %v1391_v30, 2  ;;  %vm1639_vm10 = vcmp.eq.f32.partialorder %v2969_v0, inf  ;;  %vm1641_vm11 = vcmp.eq.f32.partialorder %v2969_v0, 0.0 }
 0x269   : > { %v1410_v31 = vmin.f32 %v1408_v35, %v2895_v47  ;;  %vm1282_vm15 = vcmp.eq.f32.partialorder %v2616_v29, %v2708_v34  ;;  %vm1284_vm0 = vcmp.eq.f32.partialorder %v2628_v50, %v2708_v34  ;;  %vm1288_vm2 = vcmp.eq.f32.partialorder %v2646_v37, %v2708_v34 }
 0x26a   : > { %v1411_v55 = vmin.f32 %v1409_v6, %v3072_v12  ;;  %v1393_v35 = vmin.f32 %v1391_v30, %v1392_v40  ;;  %v3723_v30 = vld [vmem:[#allocation20_spill] sm:$0xff]  ;;  %v3724_v40 = vld [vmem:[#allocation21_spill] sm:$0xff]  ;;  %vm1290_vm3 = vcmp.eq.f32.partialorder %v2653_v41, %v2708_v34  ;;  %vm1292_vm4 = vcmp.eq.f32.partialorder %v2659_v54, %v2708_v34 }
 0x26b   : > { %v1412_v62 = vmin.f32 %v1410_v31, %v3079_v28  ;;  %vm1278_vm13 = vcmp.eq.f32.partialorder %v3723_v30, %v2708_v34  ;;  %vm1280_vm14 = vcmp.eq.f32.partialorder %v3724_v40, %v2708_v34  ;;  %vm1294_vm5 = vcmp.eq.f32.partialorder %v2662_v18, %v2708_v34 }
 0x26c   : > { %v1413_v45 = vmin.f32 %v1411_v55, %v3082_v27  ;;  %v1914_v16 = vpop.eup %1913  ;;  %v1394_v12 = vrot.slane %v1393_v35, 1  ;;  %v3722_v55 = vld [vmem:[#allocation19_spill] sm:$0xff]  ;;  %v3127_v31 = vsel %vm1278_vm13, inf, %v3723_v30  ;;  %v3158_v30 = vsel %vm1290_vm3, inf, %v2653_v41 }
 0x26d   : > { %v1414_v6 = vmin.f32 %v1412_v62, %v3087_v14  ;;  %v1638_v49 = vmul.f32 %v1914_v16, %v2969_v0  ;;  %vm1276_vm12 = vcmp.eq.f32.partialorder %v3722_v55, %v2708_v34  ;;  %v3725_v16 = vld [vmem:[#allocation22_spill] sm:$0xff]  ;;  %v3130_v62 = vsel %vm1280_vm14, inf, %v3724_v40 }
 0x26e   : > { %v1415_v13 = vmin.f32 %v1413_v45, %v3090_v9  ;;  %v3099_v38 = vmin.f32 %v1393_v35, %v1394_v12  ;;  %v1642_v45 = vand.u32 2147483648, %v2969_v0  ;;  %vm1286_vm1 = vcmp.eq.f32.partialorder %v3725_v16, %v2708_v34 }
 0x26f   : > { %v1640_v58 = vsel %vm1639_vm10, %v2969_v0, %v1638_v49  ;;  %v3124_v12 = vsel %vm1276_vm12, inf, %v3722_v55  ;;  %v3141_v35 = vsel %vm1282_vm15, inf, %v2616_v29  ;;  %v3144_v49 = vsel %vm1284_vm0, inf, %v2628_v50 }
 0x270   : > { %v3121_v0 = vsel %vm1641_vm11, %v1642_v45, %v1640_v58  ;;  %vm1433_vm6 = vcmp.eq.f32.partialorder %v2677_v10, %v3099_v38  ;;  %vm1435_vm7 = vcmp.eq.f32.partialorder %v2680_v7, %v3099_v38  ;;  %vm1437_vm8 = vcmp.eq.f32.partialorder %v2683_v21, %v3099_v38 }
 0x271   : > { %vm1439_vm9 = vcmp.eq.f32.partialorder %v2686_v32, %v3099_v38  ;;  %v3147_v55 = vsel %vm1286_vm1, inf, %v3725_v16  ;;  %v3150_v58 = vsel %vm1288_vm2, inf, %v2646_v37  ;;  %vm1441_vm10 = vcmp.eq.f32.partialorder %v2703_v53, %v3099_v38 }
 0x272   : > { %v3164_v29 = vsel %vm1292_vm4, inf, %v2659_v54  ;;  %v3170_v50 = vsel %vm1294_vm5, inf, %v2662_v18  ;;  %v1497_v37 = vsel %vm1433_vm6, inf, %v2677_v10  ;;  %v1499_v40 = vsel %vm1435_vm7, inf, %v2680_v7 }
 0x273   : > { %v1501_v45 = vsel %vm1437_vm8, inf, %v2683_v21  ;;  %v1503_v41 = vsel %vm1439_vm9, inf, %v2686_v32  ;;  %vm1443_vm11 = vcmp.eq.f32.partialorder %v2706_v22, %v3099_v38  ;;  %vm1445_vm12 = vcmp.eq.f32.partialorder %v2721_v5, %v3099_v38 }
 0x274   : > { %vm1447_vm13 = vcmp.eq.f32.partialorder %v2724_v63, %v3099_v38  ;;  %vm1449_vm14 = vcmp.eq.f32.partialorder %v2740_v51, %v3099_v38  ;;  %vm1451_vm15 = vcmp.eq.f32.partialorder %v2743_v26, %v3099_v38  ;;  %vm1453_vm0 = vcmp.eq.f32.partialorder %v2759_v52, %v3099_v38 }
 0x275   : > { %vm1455_vm1 = vcmp.eq.f32.partialorder %v2765_v59, %v3099_v38  ;;  %vm1457_vm2 = vcmp.eq.f32.partialorder %v2781_v25, %v3099_v38  ;;  %v1561_v54 = vmin.f32 %v1497_v37, %v1501_v45  ;;  %v1562_v18 = vmin.f32 %v1499_v40, %v1503_v41 }
 0x276   : > { %v3193_v10 = vmax.f32 %v3099_v38, 0.0  ;;  %v1416_v7 = vmin.f32 %v1414_v6, %v3124_v12  ;;  %vm1459_vm3 = vcmp.eq.f32.partialorder %v2787_v57, %v3099_v38  ;;  %v1505_v21 = vsel %vm1441_vm10, inf, %v2703_v53 }
 0x277   : > { %v1507_v32 = vsel %vm1443_vm11, inf, %v2706_v22  ;;  %v1417_v16 = vmin.f32 %v1415_v13, %v3127_v31  ;;  %vm1461_vm4 = vcmp.eq.f32.partialorder %v2803_v39, %v3099_v38  ;;  %v1563_v37 = vmin.f32 %v1561_v54, %v1505_v21 }
 0x278   : > { %v1564_v40 = vmin.f32 %v1562_v18, %v1507_v32  ;;  %1915 = vrsqrt.f32 %v3193_v10  ;;  %v1509_v6 = vsel %vm1445_vm12, inf, %v2721_v5  ;;  %v1511_v53 = vsel %vm1447_vm13, inf, %v2724_v63 }
 0x279   : > { %v1418_v22 = vmin.f32 %v1416_v7, %v3130_v62  ;;  %v1419_v13 = vmin.f32 %v1417_v16, %v3141_v35  ;;  %vm1463_vm5 = vcmp.eq.f32.partialorder %v2809_v46, %v3099_v38  ;;  %vm1465_vm6 = vcmp.eq.f32.partialorder %v2823_v60, %v3099_v38 }
 0x27a   : > { %v1565_v45 = vmin.f32 %v1563_v37, %v1509_v6  ;;  %v1566_v41 = vmin.f32 %v1564_v40, %v1511_v53  ;;  %v1513_v5 = vsel %vm1449_vm14, inf, %v2740_v51  ;;  %v1515_v63 = vsel %vm1451_vm15, inf, %v2743_v26 }
 0x27b   : > { %v1420_v54 = vmin.f32 %v1418_v22, %v3144_v49  ;;  %v1421_v18 = vmin.f32 %v1419_v13, %v3147_v55  ;;  %vm1467_vm7 = vcmp.eq.f32.partialorder %v2829_v36, %v3099_v38  ;;  %vm1469_vm8 = vcmp.eq.f32.partialorder %v2835_v33, %v3099_v38 }
 0x27c   : > { %v1567_v7 = vmin.f32 %v1565_v45, %v1513_v5  ;;  %v1568_v21 = vmin.f32 %v1566_v41, %v1515_v63  ;;  %v1517_v51 = vsel %vm1453_vm0, inf, %v2759_v52  ;;  %v1519_v26 = vsel %vm1455_vm1, inf, %v2765_v59 }
 0x27d   : > { %v1422_v32 = vmin.f32 %v1420_v54, %v3150_v58  ;;  %v1423_v16 = vmin.f32 %v1421_v18, %v3158_v30  ;;  %vm1471_vm9 = vcmp.eq.f32.partialorder %v2841_v48, %v3099_v38  ;;  %vm1473_vm10 = vcmp.eq.f32.partialorder %v2851_v44, %v3099_v38 }
 0x27e   : > { %v1569_v37 = vmin.f32 %v1567_v7, %v1517_v51  ;;  %v1570_v40 = vmin.f32 %v1568_v21, %v1519_v26  ;;  %v1521_v52 = vsel %vm1457_vm2, inf, %v2781_v25  ;;  %v1523_v59 = vsel %vm1459_vm3, inf, %v2787_v57 }
 0x27f   : > { %v1424_v6 = vmin.f32 %v1422_v32, %v3164_v29  ;;  %v1425_v53 = vmin.f32 %v1423_v16, %v3170_v50  ;;  %vm1475_vm11 = vcmp.eq.f32.partialorder %v2857_v20, %v3099_v38  ;;  %vm1477_vm12 = vcmp.eq.f32.partialorder %v2863_v61, %v3099_v38 }
 0x280   : > { %v1571_v22 = vmin.f32 %v1569_v37, %v1521_v52  ;;  %v1572_v13 = vmin.f32 %v1570_v40, %v1523_v59  ;;  %vm1479_vm13 = vcmp.eq.f32.partialorder %v2871_v43, %v3099_v38  ;;  %v1525_v25 = vsel %vm1461_vm4, inf, %v2803_v39 }
 0x281   : > { %v1527_v57 = vsel %vm1463_vm5, inf, %v2809_v46  ;;  %v1426_v45 = vmin.f32 %v1424_v6, %v1425_v53  ;;  %vm1481_vm14 = vcmp.eq.f32.partialorder %v2877_v23, %v3099_v38  ;;  %vm1483_vm15 = vcmp.eq.f32.partialorder %v2901_v17, %v3099_v38 }
 0x282   : > { %v1573_v41 = vmin.f32 %v1571_v22, %v1525_v25  ;;  %v1574_v5 = vmin.f32 %v1572_v13, %v1527_v57  ;;  %vm1485_vm0 = vcmp.eq.f32.partialorder %v2907_v11, %v3099_v38  ;;  %v1529_v39 = vsel %vm1465_vm6, inf, %v2823_v60 }
 0x283   : > { %v1531_v46 = vsel %vm1467_vm7, inf, %v2829_v36  ;;  %v1427_v63 = vrot.slane %v1426_v45, 4  ;;  %vm1487_vm1 = vcmp.eq.f32.partialorder %v2913_v56, %v3099_v38  ;;  %vm1489_vm2 = vcmp.eq.f32.partialorder %v2919_v2, %v3099_v38 }
 0x284   : > { %v1575_v54 = vmin.f32 %v1573_v41, %v1529_v39  ;;  %v1576_v18 = vmin.f32 %v1574_v5, %v1531_v46  ;;  %vm1491_vm3 = vcmp.eq.f32.partialorder %v2925_v19, %v3099_v38  ;;  %v1533_v60 = vsel %vm1469_vm8, inf, %v2835_v33 }
 0x285   : > { %v1916_v7 = vpop.eup %1915  ;;  %v1535_v36 = vsel %vm1471_vm9, inf, %v2841_v48  ;;  %v1428_v21 = vmin.f32 %v1426_v45, %v1427_v63  ;;  %v1537_v51 = vsel %vm1473_vm10, inf, %v2851_v44  ;;  %v1539_v33 = vsel %vm1475_vm11, inf, %v2857_v20 }
 0x286   : > { %v1577_v26 = vmin.f32 %v1575_v54, %v1533_v60  ;;  %v1578_v32 = vmin.f32 %v1576_v18, %v1535_v36  ;;  %v1654_v16 = vmul.f32 %v1916_v7, %v3193_v10  ;;  %vm1655_vm4 = vcmp.eq.f32.partialorder %v3193_v10, inf  ;;  %v3729_v54 = vld [vmem:[#allocation6_spill] sm:$0xff]  ;;  %v3730_v18 = vld [vmem:[#allocation9_spill] sm:$0xff]  ;;  %v3731_v7 = vld [vmem:[#allocation16_spill] sm:$0xff] }
 0x287   : > { %v1658_v37 = vand.u32 2147483648, %v3193_v10  ;;  %v1429_v48 = vrot.slane %v1428_v21, 2  ;;  %vm1657_vm5 = vcmp.eq.f32.partialorder %v3193_v10, 0.0  ;;  %v1541_v44 = vsel %vm1477_vm12, inf, %v2863_v61 }
 0x288   : > { %v1579_v40 = vmin.f32 %v1577_v26, %v1537_v51  ;;  %v1580_v52 = vmin.f32 %v1578_v32, %v1539_v33  ;;  %v1656_v59 = vsel %vm1655_vm4, %v3193_v10, %v1654_v16  ;;  %v1543_v20 = vsel %vm1479_vm13, inf, %v2871_v43  ;;  %v3733_v51 = vld [vmem:[#allocation5_spill] sm:$0xff]  ;;  %v3734_v26 = vld [vmem:[#allocation3_spill] sm:$0xff]  ;;  %v3736_v16 = vld [vmem:[#allocation10_spill] sm:$0xff] }
 0x289   : > { %v3322_v6 = vsel %vm1657_vm5, %v1658_v37, %v1656_v59  ;;  %v1430_v53 = vmin.f32 %v1428_v21, %v1429_v48  ;;  %vm1493_vm6 = vcmp.eq.f32.partialorder %v2931_v3, %v3099_v38  ;;  %vm1495_vm7 = vcmp.eq.f32.partialorder %v2966_v1, %v3099_v38  ;;  %v3728_v38 = vld [vmem:[#allocation4_spill] sm:$0xff]  ;;  %v3732_v21 = vld [vmem:[#allocation18_spill] sm:$0xff]  ;;  %v3735_v32 = vld [vmem:[#allocation7_spill] sm:$0xff] }
 0x28a   : > { %v1581_v22 = vmin.f32 %v1579_v40, %v1541_v44  ;;  %v1582_v13 = vmin.f32 %v1580_v52, %v1543_v20  ;;  %v1683_v10 = vsub.f32 %v3121_v0, %v3322_v6  ;;  %v1545_v61 = vsel %vm1481_vm14, inf, %v2877_v23  ;;  %v3737_v37 = vld [vmem:[#allocation12_spill] sm:$0xff] }
 0x28b   : > { %v1547_v43 = vsel %vm1483_vm15, inf, %v2901_v17  ;;  %v1431_v25 = vrot.slane %v1430_v53, 1  ;;  %v1549_v57 = vsel %vm1485_vm0, inf, %v2907_v11  ;;  %v3343_v5 = vmax.f32 %v2708_v34, 0.0 }
 0x28c   : > { %v1583_v45 = vmin.f32 %v1581_v22, %v1545_v61  ;;  %v1584_v41 = vmin.f32 %v1582_v13, %v1547_v43  ;;  %v1551_v23 = vsel %vm1487_vm1, inf, %v2913_v56  ;;  %v1553_v17 = vsel %vm1489_vm2, inf, %v2919_v2 }
 0x28d   : > { %v1555_v11 = vsel %vm1491_vm3, inf, %v2925_v19  ;;  %v3357_v39 = vmin.f32 %v1430_v53, %v1431_v25  ;;  %v1557_v34 = vsel %vm1493_vm6, inf, %v2931_v3  ;;  %v1559_v46 = vsel %vm1495_vm7, inf, %v2966_v1  ;;  %v3726_v3 = vld [vmem:[#allocation8_spill] sm:$0xff]  ;;  %v3727_v1 = vld [vmem:[#allocation11_spill] sm:$0xff] }
 0x28e   : > { %v1585_v56 = vmin.f32 %v1583_v45, %v1549_v57  ;;  %v1586_v63 = vmin.f32 %v1584_v41, %v1551_v23  ;;  %1917 = vrsqrt.f32 %v3343_v5 }
 0x28f   : > { %vm1434_vm8 = vcmp.eq.f32.partialorder %v2939_v4, %v3357_v39  ;;  %vm1436_vm9 = vcmp.eq.f32.partialorder %v2945_v8, %v3357_v39  ;;  %vm1438_vm10 = vcmp.eq.f32.partialorder %v2951_v15, %v3357_v39  ;;  %vm1440_vm11 = vcmp.eq.f32.partialorder %v2954_v24, %v3357_v39 }
 0x290   : > { %v1587_v2 = vmin.f32 %v1585_v56, %v1553_v17  ;;  %v1588_v19 = vmin.f32 %v1586_v63, %v1555_v11  ;;  %vm1442_vm12 = vcmp.eq.f32.partialorder %v3726_v3, %v3357_v39  ;;  %vm1444_vm13 = vcmp.eq.f32.partialorder %v3727_v1, %v3357_v39 }
 0x291   : > { %vm1446_vm14 = vcmp.eq.f32.partialorder %v3728_v38, %v3357_v39  ;;  %vm1448_vm15 = vcmp.eq.f32.partialorder %v3729_v54, %v3357_v39  ;;  %vm1450_vm0 = vcmp.eq.f32.partialorder %v3730_v18, %v3357_v39  ;;  %vm1484_vm3 = vcmp.eq.f32.partialorder %v3141_v35, %v3357_v39 }
 0x292   : > { %v1589_v60 = vmin.f32 %v1587_v2, %v1557_v34  ;;  %v1590_v36 = vmin.f32 %v1588_v19, %v1559_v46  ;;  %vm1486_vm4 = vcmp.eq.f32.partialorder %v3144_v49, %v3357_v39  ;;  %vm1488_vm5 = vcmp.eq.f32.partialorder %v3147_v55, %v3357_v39 }
 0x293   : > { %vm1490_vm6 = vcmp.eq.f32.partialorder %v3150_v58, %v3357_v39  ;;  %vm1492_vm7 = vcmp.eq.f32.partialorder %v3158_v30, %v3357_v39  ;;  %vm1494_vm1 = vcmp.eq.f32.partialorder %v3164_v29, %v3357_v39  ;;  %vm1496_vm2 = vcmp.eq.f32.partialorder %v3170_v50, %v3357_v39 }
 0x294   : > { %v1591_v33 = vmin.f32 %v1589_v60, %v1590_v36  ;;  %v1498_v52 = vsel %vm1434_vm8, inf, %v2939_v4  ;;  %v1500_v59 = vsel %vm1436_vm9, inf, %v2945_v8  ;;  %v1502_v44 = vsel %vm1438_vm10, inf, %v2951_v15 }
 0x295   : > { %v1504_v20 = vsel %vm1440_vm11, inf, %v2954_v24  ;;  %v1506_v4 = vsel %vm1442_vm12, inf, %v3726_v3  ;;  %v1508_v8 = vsel %vm1444_vm13, inf, %v3727_v1  ;;  %v1510_v15 = vsel %vm1446_vm14, inf, %v3728_v38 }
 0x296   : > { %v1592_v48 = vrot.slane %v1591_v33, 4  ;;  %v1512_v24 = vsel %vm1448_vm15, inf, %v3729_v54  ;;  %v1514_v22 = vsel %vm1450_vm0, inf, %v3730_v18  ;;  %vm3738_vm8 = vcmp.eq.f32.partialorder %v3731_v7, %v3357_v39 }
 0x297   : > { %v1516_v13 = vsel %vm3738_vm8, inf, %v3731_v7  ;;  %vm3739_vm9 = vcmp.eq.f32.partialorder %v3038_v42, %v3357_v39  ;;  %vm3740_vm10 = vcmp.eq.f32.partialorder %v3732_v21, %v3357_v39  ;;  %vm3741_vm11 = vcmp.eq.f32.partialorder %v3733_v51, %v3357_v39 }
 0x298   : > { %v1593_v40 = vmin.f32 %v1591_v33, %v1592_v48  ;;  %v1518_v61 = vsel %vm3739_vm9, inf, %v3038_v42  ;;  %v1520_v43 = vsel %vm3740_vm10, inf, %v3732_v21  ;;  %v1522_v57 = vsel %vm3741_vm11, inf, %v3733_v51 }
 0x299   : > { %vm3742_vm12 = vcmp.eq.f32.partialorder %v3734_v26, %v3357_v39  ;;  %vm3743_vm13 = vcmp.eq.f32.partialorder %v3735_v32, %v3357_v39  ;;  %vm3744_vm14 = vcmp.eq.f32.partialorder %v3736_v16, %v3357_v39  ;;  %vm3745_vm15 = vcmp.eq.f32.partialorder %v2895_v47, %v3357_v39 }
 0x29a   : > { %v1594_v53 = vrot.slane %v1593_v40, 2  ;;  %v1524_v45 = vsel %vm3742_vm12, inf, %v3734_v26  ;;  %v1526_v42 = vsel %vm3743_vm13, inf, %v3735_v32  ;;  %v1528_v41 = vsel %vm3744_vm14, inf, %v3736_v16 }
 0x29b   : > { %v1530_v23 = vsel %vm3745_vm15, inf, %v2895_v47  ;;  %vm3746_vm0 = vcmp.eq.f32.partialorder %v3737_v37, %v3357_v39  ;;  %vm3747_vm8 = vcmp.eq.f32.partialorder %v3079_v28, %v3357_v39  ;;  %vm3748_vm9 = vcmp.eq.f32.partialorder %v3082_v27, %v3357_v39  ;;  %v1918_v18 = vpop.eup %1917 }
 0x29c   : > { %v1595_v25 = vmin.f32 %v1593_v40, %v1594_v53  ;;  %v1532_v17 = vsel %vm3746_vm0, inf, %v3737_v37  ;;  %v1534_v34 = vsel %vm3747_vm8, inf, %v3079_v28  ;;  %v1536_v46 = vsel %vm3748_vm9, inf, %v3082_v27 }
 0x29d   : > { %vm3749_vm10 = vcmp.eq.f32.partialorder %v3087_v14, %v3357_v39  ;;  %vm3750_vm11 = vcmp.eq.f32.partialorder %v3090_v9, %v3357_v39  ;;  %vm3751_vm12 = vcmp.eq.f32.partialorder %v3124_v12, %v3357_v39  ;;  %vm3752_vm13 = vcmp.eq.f32.partialorder %v3127_v31, %v3357_v39 }
 0x29e   : > { %v1596_v11 = vrot.slane %v1595_v25, 1  ;;  %v1538_v47 = vsel %vm3749_vm10, inf, %v3087_v14  ;;  %v1540_v56 = vsel %vm3750_vm11, inf, %v3090_v9  ;;  %v3521_v28 = vsel %vm3751_vm12, inf, %v3124_v12 }
 0x29f   : > { %v3527_v27 = vsel %vm3752_vm13, inf, %v3127_v31  ;;  %vm3753_vm14 = vcmp.eq.f32.partialorder %v3130_v62, %v3357_v39  ;;  %v1548_v9 = vsel %vm1484_vm3, inf, %v3141_v35  ;;  %v3541_v12 = vsel %vm1486_vm4, inf, %v3144_v49 }
 0x2a0   : > { %v1546_v14 = vsel %vm3753_vm14, inf, %v3130_v62  ;;  %v1597_v63 = vmin.f32 %v1595_v25, %v1596_v11  ;;  %v3547_v31 = vsel %vm1488_vm5, inf, %v3147_v55  ;;  %v1554_v62 = vsel %vm1490_vm6, inf, %v3150_v58 }
 0x2a1   : > { %v1556_v35 = vsel %vm1492_vm7, inf, %v3158_v30  ;;  %v3561_v49 = vsel %vm1494_vm1, inf, %v3164_v29  ;;  %v3567_v55 = vsel %vm1496_vm2, inf, %v3170_v50  ;;  %v1598_v19 = vmin.f32 %v1498_v52, %v1502_v44 }
 0x2a2   : > { %v1667_v2 = vmax.f32 %v1597_v63, 0.0  ;;  %v1599_v58 = vmin.f32 %v1500_v59, %v1504_v20  ;;  %v1652_v3 = vmax.f32 %v3357_v39, 0.0  ;;  %v1645_v50 = vmul.f32 %v1918_v18, %v3343_v5 }
 0x2a3   : > { %v1600_v1 = vmin.f32 %v1598_v19, %v1506_v4  ;;  %vm1646_vm1 = vcmp.eq.f32.partialorder %v3343_v5, inf  ;;  %vm1648_vm2 = vcmp.eq.f32.partialorder %v3343_v5, 0.0  ;;  %v1649_v48 = vand.u32 2147483648, %v3343_v5 }
 0x2a4   : > { %1919 = vrsqrt.f32 %v1667_v2  ;;  %v1601_v30 = vmin.f32 %v1599_v58, %v1508_v8  ;;  %v1647_v37 = vsel %vm1646_vm1, %v3343_v5, %v1645_v50  ;;  %vm1671_vm3 = vcmp.eq.f32.partialorder %v1667_v2, inf }
 0x2a5   : > { %1921 = vrsqrt.f32 %v1652_v3  ;;  %v1602_v38 = vmin.f32 %v1600_v1, %v1510_v15  ;;  %vm1673_vm4 = vcmp.eq.f32.partialorder %v1667_v2, 0.0  ;;  %v1685_v59 = vmul.f32 1.442695, %v1683_v10 }
 0x2a6   : > { %v1603_v54 = vmin.f32 %v1601_v30, %v1512_v24  ;;  %v1674_v44 = vand.u32 2147483648, %v1667_v2  ;;  %vm1662_vm5 = vcmp.eq.f32.partialorder %v1652_v3, inf  ;;  %vm1664_vm6 = vcmp.eq.f32.partialorder %v1652_v3, 0.0 }
 0x2a7   : > { %v1604_v29 = vmin.f32 %v1602_v38, %v1514_v22  ;;  %v1665_v15 = vand.u32 2147483648, %v1652_v3  ;;  %1923 = vpow2.f32 %v1685_v59  ;;  %v1650_v25 = vsel %vm1648_vm2, %v1649_v48, %v1647_v37 }
 0x2a8   : > { %v1605_v7 = vmin.f32 %v1603_v54, %v1516_v13  ;;  %v1709_v50 = vlaneseq }
 0x2a9   : > { %v1606_v60 = vmin.f32 %v1604_v29, %v1518_v61 }
 0x2aa   : > { %v1607_v36 = vmin.f32 %v1605_v7, %v1520_v43  ;;  %vm1723_vm0 = vcmp.lt.s32.totalorder %v1709_v50, 256 }
 0x2ab   : > { %v1608_v21 = vmin.f32 %v1606_v60, %v1522_v57 }
 0x2ac   : > { %v1609_v51 = vmin.f32 %v1607_v36, %v1524_v45 }
 0x2ad   : > { %v1610_v26 = vmin.f32 %v1608_v21, %v1526_v42 }
 0x2ae   : > { %v1611_v32 = vmin.f32 %v1609_v51, %v1528_v41  ;;  %v1962_v51 = vmov 1966171168  }
 0x2af   : > { %v1612_v16 = vmin.f32 %v1610_v26, %v1530_v23 }
 0x2b0   : > { %v1613_v33 = vmin.f32 %v1611_v32, %v1532_v17  ;;  %v1710_v32 = vshrl.u32 %v1709_v50, 7 }
 0x2b1   : > { %v1920_v39 = vpop.eup %1919  ;;  %v1614_v20 = vmin.f32 %v1612_v16, %v1534_v34 }
 0x2b2   : > { %v1922_v40 = vpop.eup %1921  ;;  %v1670_v52 = vmul.f32 %v1920_v39, %v1667_v2  ;;  %v1615_v4 = vmin.f32 %v1613_v33, %v1536_v46 }
 0x2b3   : > { %v1661_v53 = vmul.f32 %v1922_v40, %v1652_v3  ;;  %v1616_v22 = vmin.f32 %v1614_v20, %v1538_v47 }
 0x2b4   : > { %v1672_v8 = vsel %vm1671_vm3, %v1667_v2, %v1670_v52  ;;  %v1617_v13 = vmin.f32 %v1615_v4, %v1540_v56  ;;  %v1924_v63 = vpop.eup %1923 }
 0x2b5   : > { %v1675_v24 = vsel %vm1673_vm4, %v1674_v44, %v1672_v8  ;;  %v1663_v61 = vsel %vm1662_vm5, %v1652_v3, %v1661_v53  ;;  %v1618_v10 = vmin.f32 %v1616_v22, %v3521_v28 }
 0x2b6   : > { %v1691_v43 = vsub.f32 %v3121_v0, %v1675_v24  ;;  %v1666_v6 = vsel %vm1664_vm6, %v1665_v15, %v1663_v61  ;;  %v1619_v57 = vmin.f32 %v1617_v13, %v3527_v27  ;;  %v1689_v27 = vadd.f32 1.0, %v1924_v63 }
 0x2b7   : > { %v1684_v45 = vsub.f32 %v1650_v25, %v1666_v6  ;;  %v1620_v41 = vmin.f32 %v1618_v10, %v1546_v14 }
 0x2b8   : > { %v1693_v42 = vmul.f32 1.442695, %v1691_v43  ;;  %v1621_v23 = vmin.f32 %v1619_v57, %v1548_v9 }
 0x2b9   : > { %v1622_v17 = vmin.f32 %v1620_v41, %v3541_v12 }
 0x2ba   : > { %1925 = vpow2.f32 %v1693_v42  ;;  %v1623_v11 = vmin.f32 %v1621_v23, %v3547_v31 }
 0x2bb   : > { %v1624_v34 = vmin.f32 %v1622_v17, %v1554_v62 }
 0x2bc   : > { %v1625_v46 = vmin.f32 %v1623_v11, %v1556_v35 }
 0x2bd   : > { %v1626_v47 = vmin.f32 %v1624_v34, %v3561_v49 }
 0x2be   : > { %v1627_v5 = vmin.f32 %v1625_v46, %v3567_v55  ;;  %v1687_v55 = vmul.f32 1.442695, %v1684_v45 }
 0x2c0   : > { %v1628_v56 = vmin.f32 %v1626_v47, %v1627_v5 }
 0x2c2   : > { %v1629_v28 = vrot.slane %v1628_v56, 4 }
 0x2c4   : > { %v1630_v2 = vmin.f32 %v1628_v56, %v1629_v28 }
 0x2c6   : > { %v1631_v58 = vrot.slane %v1630_v2, 2 }
 0x2c7   : > { %v1926_v19 = vpop.eup %1925 }
 0x2c8   : > { %v1697_v14 = vadd.f32 %v1926_v19, %v1689_v27  ;;  %v1632_v9 = vmin.f32 %v1630_v2, %v1631_v58 }
 0x2ca   : > { %1927 = vrcp.f32 %v1697_v14  ;;  %v1633_v3 = vrot.slane %v1632_v9, 1 }
 0x2cc   : > { %v1634_v12 = vmin.f32 %v1632_v9, %v1633_v3 }
 0x2ce   : > { %v1668_v1 = vmax.f32 %v1634_v12, 0.0 }
 0x2d0   : > { %1929 = vrsqrt.f32 %v1668_v1  ;;  %vm1678_vm7 = vcmp.eq.f32.partialorder %v1668_v1, inf  ;;  %v1681_v30 = vand.u32 2147483648, %v1668_v1  ;;  %vm1680_vm15 = vcmp.eq.f32.partialorder %v1668_v1, 0.0 }
 0x2d1   : > { %1931 = vpow2.f32 %v1687_v55 }
 0x2d7   : > { %v1928_v31 = vpop.eup %1927 }
 0x2d8   : > { %v1701_v62 = vmul.f32 %v1928_v31, %v3121_v0  ;;  %v1707_v0 = vunpack.c.l.s4 %v1962_v51 }
 0x2da   : > { %v1708_v26 = vunpack.c.0.s8 %v1707_v0 }
 0x2dc   : > { %v1711_v33 = vsub.s32 %v1708_v26, %v1710_v32 }
 0x2dd   : > { %v1930_v35 = vpop.eup %1929 }
 0x2de   : > { %v1677_v49 = vmul.f32 %v1930_v35, %v1668_v1  ;;  %v1932_v7 = vpop.eup %1931 }
 0x2df   : > { %v1690_v60 = vadd.f32 1.0, %v1932_v7 }
 0x2e0   : > { %v1679_v38 = vsel %vm1678_vm7, %v1668_v1, %v1677_v49 }
 0x2e1   : > { %v1682_v54 = vsel %vm1680_vm15, %v1681_v30, %v1679_v38 }
 0x2e2   : > { %v1692_v18 = vsub.f32 %v1650_v25, %v1682_v54 }
 0x2e4   : > { %v1695_v29 = vmul.f32 1.442695, %v1692_v18 }
 0x2e6   : > { %1933 = vpow2.f32 %v1695_v29 }
 0x2f3   : > { %v1934_v36 = vpop.eup %1933 }
 0x2f4   : > { %v1698_v21 = vadd.f32 %v1934_v36, %v1690_v60 }
 0x2f6   : > { %1935 = vrcp.f32 %v1698_v21 }
 0x303   : > { %v1936_v39 = vpop.eup %1935 }
 0x304   : > { %v1702_v16 = vmul.f32 %v1936_v39, %v1650_v25 }
 0x306   : > { %v1705_v37 = vcombine.low %v1701_v62, %v1702_v16 }
 0x308   : > { %v1712_v48 = vrot.slane %v1705_v37, %v1711_v33 }
 0x30a   : > { %v1719_v40 = vrot.slane %v1712_v48, %v1711_v33 }
 0x30c   : > { %1725 = vst.msk [vmem:[%s287_s12] sm:$0x3] %vm1723_vm0, %v1719_v40 }
 0x30d PF: > { %p12_p9 = scmp.ge.s32.totalorder %s2010_s22, 4   ;;  %s3754_s18 = smov %s1955_s19 }
 0x30e   : > { %s3755_s19 = smov %s2019_s25  ;;  %s3756_s20 = smov %s2010_s22 }
 0x30f   :  { %14 = sbr.rel (!%p12_p9) target bundleno = 2 (0x2), region = 113 }

</bundles_post_ra>
